<compile_context>
chip_gen: v6e
topology: v6e:2x2x1
jax: 0.10.0
libtpu: 0.0.40
codegen_flags: <defaults>
</compile_context>

<pallas_src>
import functools

import jax
import jax.numpy as jnp
import numpy as np
from jax.experimental import pallas as pl
from jax.experimental.pallas import tpu as pltpu

L = 34                       # sequence length implied by phi_size = 32 * 34 = 1088
C1, C2, C3, C4 = 64, 64, 64, 32
K = 3                        # Conv1d kernel size (stride 1, padding 1 -> 'same')
B_TILE = 8                   # batch rows folded into each grid step (M = 272)


def mahjong_kernel(x_ref, kp_ref, kn_ref,
                   w1, b1, w2, b2, w3, b3, w4, b4, o_ref):
    """One tile of B_TILE batch rows per grid step.

    x_ref : (M, cin) f32     flat channels-last activations, M = B_TILE * L
    kp_ref: (M, 1)   f32     1.0 except on rows that are the first of a sample
    kn_ref: (M, 1)   f32     1.0 except on rows that are the last of a sample
    w*    : (K, Cin, Cout) bf16 tap-major conv weights (VMEM-resident)
    b*    : (1, Cout) f32    biases
    o_ref : (M, 32)  f32
    """
    m = x_ref.shape[0]
    keep_prev = kp_ref[...]
    keep_next = kn_ref[...]

    def conv3(a, w_ref, b_ref):
        # 'same' Conv1d as 3 shifted matmuls.  The +-1 shifts are sublane rolls
        # (XLU); the masks zero rows that would otherwise read the neighbouring
        # sample (or wrap around the tile edge).  bf16 MXU inputs, f32 accum.
        prev = pltpu.roll(a, 1, 0) * keep_prev        # prev[i] = a[i-1]
        nxt = pltpu.roll(a, m - 1, 0) * keep_next     # nxt[i]  = a[i+1]
        acc = jnp.dot(prev.astype(jnp.bfloat16), w_ref[0],
                      preferred_element_type=jnp.float32)
        acc = acc + jnp.dot(a.astype(jnp.bfloat16), w_ref[1],
                            preferred_element_type=jnp.float32)
        acc = acc + jnp.dot(nxt.astype(jnp.bfloat16), w_ref[2],
                            preferred_element_type=jnp.float32)
        return acc + b_ref[...]

    h = conv3(x_ref[...], w1, b1)                 # conv1 (no ReLU in the module)
    h = jnp.maximum(conv3(h, w2, b2), 0.0)        # conv2 + ReLU
    h = jnp.maximum(conv3(h, w3, b3), 0.0)        # conv3 + ReLU
    h = jnp.maximum(conv3(h, w4, b4), 0.0)        # conv4 + ReLU
    o_ref[...] = h


@functools.partial(jax.jit, static_argnames=("b_tile",))
def mahjong_forward(x, params, b_tile=B_TILE):
    """x: (B, n_channels, L) float32 -> phi: (B, 32*L) = (B, 1088) float32."""
    w1, b1, w2, b2, w3, b3, w4, b4 = params
    B, cin, l = x.shape
    assert l == L
    assert b_tile % 4 == 0            # keeps M = b_tile*L a multiple of 8
    n_tiles = -(-B // b_tile)         # ceil; pad batch so every tile is full
    Bp = n_tiles * b_tile
    M = b_tile * L

    # Glue: channels-last, flat rows.  (~cin*L*4 bytes per sample, one fused
    # XLA pass - negligible next to the conv work.)
    xt = jnp.transpose(x, (0, 2, 1)).reshape(B * L, cin)
    if Bp != B:
        xt = jnp.pad(xt, ((0, (Bp - B) * L), (0, 0)))

    # Row masks for the shifted taps (same for every tile -> VMEM-resident).
    pos = np.arange(M) % L
    keep_prev = jnp.asarray((pos != 0).astype(np.float32).reshape(M, 1))
    keep_next = jnp.asarray((pos != L - 1).astype(np.float32).reshape(M, 1))

    flops = int(2 * Bp * L * K * (cin * C1 + C1 * C2 + C2 * C3 + C3 * C4))
    bytes_accessed = int(
        xt.size * 4 + Bp * L * C4 * 4 + 2 * M * 4
        + sum(int(p.size) * p.dtype.itemsize for p in params))

    out = pl.pallas_call(
        mahjong_kernel,
        out_shape=jax.ShapeDtypeStruct((Bp * L, C4), jnp.float32),
        grid_spec=pltpu.PrefetchScalarGridSpec(
            num_scalar_prefetch=0,
            grid=(n_tiles,),
            in_specs=[
                pl.BlockSpec((M, cin), lambda t: (t, 0)),       # activations
                pl.BlockSpec((M, 1), lambda t: (0, 0)),         # keep_prev
                pl.BlockSpec((M, 1), lambda t: (0, 0)),         # keep_next
                # Weights/biases: constant index_map -> DMA'd once, resident.
                pl.BlockSpec((K, cin, C1), lambda t: (0, 0, 0)),
                pl.BlockSpec((1, C1), lambda t: (0, 0)),
                pl.BlockSpec((K, C1, C2), lambda t: (0, 0, 0)),
                pl.BlockSpec((1, C2), lambda t: (0, 0)),
                pl.BlockSpec((K, C2, C3), lambda t: (0, 0, 0)),
                pl.BlockSpec((1, C3), lambda t: (0, 0)),
                pl.BlockSpec((K, C3, C4), lambda t: (0, 0, 0)),
                pl.BlockSpec((1, C4), lambda t: (0, 0)),
            ],
            out_specs=pl.BlockSpec((M, C4), lambda t: (t, 0)),
        ),
        compiler_params=pltpu.CompilerParams(
            dimension_semantics=("parallel",)),
        cost_estimate=pl.CostEstimate(
            flops=flops, transcendentals=0, bytes_accessed=bytes_accessed),
    )(xt, keep_prev, keep_next, w1, b1, w2, b2, w3, b3, w4, b4)

    # Glue: drop batch padding, then reproduce torch nn.Flatten order
    # (channel-major): (B, L, 32) -> (B, 32, L) -> (B, 1088).  Single fused
    # XLA pass over ~4.4 KB/sample.
    out = out[:B * L].reshape(B, L, C4)
    return jnp.transpose(out, (0, 2, 1)).reshape(B, C4 * L)


def init_params(key, n_channels):
    """Mimic torch.nn.Conv1d default init (uniform +-1/sqrt(C_in*K)).

    Weights stored tap-major as (K, C_in, C_out) bf16; biases (1, C_out) f32.
    w[k][ci, co] corresponds to torch_weight[co, ci, k]."""
    layer_io = [(n_channels, C1), (C1, C2), (C2, C3), (C3, C4)]
    params = []
    for cin, cout in layer_io:
        key, kw, kb = jax.random.split(key, 3)
        bound = 1.0 / np.sqrt(cin * K)
        w = jax.random.uniform(kw, (K, cin, cout), jnp.float32, -bound, bound)
        b = jax.random.uniform(kb, (1, cout), jnp.float32, -bound, bound)
        params.extend([w.astype(jnp.bfloat16), b])
    return tuple(params)


def reference_forward(x, params):
    """Pure-JAX reference doing the same bf16-weight / f32-accumulate math."""
    w1, b1, w2, b2, w3, b3, w4, b4 = params

    def conv(h, w, b):   # h: (B, L, Cin) f32
        hp = jnp.pad(h, ((0, 0), (1, 1), (0, 0)))
        acc = sum(
            jnp.dot(hp[:, k:k + L, :].astype(jnp.bfloat16), w[k],
                    preferred_element_type=jnp.float32)
            for k in range(K))
        return acc + b

    h = jnp.transpose(x, (0, 2, 1))
    h = conv(h, w1, b1)
    h = jnp.maximum(conv(h, w2, b2), 0.0)
    h = jnp.maximum(conv(h, w3, b3), 0.0)
    h = jnp.maximum(conv(h, w4, b4), 0.0)
    return jnp.transpose(h, (0, 2, 1)).reshape(x.shape[0], C4 * L)


if __name__ == "__main__":
    batch = 12          # not a multiple of B_TILE -> exercises padding; grid = 2
    n_channels = 4

    key = jax.random.PRNGKey(0)
    key, kx, kp = jax.random.split(key, 3)
    x = jax.random.normal(kx, (batch, n_channels, L), jnp.float32)
    params = init_params(kp, n_channels)

    phi = jax.block_until_ready(mahjong_forward(x, params))
    phi_ref = jax.block_until_ready(reference_forward(x, params))

    assert phi.shape == (batch, 1088)   # phi_size of the original module
    np.testing.assert_allclose(np.asarray(phi), np.asarray(phi_ref),
                               rtol=1e-2, atol=1e-2)
    print("KERNEL_OK")
</pallas_src>

<mosaic_0001>
module attributes {stable_mosaic.version = 11 : i64} {
  func.func @mahjong_kernel(%arg0: i32, %arg1: memref<272x4xf32, #tpu.memory_space<vmem>>, %arg2: memref<272x1xf32, #tpu.memory_space<vmem>>, %arg3: memref<272x1xf32, #tpu.memory_space<vmem>>, %arg4: memref<3x4x64xbf16, #tpu.memory_space<vmem>>, %arg5: memref<1x64xf32, #tpu.memory_space<vmem>>, %arg6: memref<3x64x64xbf16, #tpu.memory_space<vmem>>, %arg7: memref<1x64xf32, #tpu.memory_space<vmem>>, %arg8: memref<3x64x64xbf16, #tpu.memory_space<vmem>>, %arg9: memref<1x64xf32, #tpu.memory_space<vmem>>, %arg10: memref<3x64x32xbf16, #tpu.memory_space<vmem>>, %arg11: memref<1x32xf32, #tpu.memory_space<vmem>>, %arg12: memref<272x32xf32, #tpu.memory_space<vmem>>) attributes {dimension_semantics = [#tpu.dimension_semantics<parallel>], iteration_bounds = array<i64: 2>, scalar_prefetch = 0 : i64, scratch_operands = 0 : i64, tpu.core_type = #tpu.core_type<tc>, window_params = [{transform_indices = @transform_0, window_bounds = array<i64: 272, 4>}, {pipeline_mode = #tpu.pipeline_mode<synchronous>, transform_indices = @transform_1, window_bounds = array<i64: 272, 1>}, {pipeline_mode = #tpu.pipeline_mode<synchronous>, transform_indices = @transform_2, window_bounds = array<i64: 272, 1>}, {pipeline_mode = #tpu.pipeline_mode<synchronous>, transform_indices = @transform_3, window_bounds = array<i64: 3, 4, 64>}, {pipeline_mode = #tpu.pipeline_mode<synchronous>, transform_indices = @transform_4, window_bounds = array<i64: 1, 64>}, {pipeline_mode = #tpu.pipeline_mode<synchronous>, transform_indices = @transform_5, window_bounds = array<i64: 3, 64, 64>}, {pipeline_mode = #tpu.pipeline_mode<synchronous>, transform_indices = @transform_6, window_bounds = array<i64: 1, 64>}, {pipeline_mode = #tpu.pipeline_mode<synchronous>, transform_indices = @transform_7, window_bounds = array<i64: 3, 64, 64>}, {pipeline_mode = #tpu.pipeline_mode<synchronous>, transform_indices = @transform_8, window_bounds = array<i64: 1, 64>}, {pipeline_mode = #tpu.pipeline_mode<synchronous>, transform_indices = @transform_9, window_bounds = array<i64: 3, 64, 32>}, {pipeline_mode = #tpu.pipeline_mode<synchronous>, transform_indices = @transform_10, window_bounds = array<i64: 1, 32>}, {transform_indices = @transform_11, window_bounds = array<i64: 272, 32>}]} {
    %c0 = arith.constant 0 : index
    %c0_0 = arith.constant 0 : index
    %0 = vector.load %arg2[%c0, %c0_0] : memref<272x1xf32, #tpu.memory_space<vmem>>, vector<272x1xf32>
    %c0_1 = arith.constant 0 : index
    %c0_2 = arith.constant 0 : index
    %1 = vector.load %arg3[%c0_1, %c0_2] : memref<272x1xf32, #tpu.memory_space<vmem>>, vector<272x1xf32>
    %c0_3 = arith.constant 0 : index
    %c0_4 = arith.constant 0 : index
    %2 = vector.load %arg1[%c0_3, %c0_4] : memref<272x4xf32, #tpu.memory_space<vmem>>, vector<272x4xf32>
    %c1_i32 = arith.constant 1 : i32
    %3 = tpu.dynamic_rotate %2 by %c1_i32 dim 0 : vector<272x4xf32>, i32 -> vector<272x4xf32>
    %4 = vector.broadcast %0 : vector<272x1xf32> to vector<272x4xf32>
    %5 = arith.mulf %3, %4 : vector<272x4xf32>
    %c271_i32 = arith.constant 271 : i32
    %6 = tpu.dynamic_rotate %2 by %c271_i32 dim 0 : vector<272x4xf32>, i32 -> vector<272x4xf32>
    %7 = vector.broadcast %1 : vector<272x1xf32> to vector<272x4xf32>
    %8 = arith.mulf %6, %7 : vector<272x4xf32>
    %9 = arith.truncf %5 : vector<272x4xf32> to vector<272x4xbf16>
    %c0_5 = arith.constant 0 : index
    %c0_6 = arith.constant 0 : index
    %c0_7 = arith.constant 0 : index
    %10 = vector.load %arg4[%c0_5, %c0_6, %c0_7] : memref<3x4x64xbf16, #tpu.memory_space<vmem>>, vector<1x4x64xbf16>
    %11 = vector.shape_cast %10 : vector<1x4x64xbf16> to vector<4x64xbf16>
    %cst = arith.constant dense<0.000000e+00> : vector<272x64xf32>
    %12 = tpu.matmul %9, %11, %cst {dimension_numbers = #tpu.dot_dimension_numbers<[1], [0], [0], [1], [0, 0, 1, 1], [], []>} : vector<272x4xbf16>, vector<4x64xbf16>, vector<272x64xf32> -> vector<272x64xf32>
    %13 = arith.truncf %2 : vector<272x4xf32> to vector<272x4xbf16>
    %c1 = arith.constant 1 : index
    %c0_8 = arith.constant 0 : index
    %c0_9 = arith.constant 0 : index
    %14 = vector.load %arg4[%c1, %c0_8, %c0_9] : memref<3x4x64xbf16, #tpu.memory_space<vmem>>, vector<1x4x64xbf16>
    %15 = vector.shape_cast %14 : vector<1x4x64xbf16> to vector<4x64xbf16>
    %cst_10 = arith.constant dense<0.000000e+00> : vector<272x64xf32>
    %16 = tpu.matmul %13, %15, %cst_10 {dimension_numbers = #tpu.dot_dimension_numbers<[1], [0], [0], [1], [0, 0, 1, 1], [], []>} : vector<272x4xbf16>, vector<4x64xbf16>, vector<272x64xf32> -> vector<272x64xf32>
    %17 = arith.addf %12, %16 : vector<272x64xf32>
    %18 = arith.truncf %8 : vector<272x4xf32> to vector<272x4xbf16>
    %c2 = arith.constant 2 : index
    %c0_11 = arith.constant 0 : index
    %c0_12 = arith.constant 0 : index
    %19 = vector.load %arg4[%c2, %c0_11, %c0_12] : memref<3x4x64xbf16, #tpu.memory_space<vmem>>, vector<1x4x64xbf16>
    %20 = vector.shape_cast %19 : vector<1x4x64xbf16> to vector<4x64xbf16>
    %cst_13 = arith.constant dense<0.000000e+00> : vector<272x64xf32>
    %21 = tpu.matmul %18, %20, %cst_13 {dimension_numbers = #tpu.dot_dimension_numbers<[1], [0], [0], [1], [0, 0, 1, 1], [], []>} : vector<272x4xbf16>, vector<4x64xbf16>, vector<272x64xf32> -> vector<272x64xf32>
    %22 = arith.addf %17, %21 : vector<272x64xf32>
    %c0_14 = arith.constant 0 : index
    %c0_15 = arith.constant 0 : index
    %23 = vector.load %arg5[%c0_14, %c0_15] : memref<1x64xf32, #tpu.memory_space<vmem>>, vector<1x64xf32>
    %24 = vector.broadcast %23 : vector<1x64xf32> to vector<272x64xf32>
    %25 = arith.addf %22, %24 : vector<272x64xf32>
    %c1_i32_16 = arith.constant 1 : i32
    %26 = tpu.dynamic_rotate %25 by %c1_i32_16 dim 0 : vector<272x64xf32>, i32 -> vector<272x64xf32>
    %27 = vector.broadcast %0 : vector<272x1xf32> to vector<272x64xf32>
    %28 = arith.mulf %26, %27 : vector<272x64xf32>
    %c271_i32_17 = arith.constant 271 : i32
    %29 = tpu.dynamic_rotate %25 by %c271_i32_17 dim 0 : vector<272x64xf32>, i32 -> vector<272x64xf32>
    %30 = vector.broadcast %1 : vector<272x1xf32> to vector<272x64xf32>
    %31 = arith.mulf %29, %30 : vector<272x64xf32>
    %32 = arith.truncf %28 : vector<272x64xf32> to vector<272x64xbf16>
    %c0_18 = arith.constant 0 : index
    %c0_19 = arith.constant 0 : index
    %c0_20 = arith.constant 0 : index
    %33 = vector.load %arg6[%c0_18, %c0_19, %c0_20] : memref<3x64x64xbf16, #tpu.memory_space<vmem>>, vector<1x64x64xbf16>
    %34 = vector.shape_cast %33 : vector<1x64x64xbf16> to vector<64x64xbf16>
    %cst_21 = arith.constant dense<0.000000e+00> : vector<272x64xf32>
    %35 = tpu.matmul %32, %34, %cst_21 {dimension_numbers = #tpu.dot_dimension_numbers<[1], [0], [0], [1], [0, 0, 1, 1], [], []>} : vector<272x64xbf16>, vector<64x64xbf16>, vector<272x64xf32> -> vector<272x64xf32>
    %36 = arith.truncf %25 : vector<272x64xf32> to vector<272x64xbf16>
    %c1_22 = arith.constant 1 : index
    %c0_23 = arith.constant 0 : index
    %c0_24 = arith.constant 0 : index
    %37 = vector.load %arg6[%c1_22, %c0_23, %c0_24] : memref<3x64x64xbf16, #tpu.memory_space<vmem>>, vector<1x64x64xbf16>
    %38 = vector.shape_cast %37 : vector<1x64x64xbf16> to vector<64x64xbf16>
    %cst_25 = arith.constant dense<0.000000e+00> : vector<272x64xf32>
    %39 = tpu.matmul %36, %38, %cst_25 {dimension_numbers = #tpu.dot_dimension_numbers<[1], [0], [0], [1], [0, 0, 1, 1], [], []>} : vector<272x64xbf16>, vector<64x64xbf16>, vector<272x64xf32> -> vector<272x64xf32>
    %40 = arith.addf %35, %39 : vector<272x64xf32>
    %41 = arith.truncf %31 : vector<272x64xf32> to vector<272x64xbf16>
    %c2_26 = arith.constant 2 : index
    %c0_27 = arith.constant 0 : index
    %c0_28 = arith.constant 0 : index
    %42 = vector.load %arg6[%c2_26, %c0_27, %c0_28] : memref<3x64x64xbf16, #tpu.memory_space<vmem>>, vector<1x64x64xbf16>
    %43 = vector.shape_cast %42 : vector<1x64x64xbf16> to vector<64x64xbf16>
    %cst_29 = arith.constant dense<0.000000e+00> : vector<272x64xf32>
    %44 = tpu.matmul %41, %43, %cst_29 {dimension_numbers = #tpu.dot_dimension_numbers<[1], [0], [0], [1], [0, 0, 1, 1], [], []>} : vector<272x64xbf16>, vector<64x64xbf16>, vector<272x64xf32> -> vector<272x64xf32>
    %45 = arith.addf %40, %44 : vector<272x64xf32>
    %c0_30 = arith.constant 0 : index
    %c0_31 = arith.constant 0 : index
    %46 = vector.load %arg7[%c0_30, %c0_31] : memref<1x64xf32, #tpu.memory_space<vmem>>, vector<1x64xf32>
    %47 = vector.broadcast %46 : vector<1x64xf32> to vector<272x64xf32>
    %48 = arith.addf %45, %47 : vector<272x64xf32>
    %cst_32 = arith.constant 0.000000e+00 : f32
    %49 = vector.broadcast %cst_32 : f32 to vector<272x64xf32>
    %50 = arith.maximumf %48, %49 : vector<272x64xf32>
    %c1_i32_33 = arith.constant 1 : i32
    %51 = tpu.dynamic_rotate %50 by %c1_i32_33 dim 0 : vector<272x64xf32>, i32 -> vector<272x64xf32>
    %52 = vector.broadcast %0 : vector<272x1xf32> to vector<272x64xf32>
    %53 = arith.mulf %51, %52 : vector<272x64xf32>
    %c271_i32_34 = arith.constant 271 : i32
    %54 = tpu.dynamic_rotate %50 by %c271_i32_34 dim 0 : vector<272x64xf32>, i32 -> vector<272x64xf32>
    %55 = vector.broadcast %1 : vector<272x1xf32> to vector<272x64xf32>
    %56 = arith.mulf %54, %55 : vector<272x64xf32>
    %57 = arith.truncf %53 : vector<272x64xf32> to vector<272x64xbf16>
    %c0_35 = arith.constant 0 : index
    %c0_36 = arith.constant 0 : index
    %c0_37 = arith.constant 0 : index
    %58 = vector.load %arg8[%c0_35, %c0_36, %c0_37] : memref<3x64x64xbf16, #tpu.memory_space<vmem>>, vector<1x64x64xbf16>
    %59 = vector.shape_cast %58 : vector<1x64x64xbf16> to vector<64x64xbf16>
    %cst_38 = arith.constant dense<0.000000e+00> : vector<272x64xf32>
    %60 = tpu.matmul %57, %59, %cst_38 {dimension_numbers = #tpu.dot_dimension_numbers<[1], [0], [0], [1], [0, 0, 1, 1], [], []>} : vector<272x64xbf16>, vector<64x64xbf16>, vector<272x64xf32> -> vector<272x64xf32>
    %61 = arith.truncf %50 : vector<272x64xf32> to vector<272x64xbf16>
    %c1_39 = arith.constant 1 : index
    %c0_40 = arith.constant 0 : index
    %c0_41 = arith.constant 0 : index
    %62 = vector.load %arg8[%c1_39, %c0_40, %c0_41] : memref<3x64x64xbf16, #tpu.memory_space<vmem>>, vector<1x64x64xbf16>
    %63 = vector.shape_cast %62 : vector<1x64x64xbf16> to vector<64x64xbf16>
    %cst_42 = arith.constant dense<0.000000e+00> : vector<272x64xf32>
    %64 = tpu.matmul %61, %63, %cst_42 {dimension_numbers = #tpu.dot_dimension_numbers<[1], [0], [0], [1], [0, 0, 1, 1], [], []>} : vector<272x64xbf16>, vector<64x64xbf16>, vector<272x64xf32> -> vector<272x64xf32>
    %65 = arith.addf %60, %64 : vector<272x64xf32>
    %66 = arith.truncf %56 : vector<272x64xf32> to vector<272x64xbf16>
    %c2_43 = arith.constant 2 : index
    %c0_44 = arith.constant 0 : index
    %c0_45 = arith.constant 0 : index
    %67 = vector.load %arg8[%c2_43, %c0_44, %c0_45] : memref<3x64x64xbf16, #tpu.memory_space<vmem>>, vector<1x64x64xbf16>
    %68 = vector.shape_cast %67 : vector<1x64x64xbf16> to vector<64x64xbf16>
    %cst_46 = arith.constant dense<0.000000e+00> : vector<272x64xf32>
    %69 = tpu.matmul %66, %68, %cst_46 {dimension_numbers = #tpu.dot_dimension_numbers<[1], [0], [0], [1], [0, 0, 1, 1], [], []>} : vector<272x64xbf16>, vector<64x64xbf16>, vector<272x64xf32> -> vector<272x64xf32>
    %70 = arith.addf %65, %69 : vector<272x64xf32>
    %c0_47 = arith.constant 0 : index
    %c0_48 = arith.constant 0 : index
    %71 = vector.load %arg9[%c0_47, %c0_48] : memref<1x64xf32, #tpu.memory_space<vmem>>, vector<1x64xf32>
    %72 = vector.broadcast %71 : vector<1x64xf32> to vector<272x64xf32>
    %73 = arith.addf %70, %72 : vector<272x64xf32>
    %cst_49 = arith.constant 0.000000e+00 : f32
    %74 = vector.broadcast %cst_49 : f32 to vector<272x64xf32>
    %75 = arith.maximumf %73, %74 : vector<272x64xf32>
    %c1_i32_50 = arith.constant 1 : i32
    %76 = tpu.dynamic_rotate %75 by %c1_i32_50 dim 0 : vector<272x64xf32>, i32 -> vector<272x64xf32>
    %77 = vector.broadcast %0 : vector<272x1xf32> to vector<272x64xf32>
    %78 = arith.mulf %76, %77 : vector<272x64xf32>
    %c271_i32_51 = arith.constant 271 : i32
    %79 = tpu.dynamic_rotate %75 by %c271_i32_51 dim 0 : vector<272x64xf32>, i32 -> vector<272x64xf32>
    %80 = vector.broadcast %1 : vector<272x1xf32> to vector<272x64xf32>
    %81 = arith.mulf %79, %80 : vector<272x64xf32>
    %82 = arith.truncf %78 : vector<272x64xf32> to vector<272x64xbf16>
    %c0_52 = arith.constant 0 : index
    %c0_53 = arith.constant 0 : index
    %c0_54 = arith.constant 0 : index
    %83 = vector.load %arg10[%c0_52, %c0_53, %c0_54] : memref<3x64x32xbf16, #tpu.memory_space<vmem>>, vector<1x64x32xbf16>
    %84 = vector.shape_cast %83 : vector<1x64x32xbf16> to vector<64x32xbf16>
    %cst_55 = arith.constant dense<0.000000e+00> : vector<272x32xf32>
    %85 = tpu.matmul %82, %84, %cst_55 {dimension_numbers = #tpu.dot_dimension_numbers<[1], [0], [0], [1], [0, 0, 1, 1], [], []>} : vector<272x64xbf16>, vector<64x32xbf16>, vector<272x32xf32> -> vector<272x32xf32>
    %86 = arith.truncf %75 : vector<272x64xf32> to vector<272x64xbf16>
    %c1_56 = arith.constant 1 : index
    %c0_57 = arith.constant 0 : index
    %c0_58 = arith.constant 0 : index
    %87 = vector.load %arg10[%c1_56, %c0_57, %c0_58] : memref<3x64x32xbf16, #tpu.memory_space<vmem>>, vector<1x64x32xbf16>
    %88 = vector.shape_cast %87 : vector<1x64x32xbf16> to vector<64x32xbf16>
    %cst_59 = arith.constant dense<0.000000e+00> : vector<272x32xf32>
    %89 = tpu.matmul %86, %88, %cst_59 {dimension_numbers = #tpu.dot_dimension_numbers<[1], [0], [0], [1], [0, 0, 1, 1], [], []>} : vector<272x64xbf16>, vector<64x32xbf16>, vector<272x32xf32> -> vector<272x32xf32>
    %90 = arith.addf %85, %89 : vector<272x32xf32>
    %91 = arith.truncf %81 : vector<272x64xf32> to vector<272x64xbf16>
    %c2_60 = arith.constant 2 : index
    %c0_61 = arith.constant 0 : index
    %c0_62 = arith.constant 0 : index
    %92 = vector.load %arg10[%c2_60, %c0_61, %c0_62] : memref<3x64x32xbf16, #tpu.memory_space<vmem>>, vector<1x64x32xbf16>
    %93 = vector.shape_cast %92 : vector<1x64x32xbf16> to vector<64x32xbf16>
    %cst_63 = arith.constant dense<0.000000e+00> : vector<272x32xf32>
    %94 = tpu.matmul %91, %93, %cst_63 {dimension_numbers = #tpu.dot_dimension_numbers<[1], [0], [0], [1], [0, 0, 1, 1], [], []>} : vector<272x64xbf16>, vector<64x32xbf16>, vector<272x32xf32> -> vector<272x32xf32>
    %95 = arith.addf %90, %94 : vector<272x32xf32>
    %c0_64 = arith.constant 0 : index
    %c0_65 = arith.constant 0 : index
    %96 = vector.load %arg11[%c0_64, %c0_65] : memref<1x32xf32, #tpu.memory_space<vmem>>, vector<1x32xf32>
    %97 = vector.broadcast %96 : vector<1x32xf32> to vector<272x32xf32>
    %98 = arith.addf %95, %97 : vector<272x32xf32>
    %cst_66 = arith.constant 0.000000e+00 : f32
    %99 = vector.broadcast %cst_66 : f32 to vector<272x32xf32>
    %100 = arith.maximumf %98, %99 : vector<272x32xf32>
    %c0_67 = arith.constant 0 : index
    %c0_68 = arith.constant 0 : index
    %101 = vector.load %arg12[%c0_67, %c0_68] : memref<272x32xf32, #tpu.memory_space<vmem>>, vector<272x32xf32>
    tpu.vector_store %arg12[%c0_67, %c0_68], %100 {strides = array<i32>} : memref<272x32xf32, #tpu.memory_space<vmem>>, vector<272x32xf32>,
    return
  }
  func.func @transform_0(%arg0: i32) -> (i32, i32) {
    %c0_i32 = arith.constant 0 : i32
    %c0_i32_0 = arith.constant 0 : i32
    return %arg0, %c0_i32 : i32, i32
  }
  func.func @transform_1(%arg0: i32) -> (i32, i32) {
    %c0_i32 = arith.constant 0 : i32
    %c0_i32_0 = arith.constant 0 : i32
    %c0_i32_1 = arith.constant 0 : i32
    return %c0_i32, %c0_i32_0 : i32, i32
  }
  func.func @transform_2(%arg0: i32) -> (i32, i32) {
    %c0_i32 = arith.constant 0 : i32
    %c0_i32_0 = arith.constant 0 : i32
    %c0_i32_1 = arith.constant 0 : i32
    return %c0_i32, %c0_i32_0 : i32, i32
  }
  func.func @transform_3(%arg0: i32) -> (i32, i32, i32) {
    %c0_i32 = arith.constant 0 : i32
    %c0_i32_0 = arith.constant 0 : i32
    %c0_i32_1 = arith.constant 0 : i32
    %c0_i32_2 = arith.constant 0 : i32
    return %c0_i32, %c0_i32_0, %c0_i32_1 : i32, i32, i32
  }
  func.func @transform_4(%arg0: i32) -> (i32, i32) {
    %c0_i32 = arith.constant 0 : i32
    %c0_i32_0 = arith.constant 0 : i32
    %c0_i32_1 = arith.constant 0 : i32
    return %c0_i32, %c0_i32_0 : i32, i32
  }
  func.func @transform_5(%arg0: i32) -> (i32, i32, i32) {
    %c0_i32 = arith.constant 0 : i32
    %c0_i32_0 = arith.constant 0 : i32
    %c0_i32_1 = arith.constant 0 : i32
    %c0_i32_2 = arith.constant 0 : i32
    return %c0_i32, %c0_i32_0, %c0_i32_1 : i32, i32, i32
  }
  func.func @transform_6(%arg0: i32) -> (i32, i32) {
    %c0_i32 = arith.constant 0 : i32
    %c0_i32_0 = arith.constant 0 : i32
    %c0_i32_1 = arith.constant 0 : i32
    return %c0_i32, %c0_i32_0 : i32, i32
  }
  func.func @transform_7(%arg0: i32) -> (i32, i32, i32) {
    %c0_i32 = arith.constant 0 : i32
    %c0_i32_0 = arith.constant 0 : i32
    %c0_i32_1 = arith.constant 0 : i32
    %c0_i32_2 = arith.constant 0 : i32
    return %c0_i32, %c0_i32_0, %c0_i32_1 : i32, i32, i32
  }
  func.func @transform_8(%arg0: i32) -> (i32, i32) {
    %c0_i32 = arith.constant 0 : i32
    %c0_i32_0 = arith.constant 0 : i32
    %c0_i32_1 = arith.constant 0 : i32
    return %c0_i32, %c0_i32_0 : i32, i32
  }
  func.func @transform_9(%arg0: i32) -> (i32, i32, i32) {
    %c0_i32 = arith.constant 0 : i32
    %c0_i32_0 = arith.constant 0 : i32
    %c0_i32_1 = arith.constant 0 : i32
    %c0_i32_2 = arith.constant 0 : i32
    return %c0_i32, %c0_i32_0, %c0_i32_1 : i32, i32, i32
  }
  func.func @transform_10(%arg0: i32) -> (i32, i32) {
    %c0_i32 = arith.constant 0 : i32
    %c0_i32_0 = arith.constant 0 : i32
    %c0_i32_1 = arith.constant 0 : i32
    return %c0_i32, %c0_i32_0 : i32, i32
  }
  func.func @transform_11(%arg0: i32) -> (i32, i32) {
    %c0_i32 = arith.constant 0 : i32
    %c0_i32_0 = arith.constant 0 : i32
    return %arg0, %c0_i32 : i32, i32
  }
}

</mosaic_0001>

<bundles_post_ra>
// kernel: mahjong_forward.1
= control target key start
LH: loop header
LB: loop body
LE: loop exit
PB: predicated region body
PF: predicated region fallthrough
CT: control target
= control target key end

     0   :  { %s6863_s17 = smov 0   ;;  %s10657_s0 = inlined_call_operand.vmem [shape: f32[544,4], index: 0, kind: input, shape index: {}]   ;;  %s10658_s1 = inlined_call_operand.vmem [shape: f32[272,1], index: 1, kind: input, shape index: {}]   ;;  %s10659_s2 = inlined_call_operand.vmem [shape: f32[272,1], index: 2, kind: input, shape index: {}]   ;;  %s10660_s3 = inlined_call_operand.vmem [shape: bf16[3,4,64], index: 3, kind: input, shape index: {}]   ;;  %s10661_s4 = inlined_call_operand.vmem [shape: f32[1,64], index: 4, kind: input, shape index: {}]   ;;  %s10662_s5 = inlined_call_operand.vmem [shape: bf16[3,64,64], index: 5, kind: input, shape index: {}]   ;;  %s10663_s6 = inlined_call_operand.vmem [shape: f32[1,64], index: 6, kind: input, shape index: {}]   ;;  %s10664_s7 = inlined_call_operand.vmem [shape: bf16[3,64,64], index: 7, kind: input, shape index: {}]   ;;  %s10665_s8 = inlined_call_operand.vmem [shape: f32[1,64], index: 8, kind: input, shape index: {}]   ;;  %s10666_s9 = inlined_call_operand.vmem [shape: bf16[3,64,32], index: 9, kind: input, shape index: {}]   ;;  %s10667_s10 = inlined_call_operand.vmem [shape: f32[1,32], index: 10, kind: input, shape index: {}]   ;;  %s10668_s11 = inlined_call_operand.vmem [shape: f32[544,32], index: 11, kind: output, shape index: {}]  }
   0x1 LB: > { %s5301_s18 = sadd.s32 4294967295, %s6798_s17   ;;  %p5305_p0 = scmp.ge.s32.totalorder %s6798_s17, 1  ;;  %s6798_s17 = sphi %s6863_s17, %s21_s17  }
   0x2   : > { %p338_p1 = scmp.lt.s32.totalorder %s6798_s17, 3 }
   0x4   : > { %p339_p2 = pnand %p5305_p0, %p338_p1 }
   0x6   : > { %342 = sbr.rel (%p339_p2) target bundleno = 1512 (0x5e8), region = 64 }
   0xb   : > { %v425_v0 = vld [vmem:[%s10659_s2] sm:$0xff]  ;;  %vm1130_vm0 = vcmask 1041408   ;;  %v6800_v2 = vmov 0   ;;  %s378_s25 = smul.u32 34, %s5301_s18  ;;  %v527_v5 = vlaneseq  ;;  %v10672_v6 = vmov 0.0   ;;  %v426_v7 = vld [vmem:[%s10659_s2 + $0x8] sm:$0xff] }
   0xc   : > { %v391_v1 = vld [vmem:[%s10658_s1] sm:$0xff]  ;;  %6753 = vset.pattern.permute.xlu1 %v6800_v2  ;;  %6752 = vset.pattern.permute.xlu0 %v6800_v2  ;;  %v392_v8 = vld [vmem:[%s10658_s1 + $0x8] sm:$0xff]  ;;  %vm6802_vm1 = vmmov 0   ;;  %v394_v11 = vld [vmem:[%s10658_s1 + $0x18] sm:$0xff]  ;;  %vm1078_vm2 = vcmask 31744   ;;  %vm2122_vm5 = vcmask 523264  }
   0xd   : > { %v5308_v3 = vld [vmem:[%s10660_s3 + $0x2] sm:$0x3]  ;;  %839 = vperm.xlu1 %6753, %v425_v0   ;;  %566 = vperm.xlu0 %6752, %v391_v1   ;;  %p379_p3 = scmp.lt.s32.totalorder %s378_s25, 67  ;;  %v5343_v9 = vld [vmem:[%s10660_s3 + $0x4] sm:$0x3]  ;;  %v6899_v10 = vshrl.u32 %v527_v5, 7 }
   0xe   : > { %v1132_v4 = vsel %vm1130_vm0, %v5308_v3, 0  ;;  %5847 = vmatprep.subr.bf16.mxu0 %v10672_v6  ;;  %5849 = vmatprep.mubr.msk.bf16.mxu0 %vm6802_vm1, %v10672_v6  ;;  %v393_v12 = vld [vmem:[%s10658_s1 + $0x10] sm:$0xff]  ;;  %v1597_v15 = vsel %vm1130_vm0, %v5343_v9, 0  ;;  %v428_v20 = vld [vmem:[%s10659_s2 + $0x18] sm:$0xff]  ;;  %v396_v35 = vld [vmem:[%s10658_s1 + $0x28] sm:$0xff]  ;;  %vm5210_vm6 = vcmask 261120  }
   0xf   : > { %5848 = vmatpush3.bf16.msra.mxu0 %v1132_v4  ;;  %5917 = vmatprep.subr.bf16.mxu1 %v10672_v6  ;;  %s11462_s25 = smov (!%p379_p3, %s378_s25), 67  ;;  %10914 = vst [vmem:[#allocation2_spill] sm:$0xff] %v6899_v10  ;;  %vm802_vm3 = vcmp.lt.s32.totalorder %v6899_v10, 7  ;;  %vm529_vm4 = vcmp.lt.s32.totalorder %v6899_v10, 1  ;;  %v427_v21 = vld [vmem:[%s10659_s2 + $0x10] sm:$0xff]  ;;  %v395_v36 = vld [vmem:[%s10658_s1 + $0x20] sm:$0xff] }
  0x10   : > { %5987 = vmatprep.subr.bf16.mxu0 %v10672_v6  ;;  %5919 = vmatprep.mubr.msk.bf16.mxu1 %vm6802_vm1, %v10672_v6  ;;  %s5306_s18 = sshll.u32 %s11462_s25, 3  ;;  %v430_v49 = vld [vmem:[%s10659_s2 + $0x28] sm:$0xff]  ;;  %v429_v50 = vld [vmem:[%s10659_s2 + $0x20] sm:$0xff]  ;;  %v398_v56 = vld [vmem:[%s10658_s1 + $0x38] sm:$0xff] }
  0x11   : > { %844 = vperm.xlu1 %6753, %v426_v7   ;;  %571 = vperm.xlu0 %6752, %v392_v8   ;;  %s6913_s21 = scalar_lea.vmem %s10657_s0, %s5306_s18  ;;  %v397_v57 = vld [vmem:[%s10658_s1 + $0x30] sm:$0xff]  ;;  %v432_v0 = vld [vmem:[%s10659_s2 + $0x38] sm:$0xff]  ;;  %v400_v8 = vld [vmem:[%s10658_s1 + $0x48] sm:$0xff]  ;;  %s10519_s15 = scalar_lea.vmem %s10668_s11, %s5306_s18 }
  0x12   : > { %v6916_v13 = vld [vmem:[%s6913_s21] sm:$0xff]  ;;  %v6919_v14 = vld [vmem:[%s6913_s21 + $0x8] sm:$0xff]  ;;  %v461_v17 = vld [vmem:[%s6913_s21 + $0x10] sm:$0xff] }
  0x13   : > { %10915 = vst [vmem:[#allocation3_spill] sm:$0xff] %v6916_v13  ;;  %v1059_v16 = vpack.c.bf16 %v6919_v14, %v6916_v13  ;;  %v10674_v18 = vrot.slane %v6919_v14, 1  ;;  %v10669_v19 = vrot.slane %v6916_v13, 7  ;;  %v462_v22 = vld [vmem:[%s6913_s21 + $0x18] sm:$0xff]  ;;  %v770_v23 = vrot.slane %v461_v17, 1  ;;  %v463_v27 = vld [vmem:[%s6913_s21 + $0x20] sm:$0xff] }
  0x14   : > { %v494_v24 = vrot.slane %v6919_v14, 7  ;;  %v495_v25 = vrot.slane %v461_v17, 7  ;;  %v496_v26 = vrot.slane %v462_v22, 7  ;;  %v771_v30 = vrot.slane %v462_v22, 1  ;;  %v464_v31 = vld [vmem:[%s6913_s21 + $0x28] sm:$0xff]  ;;  %v6969_v37 = vld [vmem:[%s6913_s21 + $0x30] sm:$0xff] }
  0x15   : > { %581 = vperm.xlu1 %6753, %v394_v11   ;;  %576 = vperm.xlu0 %6752, %v393_v12   ;;  %v6945_v28 = vsel %vm802_vm3, %v10674_v18, %v770_v23  ;;  %v772_v34 = vrot.slane %v463_v27, 1  ;;  %v497_v39 = vrot.slane %v463_v27, 7  ;;  %v498_v40 = vrot.slane %v464_v31, 7  ;;  %v466_v51 = vld [vmem:[%s6913_s21 + $0x38] sm:$0xff]  ;;  %v467_v58 = vld [vmem:[%s6913_s21 + $0x40] sm:$0xff]  ;;  %v431_v1 = vld [vmem:[%s10659_s2 + $0x30] sm:$0xff] }
  0x16   : > { %5850 = vmatmul.mubr.msk.bf16.vlgmr.msra.gmra.mxu0 %vm1078_vm2, %v1059_v16  ;;  %v6951_v29 = vsel %vm529_vm4, %v10669_v19, %v494_v24  ;;  %v6956_v32 = vsel %vm529_vm4, %v495_v25, %v496_v26  ;;  %v6960_v33 = vsel %vm529_vm4, %v494_v24, %v495_v25  ;;  %v6973_v38 = vsel %vm802_vm3, %v770_v23, %v771_v30  ;;  %v468_v2 = vld [vmem:[%s6913_s21 + $0x48] sm:$0xff]  ;;  %v399_v9 = vld [vmem:[%s10658_s1 + $0x40] sm:$0xff]  ;;  %v469_v11 = vld [vmem:[%s6913_s21 + $0x50] sm:$0xff] }
  0x17   : > { %5988 = vmatpush3.bf16.msra.mxu0 %v1597_v15  ;;  %5853 = vmatprep.mubr.msk.bf16.mxu0 %vm6802_vm1, %v10672_v6  ;;  %v1060_v41 = vpack.c.bf16 %v462_v22, %v461_v17  ;;  %v6978_v42 = vsel %vm802_vm3, %v771_v30, %v772_v34  ;;  %v773_v43 = vrot.slane %v464_v31, 1  ;;  %v774_v44 = vrot.slane %v6969_v37, 1  ;;  %v1058_v17 = vld [vmem:[%s10660_s3] sm:$0x3]  ;;  %v470_v22 = vld [vmem:[%s6913_s21 + $0x58] sm:$0xff]  ;;  %v455_v18 = vld [vmem:[%s10659_s2 + $0xf0] sm:$0xff] }
  0x18   : > { %6133 = vmatprep.subr.bf16.mxu0 %v10672_v6  ;;  %v6983_v45 = vsel %vm529_vm4, %v497_v39, %v498_v40  ;;  %v6987_v46 = vsel %vm529_vm4, %v496_v26, %v497_v39  ;;  %v499_v52 = vrot.slane %v6969_v37, 7  ;;  %v500_v53 = vrot.slane %v466_v51, 7  ;;  %v402_v30 = vld [vmem:[%s10658_s1 + $0x58] sm:$0xff] }
  0x19   : > { %854 = vperm.xlu1 %6753, %v428_v20   ;;  %849 = vperm.xlu0 %6752, %v427_v21   ;;  %v6991_v47 = vsel %vm802_vm3, %v773_v43, %v774_v44  ;;  %v6995_v48 = vsel %vm802_vm3, %v772_v34, %v773_v43  ;;  %v1061_v59 = vpack.c.bf16 %v464_v31, %v463_v27  ;;  %v775_v60 = vrot.slane %v466_v51, 1  ;;  %v434_v20 = vld [vmem:[%s10659_s2 + $0x48] sm:$0xff]  ;;  %v433_v21 = vld [vmem:[%s10659_s2 + $0x40] sm:$0xff]  ;;  %v401_v31 = vld [vmem:[%s10658_s1 + $0x50] sm:$0xff] }
  0x1a   : > { %v7010_v54 = vsel %vm529_vm4, %v499_v52, %v500_v53  ;;  %v7014_v55 = vsel %vm529_vm4, %v498_v40, %v499_v52  ;;  %v776_v61 = vrot.slane %v467_v58, 1  ;;  %v501_v3 = vrot.slane %v467_v58, 7  ;;  %v471_v34 = vld [vmem:[%s6913_s21 + $0x60] sm:$0xff]  ;;  %v435_v43 = vld [vmem:[%s10659_s2 + $0x50] sm:$0xff]  ;;  %v448_v19 = vld [vmem:[%s10659_s2 + $0xb8] sm:$0xff] }
  0x1b   : > { %v7029_v63 = vsel %vm802_vm3, %v774_v44, %v775_v60  ;;  %v502_v4 = vrot.slane %v468_v2, 7  ;;  %v1062_v12 = vpack.c.bf16 %v466_v51, %v6969_v37  ;;  %v777_v15 = vrot.slane %v468_v2, 1  ;;  %v472_v44 = vld [vmem:[%s6913_s21 + $0x68] sm:$0xff] }
  0x1c   : > { %v7025_v62 = vsel %vm802_vm3, %v775_v60, %v776_v61  ;;  %v7047_v7 = vsel %vm529_vm4, %v500_v53, %v501_v3  ;;  %v778_v16 = vrot.slane %v469_v11, 1  ;;  %v1355_v23 = vsel %vm1130_vm0, %v1058_v17, 0  ;;  %v404_v53 = vld [vmem:[%s10658_s1 + $0x68] sm:$0xff] }
  0x1d   : > { %591 = vperm.xlu1 %6753, %v396_v35   ;;  %586 = vperm.xlu0 %6752, %v395_v36   ;;  %v7043_v5 = vsel %vm529_vm4, %v501_v3, %v502_v4  ;;  %v7074_v25 = vsel %vm802_vm3, %v776_v61, %v777_v15  ;;  %v503_v26 = vrot.slane %v469_v11, 7  ;;  %v504_v27 = vrot.slane %v470_v22, 7  ;;  %v474_v3 = vld [vmem:[%s6913_s21 + $0x78] sm:$0xff] }
  0x1e   : > { %5854 = vmatmul.mubr.msk.bf16.gmra.mxu0 %vm1078_vm2, %v1060_v41  ;;  %v7070_v24 = vsel %vm802_vm3, %v777_v15, %v778_v16  ;;  %5918 = vmatpush3.bf16.msra.mxu1 %v1355_v23  ;;  %v1063_v37 = vpack.c.bf16 %v468_v2, %v467_v58  ;;  %v779_v39 = vrot.slane %v470_v22, 1  ;;  %v780_v40 = vrot.slane %v471_v34, 1  ;;  %v436_v41 = vld [vmem:[%s10659_s2 + $0x58] sm:$0xff]  ;;  %v437_v2 = vld [vmem:[%s10659_s2 + $0x60] sm:$0xff]  ;;  %v405_v15 = vld [vmem:[%s10658_s1 + $0x70] sm:$0xff] }
  0x1f   : > { %5857 = vmatprep.mubr.msk.bf16.mxu0 %vm6802_vm1, %v10672_v6  ;;  %6057 = vmatprep.subr.bf16.mxu1 %v10672_v6  ;;  %v7089_v35 = vsel %vm529_vm4, %v503_v26, %v504_v27  ;;  %v7093_v36 = vsel %vm529_vm4, %v502_v4, %v503_v26  ;;  %v505_v51 = vrot.slane %v471_v34, 7  ;;  %v506_v52 = vrot.slane %v472_v44, 7  ;;  %v440_v26 = vld [vmem:[%s10659_s2 + $0x78] sm:$0xff] }
  0x20   : > { %v1064_v60 = vpack.c.bf16 %v470_v22, %v469_v11  ;;  %v781_v61 = vrot.slane %v472_v44, 1  ;;  %v508_v11 = vrot.slane %v474_v3, 7  ;;  %v783_v22 = vrot.slane %v474_v3, 1 }
  0x21   : > { %864 = vperm.xlu1 %6753, %v430_v49   ;;  %859 = vperm.xlu0 %6752, %v429_v50   ;;  %v7104_v49 = vsel %vm802_vm3, %v779_v39, %v780_v40  ;;  %v7108_v50 = vsel %vm802_vm3, %v778_v16, %v779_v39  ;;  %v7122_v58 = vsel %vm529_vm4, %v505_v51, %v506_v52  ;;  %v475_v16 = vld [vmem:[%s6913_s21 + $0x80] sm:$0xff] }
  0x22   : > { %v784_v23 = vrot.slane %v475_v16, 1 }
  0x25   : > { %601 = vperm.xlu1 %6753, %v398_v56   ;;  %596 = vperm.xlu0 %6752, %v397_v57   ;;  %v403_v56 = vld [vmem:[%s10658_s1 + $0x60] sm:$0xff]  ;;  %v473_v57 = vld [vmem:[%s6913_s21 + $0x70] sm:$0xff] }
  0x26   : > { %5858 = vmatmul.mubr.msk.bf16.gmra.mxu0 %vm1078_vm2, %v1061_v59  ;;  %v7126_v59 = vsel %vm529_vm4, %v504_v27, %v505_v51  ;;  %v439_v27 = vld [vmem:[%s10659_s2 + $0x70] sm:$0xff] }
  0x27   : > { %5861 = vmatprep.mubr.msk.bf16.mxu0 %vm6802_vm1, %v10672_v6  ;;  %v477_v51 = vld [vmem:[%s6913_s21 + $0x90] sm:$0xff] }
  0x29   : > { %874 = vperm.xlu1 %6753, %v432_v0   ;;  %869 = vperm.xlu0 %6752, %v431_v1   ;;  %v782_v0 = vrot.slane %v473_v57, 1  ;;  %v438_v1 = vld [vmem:[%s10659_s2 + $0x68] sm:$0xff] }
  0x2b   : > { %v7137_v4 = vsel %vm802_vm3, %v781_v61, %v782_v0 }
  0x2d   : > { %611 = vperm.xlu1 %6753, %v400_v8   ;;  %606 = vperm.xlu0 %6752, %v399_v9   ;;  %v7141_v8 = vsel %vm802_vm3, %v780_v40, %v781_v61  ;;  %v507_v9 = vrot.slane %v473_v57, 7 }
  0x2e   : > { %5862 = vmatmul.mubr.msk.bf16.gmra.mxu0 %vm1078_vm2, %v1062_v12  ;;  %v406_v12 = vld [vmem:[%s10658_s1 + $0x78] sm:$0xff] }
  0x2f   : > { %5865 = vmatprep.mubr.msk.bf16.mxu0 %vm6802_vm1, %v10672_v6  ;;  %v7155_v17 = vsel %vm529_vm4, %v507_v9, %v508_v11 }
  0x31   : > { %884 = vperm.xlu1 %6753, %v434_v20   ;;  %879 = vperm.xlu0 %6752, %v433_v21   ;;  %v7159_v20 = vsel %vm529_vm4, %v506_v52, %v507_v9  ;;  %v1065_v21 = vpack.c.bf16 %v472_v44, %v471_v34  ;;  %v7174_v34 = vsel %vm802_vm3, %v782_v0, %v783_v22  ;;  %v407_v44 = vld [vmem:[%s10658_s1 + $0x80] sm:$0xff]  ;;  %v442_v0 = vld [vmem:[%s10659_s2 + $0x88] sm:$0xff] }
  0x32   : > { %v1066_v52 = vpack.c.bf16 %v474_v3, %v473_v57  ;;  %v441_v57 = vld [vmem:[%s10659_s2 + $0x80] sm:$0xff] }
  0x35   : > { %621 = vperm.xlu1 %6753, %v402_v30   ;;  %616 = vperm.xlu0 %6752, %v401_v31   ;;  %v476_v30 = vld [vmem:[%s6913_s21 + $0x88] sm:$0xff]  ;;  %v7170_v31 = vsel %vm802_vm3, %v783_v22, %v784_v23 }
  0x36   : > { %5866 = vmatmul.mubr.msk.bf16.gmra.mxu0 %vm1078_vm2, %v1063_v37  ;;  %v509_v37 = vrot.slane %v475_v16, 7  ;;  %v510_v39 = vrot.slane %v476_v30, 7  ;;  %v1067_v22 = vpack.c.bf16 %v476_v30, %v475_v16  ;;  %v443_v16 = vld [vmem:[%s10659_s2 + $0x90] sm:$0xff] }
  0x37   : > { %5869 = vmatprep.mubr.msk.bf16.mxu0 %vm6802_vm1, %v10672_v6 }
  0x38   : > { %v7181_v40 = vsel %vm529_vm4, %v509_v37, %v510_v39 }
  0x39   : > { %894 = vperm.xlu1 %6753, %v436_v41   ;;  %889 = vperm.xlu0 %6752, %v435_v43   ;;  %v7185_v41 = vsel %vm529_vm4, %v508_v11, %v509_v37  ;;  %v408_v43 = vld [vmem:[%s10658_s1 + $0x88] sm:$0xff] }
  0x3d   : > { %631 = vperm.xlu1 %6753, %v404_v53   ;;  %626 = vperm.xlu0 %6752, %v403_v56   ;;  %v785_v53 = vrot.slane %v476_v30, 1  ;;  %v786_v56 = vrot.slane %v477_v51, 1  ;;  %v480_v30 = vld [vmem:[%s6913_s21 + $0xa8] sm:$0xff] }
  0x3e   : > { %5870 = vmatmul.mubr.msk.bf16.gmra.mxu0 %vm1078_vm2, %v1064_v60 }
  0x3f   : > { %5873 = vmatprep.mubr.msk.bf16.mxu0 %vm6802_vm1, %v10672_v6  ;;  %v7196_v60 = vsel %vm802_vm3, %v785_v53, %v786_v56  ;;  %v7200_v61 = vsel %vm802_vm3, %v784_v23, %v785_v53 }
  0x41   : > { %904 = vperm.xlu1 %6753, %v438_v1   ;;  %899 = vperm.xlu0 %6752, %v437_v2   ;;  %v478_v1 = vld [vmem:[%s6913_s21 + $0x98] sm:$0xff]  ;;  %v511_v2 = vrot.slane %v477_v51, 7 }
  0x42   : > { %v512_v3 = vrot.slane %v478_v1, 7  ;;  %v787_v23 = vrot.slane %v478_v1, 1 }
  0x43   : > { %v7218_v11 = vsel %vm529_vm4, %v510_v39, %v511_v2  ;;  %v444_v39 = vld [vmem:[%s10659_s2 + $0x98] sm:$0xff] }
  0x44   : > { %v7214_v9 = vsel %vm529_vm4, %v511_v2, %v512_v3  ;;  %v7233_v37 = vsel %vm802_vm3, %v786_v56, %v787_v23  ;;  %v412_v56 = vld [vmem:[%s10658_s1 + $0xa8] sm:$0xff]  ;;  %v1068_v2 = vpack.c.bf16 %v478_v1, %v477_v51  ;;  %v445_v51 = vld [vmem:[%s10659_s2 + $0xa0] sm:$0xff]  ;;  %v482_v1 = vld [vmem:[%s6913_s21 + $0xb8] sm:$0xff] }
  0x45   : > { %641 = vperm.xlu1 %6753, %v406_v12   ;;  %636 = vperm.xlu0 %6752, %v405_v15   ;;  %v410_v12 = vld [vmem:[%s10658_s1 + $0x98] sm:$0xff]  ;;  %v409_v15 = vld [vmem:[%s10658_s1 + $0x90] sm:$0xff] }
  0x46   : > { %5874 = vmatmul.mubr.msk.bf16.gmra.mxu0 %vm1078_vm2, %v1065_v21  ;;  %v479_v21 = vld [vmem:[%s6913_s21 + $0xa0] sm:$0xff] }
  0x47   : > { %5877 = vmatprep.mubr.msk.bf16.mxu0 %vm6802_vm1, %v10672_v6 }
  0x49   : > { %914 = vperm.xlu1 %6753, %v440_v26   ;;  %909 = vperm.xlu0 %6752, %v439_v27   ;;  %v788_v26 = vrot.slane %v479_v21, 1 }
  0x4b   : > { %v7229_v27 = vsel %vm802_vm3, %v787_v23, %v788_v26  ;;  %v446_v23 = vld [vmem:[%s10659_s2 + $0xa8] sm:$0xff] }
  0x4d   : > { %651 = vperm.xlu1 %6753, %v408_v43   ;;  %646 = vperm.xlu0 %6752, %v407_v44   ;;  %v513_v43 = vrot.slane %v479_v21, 7  ;;  %v514_v44 = vrot.slane %v480_v30, 7 }
  0x4e   : > { %5878 = vmatmul.mubr.msk.bf16.gmra.mxu0 %vm1078_vm2, %v1066_v52 }
  0x4f   : > { %5881 = vmatprep.mubr.msk.bf16.mxu0 %vm6802_vm1, %v10672_v6  ;;  %v7247_v52 = vsel %vm529_vm4, %v513_v43, %v514_v44  ;;  %v7251_v53 = vsel %vm529_vm4, %v512_v3, %v513_v43 }
  0x51   : > { %924 = vperm.xlu1 %6753, %v442_v0   ;;  %919 = vperm.xlu0 %6752, %v441_v57   ;;  %v411_v0 = vld [vmem:[%s10658_s1 + $0xa0] sm:$0xff]  ;;  %v481_v57 = vld [vmem:[%s6913_s21 + $0xb0] sm:$0xff] }
  0x55   : > { %661 = vperm.xlu1 %6753, %v410_v12   ;;  %656 = vperm.xlu0 %6752, %v409_v15   ;;  %v789_v12 = vrot.slane %v480_v30, 1  ;;  %v790_v15 = vrot.slane %v481_v57, 1 }
  0x56   : > { %5882 = vmatmul.mubr.msk.bf16.gmra.mxu0 %vm1078_vm2, %v1067_v22 }
  0x57   : > { %5885 = vmatprep.mubr.msk.bf16.mxu0 %vm6802_vm1, %v10672_v6  ;;  %v7262_v22 = vsel %vm802_vm3, %v789_v12, %v790_v15  ;;  %v7266_v3 = vsel %vm802_vm3, %v788_v26, %v789_v12  ;;  %v1069_v12 = vpack.c.bf16 %v480_v30, %v479_v21  ;;  %v447_v21 = vld [vmem:[%s10659_s2 + $0xb0] sm:$0xff] }
  0x59   : > { %934 = vperm.xlu1 %6753, %v444_v39   ;;  %929 = vperm.xlu0 %6752, %v443_v16   ;;  %v515_v39 = vrot.slane %v481_v57, 7  ;;  %v516_v16 = vrot.slane %v482_v1, 7 }
  0x5b   : > { %v7280_v26 = vsel %vm529_vm4, %v515_v39, %v516_v16  ;;  %v7284_v43 = vsel %vm529_vm4, %v514_v44, %v515_v39 }
  0x5d   : > { %671 = vperm.xlu1 %6753, %v412_v56   ;;  %666 = vperm.xlu0 %6752, %v411_v0   ;;  %v414_v56 = vld [vmem:[%s10658_s1 + $0xb8] sm:$0xff]  ;;  %v413_v0 = vld [vmem:[%s10658_s1 + $0xb0] sm:$0xff] }
  0x5e   : > { %5886 = vmatmul.mubr.msk.bf16.gmra.mxu0 %vm1078_vm2, %v1068_v2  ;;  %v7293_v2 = vld [vmem:[%s6913_s21 + $0xc0] sm:$0xff] }
  0x5f   : > { %5889 = vmatprep.mubr.msk.bf16.mxu0 %vm6802_vm1, %v10672_v6  ;;  %10916 = vst [vmem:[#allocation4_spill] sm:$0xff] %v7293_v2  ;;  %v10671_v30 = vrot.slane %v7293_v2, 7 }
  0x61   : > { %944 = vperm.xlu1 %6753, %v446_v23   ;;  %939 = vperm.xlu0 %6752, %v445_v51   ;;  %v791_v23 = vrot.slane %v482_v1, 1  ;;  %v10670_v51 = vrot.slane %v7293_v2, 1 }
  0x63   : > { %v7300_v44 = vsel %vm802_vm3, %v791_v23, %v10670_v51  ;;  %v7304_v39 = vsel %vm802_vm3, %v790_v15, %v791_v23  ;;  %v7320_v15 = vsel %vm529_vm4, %v516_v16, %v10671_v30  ;;  %v449_v16 = vld [vmem:[%s10659_s2 + $0xc0] sm:$0xff]  ;;  %v7338_v23 = vld [vmem:[%s6913_s21 + $0xc8] sm:$0xff] }
  0x64   : > { %10917 = vst [vmem:[#allocation5_spill] sm:$0xff] %v7320_v15  ;;  %v7384_v51 = vld [vmem:[%s6913_s21 + $0xe8] sm:$0xff]  ;;  %v10927_v15 = vmov 0.0  }
  0x65   : > { %681 = vperm.xlu1 %6753, %v414_v56   ;;  %676 = vperm.xlu0 %6752, %v413_v0   ;;  %v416_v56 = vld [vmem:[%s10658_s1 + $0xc8] sm:$0xff]  ;;  %v415_v0 = vld [vmem:[%s10658_s1 + $0xc0] sm:$0xff]  ;;  %10921 = vst [vmem:[#allocation9_spill] sm:$0xff] %v7384_v51 }
  0x66   : > { %5890 = vmatmul.mubr.msk.bf16.gmra.mxu0 %vm1078_vm2, %v1069_v12  ;;  %v1070_v12 = vpack.c.bf16 %v482_v1, %v481_v57  ;;  %v418_v57 = vld [vmem:[%s10658_s1 + $0xd8] sm:$0xff]  ;;  %v417_v1 = vld [vmem:[%s10658_s1 + $0xd0] sm:$0xff] }
  0x67   : > { %5893 = vmatprep.mubr.msk.bf16.mxu0 %vm6802_vm1, %v10672_v6 }
  0x69   : > { %954 = vperm.xlu1 %6753, %v448_v19   ;;  %949 = vperm.xlu0 %6752, %v447_v21   ;;  %v450_v19 = vld [vmem:[%s10659_s2 + $0xc8] sm:$0xff]  ;;  %v1071_v21 = vpack.c.bf16 %v7338_v23, %v7293_v2 }
  0x6d   : > { %691 = vperm.xlu1 %6753, %v416_v56   ;;  %686 = vperm.xlu0 %6752, %v415_v0   ;;  %v452_v56 = vld [vmem:[%s10659_s2 + $0xd8] sm:$0xff]  ;;  %v451_v0 = vld [vmem:[%s10659_s2 + $0xd0] sm:$0xff] }
  0x6e   : > { %5894 = vmatmul.mubr.msk.bf16.gmra.mxu0 %vm1078_vm2, %v1070_v12  ;;  %v7358_v12 = vld [vmem:[%s6913_s21 + $0xd0] sm:$0xff] }
  0x6f   : > { %5897 = vmatprep.mubr.msk.bf16.mxu0 %vm6802_vm1, %v10672_v6  ;;  %10918 = vst [vmem:[#allocation6_spill] sm:$0xff] %v7358_v12 }
  0x71   : > { %964 = vperm.xlu1 %6753, %v450_v19   ;;  %959 = vperm.xlu0 %6752, %v449_v16   ;;  %v7361_v19 = vld [vmem:[%s6913_s21 + $0xd8] sm:$0xff]  ;;  %v420_v16 = vld [vmem:[%s10658_s1 + $0xe8] sm:$0xff] }
  0x72   : > { %10919 = vst [vmem:[#allocation7_spill] sm:$0xff] %v7361_v19 }
  0x75   : > { %701 = vperm.xlu1 %6753, %v418_v57   ;;  %696 = vperm.xlu0 %6752, %v417_v1   ;;  %v419_v57 = vld [vmem:[%s10658_s1 + $0xe0] sm:$0xff]  ;;  %v1072_v1 = vpack.c.bf16 %v7361_v19, %v7358_v12 }
  0x76   : > { %5898 = vmatmul.mubr.msk.bf16.gmra.mxu0 %vm1078_vm2, %v1071_v21  ;;  %v454_v21 = vld [vmem:[%s10659_s2 + $0xe8] sm:$0xff] }
  0x77   : > { %5901 = vmatprep.mubr.msk.bf16.mxu0 %vm6802_vm1, %v10672_v6 }
  0x79   : > { %974 = vperm.xlu1 %6753, %v452_v56   ;;  %969 = vperm.xlu0 %6752, %v451_v0   ;;  %v453_v56 = vld [vmem:[%s10659_s2 + $0xe0] sm:$0xff] }
  0x7a   : > { %v7381_v0 = vld [vmem:[%s6913_s21 + $0xe0] sm:$0xff] }
  0x7b   : > { %10920 = vst [vmem:[#allocation8_spill] sm:$0xff] %v7381_v0  ;;  %v1073_v30 = vpack.c.bf16 %v7384_v51, %v7381_v0  ;;  %v10923_v51 = vrot.slane %v6919_v14, 1  ;;  %v7428_v14 = vld [vmem:[%s6913_s21 + $0xf8] sm:$0xff] }
  0x7d   : > { %711 = vperm.xlu1 %6753, %v420_v16   ;;  %706 = vperm.xlu0 %6752, %v419_v57   ;;  %v7387_v16 = vld [vmem:[%s6913_s21 + $0x108] sm:$0xff]  ;;  %v422_v57 = vld [vmem:[%s10658_s1 + $0xf8] sm:$0xff] }
  0x7e   : > { %5902 = vmatmul.mubr.msk.bf16.gmra.mxu0 %vm1078_vm2, %v1072_v1  ;;  %v421_v1 = vld [vmem:[%s10658_s1 + $0xf0] sm:$0xff]  ;;  %v10926_v0 = vrot.slane %v7387_v16, 7 }
  0x7f   : > { %5905 = vmatprep.mubr.msk.bf16.mxu0 %vm6802_vm1, %v10672_v6  ;;  %v10683_v6 = vrot.slane %v6916_v13, 1 }
  0x81   : > { %984 = vperm.xlu1 %6753, %v454_v21   ;;  %979 = vperm.xlu0 %6752, %v453_v56   ;;  %v456_v56 = vld [vmem:[%s10659_s2 + $0xf8] sm:$0xff]  ;;  %v10925_v21 = vrot.slane %v6916_v13, 7 }
  0x83   : > { %v563_v12 = vsel %vm529_vm4, %v10926_v0, %v10925_v21 }
  0x85   : > { %721 = vperm.xlu1 %6753, %v422_v57   ;;  %716 = vperm.xlu0 %6752, %v421_v1   ;;  %v835_v57 = vsel %vm802_vm3, %v10683_v6, %v10923_v51  ;;  %v424_v51 = vld [vmem:[%s10658_s1 + $0x108] sm:$0xff]  ;;  %v423_v6 = vld [vmem:[%s10658_s1 + $0x100] sm:$0xff] }
  0x86   : > { %5906 = vmatmul.mubr.msk.bf16.gmra.mxu0 %vm1078_vm2, %v1073_v30  ;;  %v7425_v30 = vld [vmem:[%s6913_s21 + $0xf0] sm:$0xff] }
  0x87   : > { %5909 = vmatprep.mubr.msk.bf16.mxu0 %vm6802_vm1, %v10927_v15  ;;  %v1074_v21 = vpack.c.bf16 %v7428_v14, %v7425_v30 }
  0x88   : > { %v7406_v19 = vpop.permute.xlu1 %839  ;;  %v7414_v1 = vpop.permute.xlu0 %566 }
  0x89   : > { %10922 = vst [vmem:[#allocation10_spill] sm:$0xff] %v7406_v19  ;;  %10924 = vst [vmem:[#allocation11_spill] sm:$0xff] %v7414_v1  ;;  %994 = vperm.xlu1 %6753, %v456_v56   ;;  %989 = vperm.xlu0 %6752, %v455_v18   ;;  %v1007_v13 = vmul.f32 %v7406_v19, %v835_v57  ;;  %v734_v0 = vmul.f32 %v7414_v1, %v563_v12  ;;  %v458_v12 = vld [vmem:[%s10659_s2 + $0x108] sm:$0xff]  ;;  %v457_v57 = vld [vmem:[%s10659_s2 + $0x100] sm:$0xff] }
  0x8c   : > { %v7440_v10 = vpop.permute.xlu1 %844  ;;  %v7442_v56 = vpop.permute.xlu0 %571 }
  0x8d   : > { %10928 = vst [vmem:[#allocation12_spill] sm:$0xff] %v7440_v10  ;;  %10929 = vst [vmem:[#allocation13_spill] sm:$0xff] %v7442_v56  ;;  %v1008_v18 = vmul.f32 %v7440_v10, %v6945_v28  ;;  %v735_v2 = vmul.f32 %v7442_v56, %v6951_v29  ;;  %731 = vperm.xlu1 %6753, %v424_v51   ;;  %726 = vperm.xlu0 %6752, %v423_v6   ;;  %v6754_v28 = vld [vmem:[%s10662_s5 + $0x38] sm:$0xff]   ;;  %v7465_v6 = vld [vmem:[%s6913_s21 + $0x100] sm:$0xff] }
  0x8e   : > { %5910 = vmatmul.mubr.msk.bf16.gmra.mxu0 %vm1078_vm2, %v1074_v21  ;;  %v6755_v21 = vld [vmem:[%s10662_s5 + $0x30] sm:$0xff]  }
  0x8f   : > { %v1526_v1 = vpack.c.bf16 %v1008_v18, %v1007_v13  ;;  %v1041_v19 = vpack.c.bf16 %v735_v2, %v734_v0  ;;  %5913 = vmatprep.mubr.msk.bf16.mxu0 %vm6802_vm1, %v10927_v15  ;;  %v1075_v2 = vpack.c.bf16 %v7387_v16, %v7465_v6 }
  0x90   : > { %v7458_v10 = vpop.permute.xlu1 %581  ;;  %v7460_v29 = vpop.permute.xlu0 %576 }
  0x91   : > { %10930 = vst [vmem:[#allocation14_spill] sm:$0xff] %v7458_v10  ;;  %10931 = vst [vmem:[#allocation15_spill] sm:$0xff] %v7460_v29  ;;  %v737_v51 = vmul.f32 %v7458_v10, %v6956_v32  ;;  %v736_v13 = vmul.f32 %v7460_v29, %v6960_v33  ;;  %1004 = vperm.xlu1 %6753, %v458_v12   ;;  %999 = vperm.xlu0 %6752, %v457_v57  }
  0x92   : > { %5920 = vmatmul.mubr.msk.bf16.vlgmr.msra.gmra.mxu1 %vm1078_vm2, %v1041_v19 }
  0x93   : > { %5923 = vmatprep.mubr.msk.bf16.mxu1 %vm6802_vm1, %v10927_v15  ;;  %v1042_v0 = vpack.c.bf16 %v737_v51, %v736_v13  ;;  %6058 = vmatpush3.bf16.msra.mxu1 %v6754_v28 }
  0x94   : > { %v7479_v32 = vpop.permute.xlu1 %854  ;;  %v7481_v18 = vpop.permute.xlu0 %849  ;;  %6059 = vmatprep.subr.bf16.mxu1 %v10927_v15 }
  0x95   : > { %10932 = vst [vmem:[#allocation16_spill] sm:$0xff] %v7479_v32  ;;  %10933 = vst [vmem:[#allocation17_spill] sm:$0xff] %v7481_v18  ;;  %v1010_v33 = vmul.f32 %v7479_v32, %v6978_v42  ;;  %v1009_v19 = vmul.f32 %v7481_v18, %v6973_v38 }
  0x96   : > { %5914 = vmatmul.mubr.msk.bf16.gmra.mxu0 %vm1078_vm2, %v1075_v2 }
  0x97   : > { %v1527_v12 = vpack.c.bf16 %v1010_v33, %v1009_v19  ;;  %6060 = vmatpush3.bf16.msra.mxu1 %v6755_v21  ;;  %5989 = vmatprep.mubr.msk.bf16.mxu0 %vm6802_vm1, %v10927_v15 }
  0x98   : > { %v7489_v57 = vpop.permute.xlu1 %591  ;;  %v7491_v28 = vpop.permute.xlu0 %586  ;;  %6061 = vmatprep.subr.bf16.mxu1 %v10927_v15 }
  0x99   : > { %10934 = vst [vmem:[#allocation18_spill] sm:$0xff] %v7489_v57  ;;  %10935 = vst [vmem:[#allocation19_spill] sm:$0xff] %v7491_v28  ;;  %v739_v51 = vmul.f32 %v7489_v57, %v6983_v45  ;;  %v738_v42 = vmul.f32 %v7491_v28, %v6987_v46 }
  0x9a   : > { %5924 = vmatmul.mubr.msk.bf16.gmra.mxu1 %vm1078_vm2, %v1042_v0 }
  0x9b   : > { %5927 = vmatprep.mubr.msk.bf16.mxu1 %vm6802_vm1, %v10927_v15  ;;  %v1043_v38 = vpack.c.bf16 %v739_v51, %v738_v42 }
  0x9c   : > { %v7503_v13 = vpop.permute.xlu1 %864  ;;  %v7505_v2 = vpop.permute.xlu0 %859 }
  0x9d   : > { %10936 = vst [vmem:[#allocation20_spill] sm:$0xff] %v7503_v13  ;;  %10937 = vst [vmem:[#allocation21_spill] sm:$0xff] %v7505_v2  ;;  %v1012_v21 = vmul.f32 %v7503_v13, %v6991_v47  ;;  %v1011_v33 = vmul.f32 %v7505_v2, %v6995_v48 }
  0x9e   : > { %5990 = vmatmul.mubr.msk.bf16.vlgmr.msra.gmra.mxu0 %vm1078_vm2, %v1526_v1 }
  0x9f   : > { %v1528_v45 = vpack.c.bf16 %v1012_v21, %v1011_v33  ;;  %5993 = vmatprep.mubr.msk.bf16.mxu0 %vm6802_vm1, %v10927_v15 }
  0xa0   : > { %v7512_v46 = vpop.permute.xlu1 %601  ;;  %v7514_v0 = vpop.permute.xlu0 %596 }
  0xa1   : > { %10938 = vst [vmem:[#allocation22_spill] sm:$0xff] %v7512_v46  ;;  %10939 = vst [vmem:[#allocation23_spill] sm:$0xff] %v7514_v0  ;;  %v741_v19 = vmul.f32 %v7512_v46, %v7010_v54  ;;  %v740_v51 = vmul.f32 %v7514_v0, %v7014_v55  ;;  %v6756_v54 = vld [vmem:[%s10662_s5 + $0x28] sm:$0xff]  }
  0xa2   : > { %5928 = vmatmul.mubr.msk.bf16.gmra.mxu1 %vm1078_vm2, %v1043_v38 }
  0xa3   : > { %5931 = vmatprep.mubr.msk.bf16.mxu1 %vm6802_vm1, %v10927_v15  ;;  %v1044_v47 = vpack.c.bf16 %v741_v19, %v740_v51  ;;  %6062 = vmatpush3.bf16.msra.mxu1 %v6756_v54 }
  0xa4   : > { %v7525_v48 = vpop.permute.xlu1 %874  ;;  %v7527_v1 = vpop.permute.xlu0 %869  ;;  %6063 = vmatprep.subr.bf16.mxu1 %v10927_v15 }
  0xa5   : > { %10940 = vst [vmem:[#allocation24_spill] sm:$0xff] %v7525_v48  ;;  %10941 = vst [vmem:[#allocation25_spill] sm:$0xff] %v7527_v1  ;;  %v1014_v42 = vmul.f32 %v7525_v48, %v7025_v62  ;;  %v1013_v21 = vmul.f32 %v7527_v1, %v7029_v63 }
  0xa6   : > { %5994 = vmatmul.mubr.msk.bf16.gmra.mxu0 %vm1078_vm2, %v1527_v12 }
  0xa7   : > { %v1529_v55 = vpack.c.bf16 %v1014_v42, %v1013_v21  ;;  %5997 = vmatprep.mubr.msk.bf16.mxu0 %vm6802_vm1, %v10927_v15 }
  0xa8   : > { %v7537_v38 = vpop.permute.xlu1 %611  ;;  %v7539_v33 = vpop.permute.xlu0 %606 }
  0xa9   : > { %10942 = vst [vmem:[#allocation26_spill] sm:$0xff] %v7537_v38  ;;  %10943 = vst [vmem:[#allocation27_spill] sm:$0xff] %v7539_v33  ;;  %v743_v62 = vmul.f32 %v7537_v38, %v7043_v5  ;;  %v742_v63 = vmul.f32 %v7539_v33, %v7047_v7 }
  0xaa   : > { %5932 = vmatmul.mubr.msk.bf16.gmra.mxu1 %vm1078_vm2, %v1044_v47 }
  0xab   : > { %5935 = vmatprep.mubr.msk.bf16.mxu1 %vm6802_vm1, %v10927_v15  ;;  %v1045_v12 = vpack.c.bf16 %v743_v62, %v742_v63 }
  0xac   : > { %v7551_v19 = vpop.permute.xlu1 %884  ;;  %v7553_v51 = vpop.permute.xlu0 %879 }
  0xad   : > { %10944 = vst [vmem:[#allocation28_spill] sm:$0xff] %v7551_v19  ;;  %10945 = vst [vmem:[#allocation29_spill] sm:$0xff] %v7553_v51  ;;  %v1016_v42 = vmul.f32 %v7551_v19, %v7070_v24  ;;  %v1015_v21 = vmul.f32 %v7553_v51, %v7074_v25 }
  0xae   : > { %5998 = vmatmul.mubr.msk.bf16.gmra.mxu0 %vm1078_vm2, %v1528_v45 }
  0xaf   : > { %v1530_v5 = vpack.c.bf16 %v1016_v42, %v1015_v21  ;;  %6001 = vmatprep.mubr.msk.bf16.mxu0 %vm6802_vm1, %v10927_v15 }
  0xb0   : > { %v7560_v7 = vpop.permute.xlu1 %621  ;;  %v7562_v47 = vpop.permute.xlu0 %616 }
  0xb1   : > { %10946 = vst [vmem:[#allocation30_spill] sm:$0xff] %v7560_v7  ;;  %10947 = vst [vmem:[#allocation31_spill] sm:$0xff] %v7562_v47  ;;  %v745_v54 = vmul.f32 %v7560_v7, %v7089_v35  ;;  %v744_v62 = vmul.f32 %v7562_v47, %v7093_v36 }
  0xb2   : > { %5936 = vmatmul.mubr.msk.bf16.gmra.mxu1 %vm1078_vm2, %v1045_v12 }
  0xb3   : > { %5939 = vmatprep.mubr.msk.bf16.mxu1 %vm6802_vm1, %v10927_v15  ;;  %v1046_v24 = vpack.c.bf16 %v745_v54, %v744_v62 }
  0xb4   : > { %v7573_v25 = vpop.permute.xlu1 %894  ;;  %v7575_v45 = vpop.permute.xlu0 %889 }
  0xb5   : > { %10948 = vst [vmem:[#allocation32_spill] sm:$0xff] %v7573_v25  ;;  %10949 = vst [vmem:[#allocation33_spill] sm:$0xff] %v7575_v45  ;;  %v1018_v63 = vmul.f32 %v7573_v25, %v7104_v49  ;;  %v1017_v42 = vmul.f32 %v7575_v45, %v7108_v50 }
  0xb6   : > { %6002 = vmatmul.mubr.msk.bf16.gmra.mxu0 %vm1078_vm2, %v1529_v55 }
  0xb7   : > { %v1531_v35 = vpack.c.bf16 %v1018_v63, %v1017_v42  ;;  %6005 = vmatprep.mubr.msk.bf16.mxu0 %vm6802_vm1, %v10927_v15 }
  0xb8   : > { %v7582_v36 = vpop.permute.xlu1 %631  ;;  %v7584_v12 = vpop.permute.xlu0 %626 }
  0xb9   : > { %10950 = vst [vmem:[#allocation34_spill] sm:$0xff] %v7582_v36  ;;  %10951 = vst [vmem:[#allocation35_spill] sm:$0xff] %v7584_v12  ;;  %v747_v21 = vmul.f32 %v7582_v36, %v7122_v58  ;;  %v746_v54 = vmul.f32 %v7584_v12, %v7126_v59 }
  0xba   : > { %5940 = vmatmul.mubr.msk.bf16.gmra.mxu1 %vm1078_vm2, %v1046_v24 }
  0xbb   : > { %5943 = vmatprep.mubr.msk.bf16.mxu1 %vm6802_vm1, %v10927_v15  ;;  %v1047_v49 = vpack.c.bf16 %v747_v21, %v746_v54 }
  0xbc   : > { %v7595_v50 = vpop.permute.xlu1 %904  ;;  %v7597_v55 = vpop.permute.xlu0 %899 }
  0xbd   : > { %10952 = vst [vmem:[#allocation36_spill] sm:$0xff] %v7595_v50  ;;  %10953 = vst [vmem:[#allocation37_spill] sm:$0xff] %v7597_v55  ;;  %v1020_v62 = vmul.f32 %v7595_v50, %v7137_v4  ;;  %v1019_v63 = vmul.f32 %v7597_v55, %v7141_v8 }
  0xbe   : > { %6006 = vmatmul.mubr.msk.bf16.gmra.mxu0 %vm1078_vm2, %v1530_v5 }
  0xbf   : > { %v1532_v58 = vpack.c.bf16 %v1020_v62, %v1019_v63  ;;  %6009 = vmatprep.mubr.msk.bf16.mxu0 %vm6802_vm1, %v10927_v15 }
  0xc0   : > { %v7604_v59 = vpop.permute.xlu1 %641  ;;  %v7606_v24 = vpop.permute.xlu0 %636 }
  0xc1   : > { %10954 = vst [vmem:[#allocation38_spill] sm:$0xff] %v7604_v59  ;;  %10955 = vst [vmem:[#allocation39_spill] sm:$0xff] %v7606_v24  ;;  %v749_v42 = vmul.f32 %v7604_v59, %v7155_v17  ;;  %v748_v21 = vmul.f32 %v7606_v24, %v7159_v20  ;;  %v6757_v20 = vld [vmem:[%s10662_s5 + $0x20] sm:$0xff]  }
  0xc2   : > { %5944 = vmatmul.mubr.msk.bf16.gmra.mxu1 %vm1078_vm2, %v1047_v49 }
  0xc3   : > { %5947 = vmatprep.mubr.msk.bf16.mxu1 %vm6802_vm1, %v10927_v15  ;;  %v1048_v4 = vpack.c.bf16 %v749_v42, %v748_v21  ;;  %6064 = vmatpush3.bf16.msra.mxu1 %v6757_v20 }
  0xc4   : > { %v7617_v8 = vpop.permute.xlu1 %914  ;;  %v7619_v5 = vpop.permute.xlu0 %909  ;;  %6209 = vmatprep.subr.bf16.mxu1 %v10927_v15 }
  0xc5   : > { %10956 = vst [vmem:[#allocation40_spill] sm:$0xff] %v7617_v8  ;;  %10957 = vst [vmem:[#allocation41_spill] sm:$0xff] %v7619_v5  ;;  %v1022_v54 = vmul.f32 %v7617_v8, %v7170_v31  ;;  %v1021_v62 = vmul.f32 %v7619_v5, %v7174_v34 }
  0xc6   : > { %6010 = vmatmul.mubr.msk.bf16.gmra.mxu0 %vm1078_vm2, %v1531_v35 }
  0xc7   : > { %v1533_v17 = vpack.c.bf16 %v1022_v54, %v1021_v62  ;;  %6013 = vmatprep.mubr.msk.bf16.mxu0 %vm6802_vm1, %v10927_v15 }
  0xc8   : > { %v7629_v49 = vpop.permute.xlu1 %651  ;;  %v7631_v63 = vpop.permute.xlu0 %646 }
  0xc9   : > { %10958 = vst [vmem:[#allocation42_spill] sm:$0xff] %v7629_v49  ;;  %10959 = vst [vmem:[#allocation43_spill] sm:$0xff] %v7631_v63  ;;  %v751_v31 = vmul.f32 %v7629_v49, %v7181_v40  ;;  %v750_v34 = vmul.f32 %v7631_v63, %v7185_v41 }
  0xca   : > { %5948 = vmatmul.mubr.msk.bf16.gmra.mxu1 %vm1078_vm2, %v1048_v4 }
  0xcb   : > { %5951 = vmatprep.mubr.msk.bf16.mxu1 %vm6802_vm1, %v10927_v15  ;;  %v1049_v35 = vpack.c.bf16 %v751_v31, %v750_v34 }
  0xcc   : > { %v7643_v42 = vpop.permute.xlu1 %924  ;;  %v7645_v21 = vpop.permute.xlu0 %919 }
  0xcd   : > { %10960 = vst [vmem:[#allocation44_spill] sm:$0xff] %v7643_v42  ;;  %10961 = vst [vmem:[#allocation45_spill] sm:$0xff] %v7645_v21  ;;  %v1024_v54 = vmul.f32 %v7643_v42, %v7196_v60  ;;  %v1023_v40 = vmul.f32 %v7645_v21, %v7200_v61 }
  0xce   : > { %6014 = vmatmul.mubr.msk.bf16.gmra.mxu0 %vm1078_vm2, %v1532_v58 }
  0xcf   : > { %v1534_v41 = vpack.c.bf16 %v1024_v54, %v1023_v40  ;;  %6017 = vmatprep.mubr.msk.bf16.mxu0 %vm6802_vm1, %v10927_v15 }
  0xd0   : > { %v7652_v4 = vpop.permute.xlu1 %661  ;;  %v7654_v62 = vpop.permute.xlu0 %656 }
  0xd1   : > { %10962 = vst [vmem:[#allocation46_spill] sm:$0xff] %v7652_v4  ;;  %10963 = vst [vmem:[#allocation47_spill] sm:$0xff] %v7654_v62  ;;  %v753_v20 = vmul.f32 %v7652_v4, %v7214_v9  ;;  %v752_v31 = vmul.f32 %v7654_v62, %v7218_v11 }
  0xd2   : > { %5952 = vmatmul.mubr.msk.bf16.gmra.mxu1 %vm1078_vm2, %v1049_v35 }
  0xd3   : > { %5955 = vmatprep.mubr.msk.bf16.mxu1 %vm6802_vm1, %v10927_v15  ;;  %v1050_v60 = vpack.c.bf16 %v753_v20, %v752_v31 }
  0xd4   : > { %v7665_v61 = vpop.permute.xlu1 %934  ;;  %v7667_v58 = vpop.permute.xlu0 %929 }
  0xd5   : > { %10964 = vst [vmem:[#allocation48_spill] sm:$0xff] %v7665_v61  ;;  %10965 = vst [vmem:[#allocation49_spill] sm:$0xff] %v7667_v58  ;;  %v1026_v34 = vmul.f32 %v7665_v61, %v7229_v27  ;;  %v1025_v54 = vmul.f32 %v7667_v58, %v7233_v37  ;;  %v10982_v58 = vld [vmem:[#allocation6_spill] sm:$0xff] }
  0xd6   : > { %v7673_v9 = vpop.f32.mrf.mxu0  ;;  %6018 = vmatmul.mubr.msk.bf16.gmra.mxu0 %vm1078_vm2, %v1533_v17  ;;  %v519_v4 = vrot.slane %v10982_v58, 7 }
  0xd7   : > { %v1535_v11 = vpack.c.bf16 %v1026_v34, %v1025_v54  ;;  %6021 = vmatprep.mubr.msk.bf16.mxu0 %vm6802_vm1, %v10927_v15 }
  0xd8   : > { %v7676_v35 = vpop.permute.xlu1 %671  ;;  %v7678_v40 = vpop.permute.xlu0 %666 }
  0xd9   : > { %10966 = vst [vmem:[#allocation50_spill] sm:$0xff] %v7676_v35  ;;  %10967 = vst [vmem:[#allocation51_spill] sm:$0xff] %v7678_v40  ;;  %v755_v20 = vmul.f32 %v7676_v35, %v7247_v52  ;;  %v754_v27 = vmul.f32 %v7678_v40, %v7251_v53  ;;  %v5851_v31 = vpop.f32.mrf.mxu0 }
  0xda   : > { %5956 = vmatmul.mubr.msk.bf16.gmra.mxu1 %vm1078_vm2, %v1050_v60 }
  0xdb   : > { %v7687_v37 = vpop.f32.mrf.mxu0  ;;  %5959 = vmatprep.mubr.msk.bf16.mxu1 %vm6802_vm1, %v10927_v15  ;;  %v1051_v17 = vpack.c.bf16 %v755_v20, %v754_v27  ;;  %v518_v27 = vrot.slane %v7338_v23, 7 }
  0xdc   : > { %v7691_v34 = vpop.permute.xlu1 %944  ;;  %v7693_v54 = vpop.permute.xlu0 %939 }
  0xdd   : > { %10968 = vst [vmem:[#allocation52_spill] sm:$0xff] %v7691_v34  ;;  %10969 = vst [vmem:[#allocation53_spill] sm:$0xff] %v7693_v54  ;;  %v1028_v56 = vmul.f32 %v7691_v34, %v7262_v22  ;;  %v1027_v52 = vmul.f32 %v7693_v54, %v7266_v3  ;;  %v5852_v53 = vpop.f32.mrf.mxu0 }
  0xde   : > { %6022 = vmatmul.mubr.msk.bf16.gmra.mxu0 %vm1078_vm2, %v1534_v41 }
  0xdf   : > { %v7699_v31 = vpop.f32.mrf.mxu0  ;;  %v1536_v60 = vpack.c.bf16 %v1028_v56, %v1027_v52  ;;  %6025 = vmatprep.mubr.msk.bf16.mxu0 %vm6802_vm1, %v10927_v15 }
  0xe0   : > { %v7702_v35 = vpop.permute.xlu1 %681  ;;  %v7704_v40 = vpop.permute.xlu0 %676 }
  0xe1   : > { %10970 = vst [vmem:[#allocation54_spill] sm:$0xff] %v7702_v35  ;;  %10971 = vst [vmem:[#allocation55_spill] sm:$0xff] %v7704_v40  ;;  %v757_v20 = vmul.f32 %v7702_v35, %v7280_v26  ;;  %v756_v22 = vmul.f32 %v7704_v40, %v7284_v43  ;;  %v5855_v3 = vpop.f32.mrf.mxu0 }
  0xe2   : > { %5960 = vmatmul.mubr.msk.bf16.gmra.mxu1 %vm1078_vm2, %v1051_v17  ;;  %v10974_v17 = vld [vmem:[#allocation4_spill] sm:$0xff] }
  0xe3   : > { %v7714_v41 = vpop.f32.mrf.mxu0  ;;  %5963 = vmatprep.mubr.msk.bf16.mxu1 %vm6802_vm1, %v10927_v15  ;;  %v1052_v56 = vpack.c.bf16 %v757_v20, %v756_v22  ;;  %v10975_v35 = vrot.slane %v10974_v17, 7 }
  0xe4   : > { %v7718_v52 = vpop.permute.xlu1 %954  ;;  %v7720_v53 = vpop.permute.xlu0 %949 }
  0xe5   : > { %10972 = vst [vmem:[#allocation56_spill] sm:$0xff] %v7718_v52  ;;  %10973 = vst [vmem:[#allocation57_spill] sm:$0xff] %v7720_v53  ;;  %v1030_v26 = vmul.f32 %v7718_v52, %v7300_v44  ;;  %v1029_v43 = vmul.f32 %v7720_v53, %v7304_v39  ;;  %v5856_v3 = vpop.f32.mrf.mxu0  ;;  %v538_v34 = vsel %vm529_vm4, %v10975_v35, %v518_v27  ;;  %v10979_v39 = vld [vmem:[#allocation5_spill] sm:$0xff] }
  0xe6   : > { %6026 = vmatmul.mubr.msk.bf16.gmra.mxu0 %vm1078_vm2, %v1535_v11 }
  0xe7   : > { %v1537_v54 = vpack.c.bf16 %v1030_v26, %v1029_v43  ;;  %v7730_v61 = vpop.f32.mrf.mxu0  ;;  %6029 = vmatprep.mubr.msk.bf16.mxu0 %vm6802_vm1, %v10927_v15 }
  0xe8   : > { %v7733_v20 = vpop.permute.xlu1 %691  ;;  %v7735_v22 = vpop.permute.xlu0 %686 }
  0xe9   : > { %10977 = vst [vmem:[#allocation4_spill] sm:$0xff] %v7733_v20  ;;  %10978 = vst [vmem:[#allocation2_spill] sm:$0xff] %v7735_v22  ;;  %v759_v44 = vmul.f32 %v7733_v20, %v538_v34  ;;  %v758_v3 = vmul.f32 %v7735_v22, %v10979_v39  ;;  %v5859_v52 = vpop.f32.mrf.mxu0  ;;  %v10983_v34 = vld [vmem:[#allocation7_spill] sm:$0xff]  ;;  %v794_v22 = vrot.slane %v10982_v58, 1  ;;  %v10988_v58 = vld [vmem:[#allocation8_spill] sm:$0xff] }
  0xea   : > { %5964 = vmatmul.mubr.msk.bf16.gmra.mxu1 %vm1078_vm2, %v1052_v56  ;;  %v520_v20 = vrot.slane %v10983_v34, 7  ;;  %v521_v49 = vrot.slane %v10988_v58, 7  ;;  %v796_v24 = vrot.slane %v10988_v58, 1  ;;  %v524_v58 = vrot.slane %v7428_v14, 7 }
  0xeb   : > { %v7743_v35 = vpop.f32.mrf.mxu0  ;;  %5967 = vmatprep.mubr.msk.bf16.mxu1 %vm6802_vm1, %v10927_v15  ;;  %v1053_v11 = vpack.c.bf16 %v759_v44, %v758_v3  ;;  %v6758_v3 = vld [vmem:[%s10662_s5 + $0x18] sm:$0xff]  }
  0xec   : > { %v7747_v26 = vpop.permute.xlu1 %964  ;;  %v7749_v43 = vpop.permute.xlu0 %959  ;;  %v536_v44 = vsel %vm529_vm4, %v519_v4, %v520_v20  ;;  %6134 = vmatpush3.bf16.msra.mxu0 %v6758_v3  ;;  %v10990_v3 = vrot.slane %v10974_v17, 1 }
  0xed   : > { %10980 = vst [vmem:[#allocation5_spill] sm:$0xff] %v7747_v26  ;;  %10981 = vst [vmem:[#allocation58_spill] sm:$0xff] %v7749_v43  ;;  %v5860_v53 = vpop.f32.mrf.mxu0  ;;  %6135 = vmatprep.subr.bf16.mxu0 %v10927_v15 }
  0xee   : > { %6030 = vmatmul.mubr.msk.bf16.gmra.mxu0 %vm1078_vm2, %v1536_v60  ;;  %v537_v53 = vsel %vm529_vm4, %v518_v27, %v519_v4  ;;  %v793_v60 = vrot.slane %v7338_v23, 1 }
  0xef   : > { %v7753_v62 = vpop.f32.mrf.mxu0  ;;  %6033 = vmatprep.mubr.msk.bf16.mxu0 %vm6802_vm1, %v10927_v15 }
  0xf0   : > { %v7756_v56 = vpop.permute.xlu1 %701  ;;  %v7758_v52 = vpop.permute.xlu0 %696  ;;  %v810_v8 = vsel %vm802_vm3, %v793_v60, %v794_v22 }
  0xf1   : > { %10984 = vst [vmem:[#allocation6_spill] sm:$0xff] %v7756_v56  ;;  %10985 = vst [vmem:[#allocation7_spill] sm:$0xff] %v7758_v52  ;;  %v5863_v39 = vpop.f32.mrf.mxu0  ;;  %v761_v21 = vmul.f32 %v7756_v56, %v536_v44  ;;  %v760_v4 = vmul.f32 %v7758_v52, %v537_v53  ;;  %v811_v44 = vsel %vm802_vm3, %v10990_v3, %v793_v60 }
  0xf2   : > { %5968 = vmatmul.mubr.msk.bf16.gmra.mxu1 %vm1078_vm2, %v1053_v11  ;;  %v10989_v11 = vld [vmem:[#allocation9_spill] sm:$0xff]  ;;  %v1032_v5 = vmul.f32 %v7747_v26, %v810_v8  ;;  %v1031_v59 = vmul.f32 %v7749_v43, %v811_v44  ;;  %v535_v60 = vsel %vm529_vm4, %v520_v20, %v521_v49 }
  0xf3   : > { %v7772_v42 = vpop.f32.mrf.mxu0  ;;  %5971 = vmatprep.mubr.msk.bf16.mxu1 %vm6802_vm1, %v10927_v15  ;;  %v522_v63 = vrot.slane %v10989_v11, 7 }
  0xf4   : > { %v7778_v27 = vpop.permute.xlu1 %974  ;;  %v7780_v39 = vpop.permute.xlu0 %969 }
  0xf5   : > { %10986 = vst [vmem:[#allocation59_spill] sm:$0xff] %v7778_v27  ;;  %10987 = vst [vmem:[#allocation60_spill] sm:$0xff] %v7780_v39  ;;  %v5864_v23 = vpop.f32.mrf.mxu0  ;;  %v534_v17 = vsel %vm529_vm4, %v521_v49, %v522_v63  ;;  %v1538_v49 = vpack.c.bf16 %v1032_v5, %v1031_v59 }
  0xf6   : > { %6034 = vmatmul.mubr.msk.bf16.gmra.mxu0 %vm1078_vm2, %v1537_v54  ;;  %v1054_v23 = vpack.c.bf16 %v761_v21, %v760_v4  ;;  %v795_v54 = vrot.slane %v10983_v34, 1  ;;  %v523_v34 = vrot.slane %v7425_v30, 7 }
  0xf7   : > { %v7791_v53 = vpop.f32.mrf.mxu0  ;;  %6037 = vmatprep.mubr.msk.bf16.mxu0 %vm6802_vm1, %v10927_v15 }
  0xf8   : > { %v7794_v56 = vpop.permute.xlu1 %711  ;;  %v7796_v52 = vpop.permute.xlu0 %706 }
  0xf9   : > { %10991 = vst [vmem:[#allocation8_spill] sm:$0xff] %v7794_v56  ;;  %10992 = vst [vmem:[#allocation9_spill] sm:$0xff] %v7796_v52  ;;  %v5867_v3 = vpop.f32.mrf.mxu0  ;;  %v763_v8 = vmul.f32 %v7794_v56, %v534_v17  ;;  %v762_v4 = vmul.f32 %v7796_v52, %v535_v60  ;;  %v532_v56 = vsel %vm529_vm4, %v523_v34, %v524_v58  ;;  %v798_v52 = vrot.slane %v7425_v30, 1 }
  0xfa   : > { %5972 = vmatmul.mubr.msk.bf16.gmra.mxu1 %vm1078_vm2, %v1054_v23  ;;  %v808_v23 = vsel %vm802_vm3, %v795_v54, %v796_v24  ;;  %v809_v3 = vsel %vm802_vm3, %v794_v22, %v795_v54  ;;  %v533_v22 = vsel %vm529_vm4, %v522_v63, %v523_v34 }
  0xfb   : > { %v7809_v21 = vpop.f32.mrf.mxu0  ;;  %5975 = vmatprep.mubr.msk.bf16.mxu1 %vm6802_vm1, %v10927_v15  ;;  %v1055_v59 = vpack.c.bf16 %v763_v8, %v762_v4  ;;  %v1034_v5 = vmul.f32 %v7778_v27, %v808_v23 }
  0xfc   : > { %v7815_v44 = vpop.permute.xlu1 %984  ;;  %v7817_v26 = vpop.permute.xlu0 %979 }
  0xfd   : > { %10993 = vst [vmem:[#allocation61_spill] sm:$0xff] %v7815_v44  ;;  %10994 = vst [vmem:[#allocation62_spill] sm:$0xff] %v7817_v26  ;;  %v5868_v20 = vpop.f32.mrf.mxu0 }
  0xfe   : > { %6038 = vmatmul.mubr.msk.bf16.gmra.mxu0 %vm1078_vm2, %v1538_v49  ;;  %v1033_v20 = vmul.f32 %v7780_v39, %v809_v3  ;;  %v797_v49 = vrot.slane %v10989_v11, 1  ;;  %v525_v11 = vrot.slane %v7465_v6, 7 }
  0xff   : > { %v7825_v43 = vpop.f32.mrf.mxu0  ;;  %6041 = vmatprep.mubr.msk.bf16.mxu0 %vm6802_vm1, %v10927_v15 }
 0x100   : > { %v7828_v17 = vpop.permute.xlu1 %721  ;;  %v7830_v60 = vpop.permute.xlu0 %716  ;;  %v1539_v63 = vpack.c.bf16 %v1034_v5, %v1033_v20  ;;  %v806_v30 = vsel %vm802_vm3, %v797_v49, %v798_v52 }
 0x101   : > { %10995 = vst [vmem:[#allocation63_spill] sm:$0xff] %v7828_v17  ;;  %10996 = vst [vmem:[#allocation64_spill] sm:$0xff] %v7830_v60  ;;  %v5871_v54 = vpop.f32.mrf.mxu0  ;;  %v765_v4 = vmul.f32 %v7828_v17, %v532_v56  ;;  %v764_v23 = vmul.f32 %v7830_v60, %v533_v22  ;;  %v1036_v5 = vmul.f32 %v7815_v44, %v806_v30 }
 0x102   : > { %5976 = vmatmul.mubr.msk.bf16.gmra.mxu1 %vm1078_vm2, %v1055_v59  ;;  %v807_v59 = vsel %vm802_vm3, %v796_v24, %v797_v49  ;;  %v531_v49 = vsel %vm529_vm4, %v524_v58, %v525_v11 }
 0x103   : > { %v7843_v8 = vpop.f32.mrf.mxu0  ;;  %5979 = vmatprep.mubr.msk.bf16.mxu1 %vm6802_vm1, %v10927_v15  ;;  %v1056_v22 = vpack.c.bf16 %v765_v4, %v764_v23  ;;  %v1035_v20 = vmul.f32 %v7817_v26, %v807_v59  ;;  %v799_v4 = vrot.slane %v7428_v14, 1  ;;  %v800_v23 = vrot.slane %v7465_v6, 1 }
 0x104   : > { %v7849_v3 = vpop.permute.xlu1 %994  ;;  %v7851_v27 = vpop.permute.xlu0 %989 }
 0x105   : > { %10997 = vst [vmem:[#allocation65_spill] sm:$0xff] %v7849_v3  ;;  %10998 = vst [vmem:[#allocation66_spill] sm:$0xff] %v7851_v27  ;;  %v5872_v34 = vpop.f32.mrf.mxu0  ;;  %v1540_v60 = vpack.c.bf16 %v1036_v5, %v1035_v20  ;;  %v804_v58 = vsel %vm802_vm3, %v799_v4, %v800_v23  ;;  %v805_v14 = vsel %vm802_vm3, %v798_v52, %v799_v4  ;;  %v801_v52 = vrot.slane %v7387_v16, 1  ;;  %v11003_v4 = vld [vmem:[#allocation3_spill] sm:$0xff] }
 0x106   : > { %6042 = vmatmul.mubr.msk.bf16.gmra.mxu0 %vm1078_vm2, %v1539_v63  ;;  %v11000_v34 = vrot.slane %v7387_v16, 7 }
 0x107   : > { %v7858_v54 = vpop.f32.mrf.mxu0  ;;  %6045 = vmatprep.mubr.msk.bf16.mxu0 %vm6802_vm1, %v10927_v15  ;;  %v803_v16 = vsel %vm802_vm3, %v800_v23, %v801_v52 }
 0x108   : > { %v7861_v56 = vpop.permute.xlu1 %731  ;;  %v530_v17 = vsel %vm529_vm4, %v525_v11, %v11000_v34  ;;  %v7871_v24 = vpop.permute.xlu0 %726  ;;  %v6760_v11 = vld [vmem:[%s10662_s5 + $0x10] sm:$0xff]  }
 0x109   : > { %10999 = vst [vmem:[#allocation67_spill] sm:$0xff] %v7861_v56  ;;  %11001 = vst [vmem:[#allocation68_spill] sm:$0xff] %v7871_v24  ;;  %v5875_v63 = vpop.f32.mrf.mxu0  ;;  %v767_v59 = vmul.f32 %v7861_v56, %v530_v17  ;;  %v766_v34 = vmul.f32 %v7871_v24, %v531_v49  ;;  %v1037_v17 = vmul.f32 %v7851_v27, %v805_v14  ;;  %6136 = vmatpush3.bf16.msra.mxu0 %v6760_v11 }
 0x10a   : > { %5980 = vmatmul.mubr.msk.bf16.gmra.mxu1 %vm1078_vm2, %v1056_v22  ;;  %6137 = vmatprep.subr.bf16.mxu0 %v10927_v15 }
 0x10b   : > { %v7878_v30 = vpop.f32.mrf.mxu0  ;;  %5983 = vmatprep.mubr.msk.bf16.mxu1 %vm6802_vm1, %v10927_v15  ;;  %v1057_v22 = vpack.c.bf16 %v767_v59, %v766_v34  ;;  %v11004_v59 = vrot.slane %v11003_v4, 1 }
 0x10c   : > { %v7905_v63 = vpop.permute.xlu1 %1004 }
 0x10d   : > { %v5876_v44 = vpop.f32.mrf.mxu0  ;;  %11002 = vst [vmem:[#allocation69_spill] sm:$0xff] %v7905_v63  ;;  %v836_v34 = vsel %vm802_vm3, %v801_v52, %v11004_v59 }
 0x10e   : > { %6046 = vmatmul.mubr.msk.bf16.gmra.mxu0 %vm1078_vm2, %v1540_v60  ;;  %v1038_v44 = vmul.f32 %v7849_v3, %v804_v58  ;;  %v7911_v58 = vpop.permute.xlu0 %999  ;;  %v1040_v11 = vmul.f32 %v7905_v63, %v836_v34 }
 0x10f   : > { %v7888_v6 = vpop.f32.mrf.mxu0  ;;  %6049 = vmatprep.mubr.msk.bf16.mxu0 %vm6802_vm1, %v10927_v15  ;;  %11005 = vst [vmem:[#allocation3_spill] sm:$0xff] %v7911_v58 }
 0x110   : > { %v1541_v20 = vpack.c.bf16 %v1038_v44, %v1037_v17 }
 0x111   : > { %v5879_v5 = vpop.f32.mrf.mxu0 }
 0x112   : > { %5984 = vmatmul.mubr.msk.bf16.gmra.mxu1 %vm1078_vm2, %v1057_v22  ;;  %v1039_v22 = vmul.f32 %v7911_v58, %v803_v16 }
 0x113   : > { %v7901_v60 = vpop.f32.mrf.mxu0  ;;  %6065 = vmatprep.mubr.msk.bf16.mxu1 %vm6802_vm1, %v10927_v15 }
 0x114   : > { %v1542_v5 = vpack.c.bf16 %v1040_v11, %v1039_v22 }
 0x115   : > { %v5880_v49 = vpop.f32.mrf.mxu0 }
 0x116   : > { %6050 = vmatmul.mubr.msk.bf16.gmra.mxu0 %vm1078_vm2, %v1541_v20 }
 0x117   : > { %v7915_v14 = vpop.f32.mrf.mxu0  ;;  %6053 = vmatprep.mubr.msk.bf16.mxu0 %vm6802_vm1, %v10927_v15 }
 0x119   : > { %v5883_v44 = vpop.f32.mrf.mxu0 }
 0x11b   : > { %v7922_v17 = vpop.f32.mrf.mxu0 }
 0x11c   : > { %11006 = vst [vmem:[#allocation70_spill] sm:$0xff] %v7922_v17 }
 0x11d   : > { %v5884_v49 = vpop.f32.mrf.mxu0 }
 0x11e   : > { %6054 = vmatmul.mubr.msk.bf16.gmra.mxu0 %vm1078_vm2, %v1542_v5  ;;  %v6762_v5 = vld [vmem:[%s10662_s5 + $0x8] sm:$0xff]  }
 0x11f   : > { %v7924_v4 = vpop.f32.mrf.mxu0  ;;  %6141 = vmatprep.mubr.msk.bf16.mxu0 %vm6802_vm1, %v10927_v15  ;;  %6138 = vmatpush3.bf16.msra.mxu0 %v6762_v5 }
 0x120   : > { %11007 = vst [vmem:[#allocation71_spill] sm:$0xff] %v7924_v4  ;;  %6139 = vmatprep.subr.bf16.mxu0 %v10927_v15  ;;  %v11026_v4 = vld [vmem:[#allocation12_spill] sm:$0xff] }
 0x121   : > { %v5887_v23 = vpop.f32.mrf.mxu0 }
 0x123   : > { %v7929_v52 = vpop.f32.mrf.mxu0 }
 0x124   : > { %11008 = vst [vmem:[#allocation72_spill] sm:$0xff] %v7929_v52  ;;  %v11025_v52 = vld [vmem:[#allocation10_spill] sm:$0xff] }
 0x125   : > { %v5888_v20 = vpop.f32.mrf.mxu0 }
 0x127   : > { %v7931_v59 = vpop.f32.mrf.mxu0 }
 0x128   : > { %11009 = vst [vmem:[#allocation73_spill] sm:$0xff] %v7931_v59 }
 0x129   : > { %v5891_v34 = vpop.f32.mrf.mxu0 }
 0x12b   : > { %v7933_v16 = vpop.f32.mrf.mxu0 }
 0x12c   : > { %11010 = vst [vmem:[#allocation74_spill] sm:$0xff] %v7933_v16 }
 0x12d   : > { %v5892_v44 = vpop.f32.mrf.mxu0 }
 0x12f   : > { %v7935_v63 = vpop.f32.mrf.mxu0 }
 0x130   : > { %11011 = vst [vmem:[#allocation75_spill] sm:$0xff] %v7935_v63 }
 0x131   : > { %v5895_v11 = vpop.f32.mrf.mxu0 }
 0x133   : > { %v7937_v22 = vpop.f32.mrf.mxu0 }
 0x134   : > { %11012 = vst [vmem:[#allocation76_spill] sm:$0xff] %v7937_v22 }
 0x135   : > { %v5896_v49 = vpop.f32.mrf.mxu0 }
 0x137   : > { %v7943_v23 = vpop.f32.mrf.mxu0 }
 0x138   : > { %11013 = vst [vmem:[#allocation77_spill] sm:$0xff] %v7943_v23 }
 0x139   : > { %v5899_v20 = vpop.f32.mrf.mxu0 }
 0x13b   : > { %v7945_v34 = vpop.f32.mrf.mxu0 }
 0x13c   : > { %11014 = vst [vmem:[#allocation78_spill] sm:$0xff] %v7945_v34 }
 0x13d   : > { %v5900_v58 = vpop.f32.mrf.mxu0 }
 0x13e   : > { %v6764_v58 = vld [vmem:[%s10662_s5] sm:$0xff]  }
 0x13f   : > { %v7947_v44 = vpop.f32.mrf.mxu0  ;;  %6140 = vmatpush3.bf16.msra.mxu0 %v6764_v58 }
 0x140   : > { %11015 = vst [vmem:[#allocation79_spill] sm:$0xff] %v7947_v44  ;;  %6285 = vmatprep.subr.bf16.mxu0 %v10927_v15 }
 0x141   : > { %v5903_v56 = vpop.f32.mrf.mxu0 }
 0x143   : > { %v7949_v11 = vpop.f32.mrf.mxu0 }
 0x144   : > { %11016 = vst [vmem:[#allocation80_spill] sm:$0xff] %v7949_v11 }
 0x145   : > { %v5904_v24 = vpop.f32.mrf.mxu0 }
 0x147   : > { %v7951_v3 = vpop.f32.mrf.mxu0 }
 0x148   : > { %11017 = vst [vmem:[#allocation81_spill] sm:$0xff] %v7951_v3 }
 0x149   : > { %v5907_v27 = vpop.f32.mrf.mxu0 }
 0x14b   : > { %v7953_v26 = vpop.f32.mrf.mxu0 }
 0x14c   : > { %11018 = vst [vmem:[#allocation82_spill] sm:$0xff] %v7953_v26 }
 0x14d   : > { %v5908_v5 = vpop.f32.mrf.mxu0 }
 0x14f   : > { %v7955_v49 = vpop.f32.mrf.mxu0 }
 0x150   : > { %11019 = vst [vmem:[#allocation83_spill] sm:$0xff] %v7955_v49 }
 0x151   : > { %v5911_v39 = vpop.f32.mrf.mxu0 }
 0x152   : > { %v1391_v23 = vpop.f32.mrf.mxu1 }
 0x153   : > { %v7957_v20 = vpop.f32.mrf.mxu0 }
 0x154   : > { %11020 = vst [vmem:[#allocation84_spill] sm:$0xff] %v7957_v20  ;;  %v5921_v56 = vpop.f32.mrf.mxu1  ;;  %v1392_v20 = vadd.f32 %v1391_v23, %v7673_v9 }
 0x155   : > { %v5912_v44 = vpop.f32.mrf.mxu0 }
 0x156   : > { %v1394_v24 = vpop.f32.mrf.mxu1  ;;  %v7971_v44 = vld [vmem:[%s10661_s4] ss:$0 sm:$0xff] }
 0x157   : > { %v7963_v27 = vpop.f32.mrf.mxu0 }
 0x158   : > { %11021 = vst [vmem:[#allocation85_spill] sm:$0xff] %v7963_v27  ;;  %v5922_v26 = vpop.f32.mrf.mxu1 }
 0x159   : > { %v5915_v5 = vpop.f32.mrf.mxu0  ;;  %v1395_v26 = vadd.f32 %v1394_v24, %v7687_v37  ;;  %v6759_v37 = vld [vmem:[%s10662_s5 + $0x58] sm:$0xff]  }
 0x15a   : > { %v1399_v3 = vpop.f32.mrf.mxu1 }
 0x15b   : > { %v7965_v49 = vpop.f32.mrf.mxu0  ;;  %v1400_v23 = vadd.f32 %v1399_v3, %v7699_v31 }
 0x15c   : > { %11022 = vst [vmem:[#allocation86_spill] sm:$0xff] %v7965_v49  ;;  %v5925_v39 = vpop.f32.mrf.mxu1 }
 0x15d   : > { %v5916_v11 = vpop.f32.mrf.mxu0 }
 0x15e   : > { %v1402_v34 = vpop.f32.mrf.mxu1 }
 0x15f   : > { %v1633_v22 = vpop.f32.mrf.mxu0  ;;  %v1403_v31 = vadd.f32 %v1402_v34, %v7714_v41  ;;  %v6761_v41 = vld [vmem:[%s10662_s5 + $0x50] sm:$0xff]  }
 0x160   : > { %v1768_v63 = vadd.f32 %v1633_v22, %v1392_v20  ;;  %v5926_v58 = vpop.f32.mrf.mxu1 }
 0x161   : > { %v5991_v56 = vpop.f32.mrf.mxu0 }
 0x162   : > { %v1407_v5 = vpop.f32.mrf.mxu1  ;;  %v7975_v27 = vadd.f32 %v7971_v44, %v1768_v63 }
 0x163   : > { %v1636_v39 = vpop.f32.mrf.mxu0 }
 0x164   : > { %11023 = vst [vmem:[#allocation87_spill] sm:$0xff] %v7975_v27  ;;  %v1769_v11 = vadd.f32 %v1636_v39, %v1395_v26  ;;  %v5929_v49 = vpop.f32.mrf.mxu1  ;;  %v10777_v16 = vrot.slane %v7975_v27, 7  ;;  %v10780_v3 = vrot.slane %v7975_v27, 1 }
 0x165   : > { %v5992_v9 = vpop.f32.mrf.mxu0 }
 0x166   : > { %v1810_v22 = vadd.f32 %v7971_v44, %v1769_v11  ;;  %v1410_v20 = vpop.f32.mrf.mxu1 }
 0x167   : > { %v1641_v59 = vpop.f32.mrf.mxu0 }
 0x168   : > { %v1844_v24 = vrot.slane %v1810_v22, 7  ;;  %v1946_v63 = vrot.slane %v1810_v22, 1  ;;  %v2072_v58 = vpack.c.bf16 %v1810_v22, %v7975_v27  ;;  %v1770_v56 = vadd.f32 %v1641_v59, %v1400_v23  ;;  %v5930_v49 = vpop.f32.mrf.mxu1 }
 0x169   : > { %v5995_v26 = vpop.f32.mrf.mxu0 }
 0x16a   : > { %v7990_v39 = vsel %vm529_vm4, %v10777_v16, %v1844_v24  ;;  %v1811_v11 = vadd.f32 %v7971_v44, %v1770_v56  ;;  %v1415_v9 = vpop.f32.mrf.mxu1  ;;  %6066 = vmatmul.mubr.msk.bf16.vlgmr.msra.gmra.mxu1 %vm2122_vm5, %v2072_v58  ;;  %v2011_v59 = vsel %vm802_vm3, %v10780_v3, %v1946_v63  ;;  %v1408_v58 = vadd.f32 %v1407_v5, %v7730_v61  ;;  %v6763_v61 = vld [vmem:[%s10662_s5 + $0x48] sm:$0xff]  }
 0x16b   : > { %11024 = vst [vmem:[#allocation88_spill] sm:$0xff] %v7990_v39  ;;  %6210 = vmatpush3.bf16.msra.mxu1 %v6759_v37  ;;  %v1644_v22 = vpop.f32.mrf.mxu0  ;;  %6069 = vmatprep.mubr.msk.bf16.mxu1 %vm6802_vm1, %v10927_v15  ;;  %v8011_v3 = vmul.f32 %v2011_v59, %v11025_v52 }
 0x16c   : > { %v1845_v34 = vrot.slane %v1811_v11, 7  ;;  %v1947_v23 = vrot.slane %v1811_v11, 1  ;;  %v1771_v56 = vadd.f32 %v1644_v22, %v1403_v31  ;;  %v5933_v49 = vpop.f32.mrf.mxu1  ;;  %6211 = vmatprep.subr.bf16.mxu1 %v10927_v15 }
 0x16d   : > { %v5996_v37 = vpop.f32.mrf.mxu0 }
 0x16e   : > { %v1908_v26 = vsel %vm529_vm4, %v1844_v24, %v1845_v34  ;;  %v2010_v16 = vsel %vm802_vm3, %v1946_v63, %v1947_v23  ;;  %v1812_v27 = vadd.f32 %v7971_v44, %v1771_v56  ;;  %v1418_v39 = vpop.f32.mrf.mxu1 }
 0x16f   : > { %v8014_v31 = vmul.f32 %v2010_v16, %v11026_v4  ;;  %v1649_v22 = vpop.f32.mrf.mxu0  ;;  %6212 = vmatpush3.bf16.msra.mxu1 %v6761_v41  ;;  %v1411_v16 = vadd.f32 %v1410_v20, %v7743_v35  ;;  %v6765_v35 = vld [vmem:[%s10662_s5 + $0x40] sm:$0xff]  }
 0x170   : > { %v1846_v5 = vrot.slane %v1812_v27, 7  ;;  %v1948_v24 = vrot.slane %v1812_v27, 1  ;;  %v2073_v49 = vpack.c.bf16 %v1812_v27, %v1811_v11  ;;  %v1772_v37 = vadd.f32 %v1649_v22, %v1408_v58  ;;  %v5934_v63 = vpop.f32.mrf.mxu1  ;;  %6213 = vmatprep.subr.bf16.mxu1 %v10927_v15 }
 0x171   : > { %v5999_v56 = vpop.f32.mrf.mxu0  ;;  %v8030_v27 = vmul.f32 %v1908_v26, %v7460_v29 }
 0x172   : > { %v1907_v41 = vsel %vm529_vm4, %v1845_v34, %v1846_v5  ;;  %v2009_v4 = vsel %vm802_vm3, %v1947_v23, %v1948_v24  ;;  %v1813_v52 = vadd.f32 %v7971_v44, %v1772_v37  ;;  %v1423_v17 = vpop.f32.mrf.mxu1  ;;  %6070 = vmatmul.mubr.msk.bf16.gmra.mxu1 %vm2122_vm5, %v2073_v49  ;;  %v1416_v37 = vadd.f32 %v1415_v9, %v7753_v62 }
 0x173   : > { %v8033_v11 = vmul.f32 %v1907_v41, %v7458_v10  ;;  %v1652_v58 = vpop.f32.mrf.mxu0  ;;  %6073 = vmatprep.mubr.msk.bf16.mxu1 %vm6802_vm1, %v10927_v15  ;;  %6214 = vmatpush3.bf16.msra.mxu1 %v6763_v61 }
 0x174   : > { %v1847_v20 = vrot.slane %v1813_v52, 7  ;;  %v1949_v34 = vrot.slane %v1813_v52, 1  ;;  %v1773_v23 = vadd.f32 %v1652_v58, %v1411_v16  ;;  %v5937_v22 = vpop.f32.mrf.mxu1  ;;  %6215 = vmatprep.subr.bf16.mxu1 %v10927_v15  ;;  %v8050_v16 = vmul.f32 %v2009_v4, %v7481_v18 }
 0x175   : > { %v6000_v26 = vpop.f32.mrf.mxu0 }
 0x176   : > { %v1906_v63 = vsel %vm529_vm4, %v1846_v5, %v1847_v20  ;;  %v2008_v61 = vsel %vm802_vm3, %v1948_v24, %v1949_v34  ;;  %v1814_v56 = vadd.f32 %v7971_v44, %v1773_v23  ;;  %v1426_v41 = vpop.f32.mrf.mxu1  ;;  %v1419_v23 = vadd.f32 %v1418_v39, %v7772_v42 }
 0x177   : > { %v8053_v58 = vmul.f32 %v2008_v61, %v7479_v32  ;;  %v1657_v22 = vpop.f32.mrf.mxu0  ;;  %6216 = vmatpush3.bf16.msra.mxu1 %v6765_v35 }
 0x178   : > { %v1848_v26 = vrot.slane %v1814_v56, 7  ;;  %v1950_v49 = vrot.slane %v1814_v56, 1  ;;  %v2074_v62 = vpack.c.bf16 %v1814_v56, %v1813_v52  ;;  %v1774_v9 = vadd.f32 %v1657_v22, %v1416_v37  ;;  %v5938_v59 = vpop.f32.mrf.mxu1  ;;  %6361 = vmatprep.subr.bf16.mxu1 %v10927_v15 }
 0x179   : > { %v6003_v5 = vpop.f32.mrf.mxu0  ;;  %v8066_v52 = vmul.f32 %v1906_v63, %v7491_v28 }
 0x17a   : > { %v1905_v4 = vsel %vm529_vm4, %v1847_v20, %v1848_v26  ;;  %v2007_v61 = vsel %vm802_vm3, %v1949_v34, %v1950_v49  ;;  %v1815_v35 = vadd.f32 %v7971_v44, %v1774_v9  ;;  %v1431_v32 = vpop.f32.mrf.mxu1  ;;  %6074 = vmatmul.mubr.msk.bf16.gmra.mxu1 %vm2122_vm5, %v2074_v62  ;;  %v1424_v62 = vadd.f32 %v1423_v17, %v7791_v53 }
 0x17b   : > { %v8069_v59 = vmul.f32 %v1905_v4, %v7489_v57  ;;  %v1660_v37 = vpop.f32.mrf.mxu0  ;;  %6077 = vmatprep.mubr.msk.bf16.mxu1 %vm6802_vm1, %v10927_v15  ;;  %v8082_v24 = vmul.f32 %v2007_v61, %v7505_v2 }
 0x17c   : > { %v1849_v42 = vrot.slane %v1815_v35, 7  ;;  %v1951_v39 = vrot.slane %v1815_v35, 1  ;;  %v1775_v20 = vadd.f32 %v1660_v37, %v1419_v23  ;;  %v5941_v56 = vpop.f32.mrf.mxu1 }
 0x17d   : > { %v6004_v34 = vpop.f32.mrf.mxu0 }
 0x17e   : > { %v1904_v63 = vsel %vm529_vm4, %v1848_v26, %v1849_v42  ;;  %v2006_v9 = vsel %vm802_vm3, %v1950_v49, %v1951_v39  ;;  %v1816_v5 = vadd.f32 %v7971_v44, %v1775_v20  ;;  %v1434_v4 = vpop.f32.mrf.mxu1  ;;  %v1427_v49 = vadd.f32 %v1426_v41, %v7809_v21 }
 0x17f   : > { %v8085_v23 = vmul.f32 %v2006_v9, %v7503_v13  ;;  %v1665_v37 = vpop.f32.mrf.mxu0 }
 0x180   : > { %v1850_v56 = vrot.slane %v1816_v5, 7  ;;  %v1952_v34 = vrot.slane %v1816_v5, 1  ;;  %v2075_v22 = vpack.c.bf16 %v1816_v5, %v1815_v35  ;;  %v1776_v53 = vadd.f32 %v1665_v37, %v1424_v62  ;;  %v5942_v17 = vpop.f32.mrf.mxu1 }
 0x181   : > { %v6007_v57 = vpop.f32.mrf.mxu0  ;;  %v8097_v35 = vmul.f32 %v1904_v63, %v7514_v0 }
 0x182   : > { %v1903_v20 = vsel %vm529_vm4, %v1849_v42, %v1850_v56  ;;  %v2005_v61 = vsel %vm802_vm3, %v1951_v39, %v1952_v34  ;;  %v1817_v9 = vadd.f32 %v7971_v44, %v1776_v53  ;;  %v1439_v13 = vpop.f32.mrf.mxu1  ;;  %6078 = vmatmul.mubr.msk.bf16.gmra.mxu1 %vm2122_vm5, %v2075_v22  ;;  %v1432_v22 = vadd.f32 %v1431_v32, %v7825_v43 }
 0x183   : > { %v8100_v57 = vmul.f32 %v1903_v20, %v7512_v46  ;;  %v1668_v62 = vpop.f32.mrf.mxu0  ;;  %6081 = vmatprep.mubr.msk.bf16.mxu1 %vm6802_vm1, %v10927_v15  ;;  %v8113_v26 = vmul.f32 %v2005_v61, %v7527_v1 }
 0x184   : > { %v1851_v21 = vrot.slane %v1817_v9, 7  ;;  %v1953_v41 = vrot.slane %v1817_v9, 1  ;;  %v1777_v42 = vadd.f32 %v1668_v62, %v1427_v49  ;;  %v5945_v5 = vpop.f32.mrf.mxu1 }
 0x185   : > { %v6008_v39 = vpop.f32.mrf.mxu0 }
 0x186   : > { %v1902_v63 = vsel %vm529_vm4, %v1850_v56, %v1851_v21  ;;  %v2004_v53 = vsel %vm802_vm3, %v1952_v34, %v1953_v41  ;;  %v1818_v17 = vadd.f32 %v7971_v44, %v1777_v42  ;;  %v1442_v20 = vpop.f32.mrf.mxu1  ;;  %v1435_v34 = vadd.f32 %v1434_v4, %v7843_v8 }
 0x187   : > { %v8116_v49 = vmul.f32 %v2004_v53, %v7525_v48  ;;  %v1673_v62 = vpop.f32.mrf.mxu0 }
 0x188   : > { %v1852_v5 = vrot.slane %v1818_v17, 7  ;;  %v1954_v39 = vrot.slane %v1818_v17, 1  ;;  %v2076_v37 = vpack.c.bf16 %v1818_v17, %v1817_v9  ;;  %v1778_v32 = vadd.f32 %v1673_v62, %v1432_v22  ;;  %v5946_v43 = vpop.f32.mrf.mxu1 }
 0x189   : > { %v6011_v46 = vpop.f32.mrf.mxu0  ;;  %v8128_v9 = vmul.f32 %v1902_v63, %v7539_v33 }
 0x18a   : > { %v1901_v42 = vsel %vm529_vm4, %v1851_v21, %v1852_v5  ;;  %v2003_v61 = vsel %vm802_vm3, %v1953_v41, %v1954_v39  ;;  %v1819_v53 = vadd.f32 %v7971_v44, %v1778_v32  ;;  %v1447_v48 = vpop.f32.mrf.mxu1  ;;  %6082 = vmatmul.mubr.msk.bf16.gmra.mxu1 %vm2122_vm5, %v2076_v37  ;;  %v1440_v37 = vadd.f32 %v1439_v13, %v7858_v54 }
 0x18b   : > { %v8131_v46 = vmul.f32 %v1901_v42, %v7537_v38  ;;  %v1676_v22 = vpop.f32.mrf.mxu0  ;;  %6085 = vmatprep.mubr.msk.bf16.mxu1 %vm6802_vm1, %v10927_v15  ;;  %v8144_v56 = vmul.f32 %v2003_v61, %v7553_v51 }
 0x18c   : > { %v1853_v8 = vrot.slane %v1819_v53, 7  ;;  %v1955_v4 = vrot.slane %v1819_v53, 1  ;;  %v1779_v21 = vadd.f32 %v1676_v22, %v1435_v34  ;;  %v5949_v17 = vpop.f32.mrf.mxu1 }
 0x18d   : > { %v6012_v41 = vpop.f32.mrf.mxu0 }
 0x18e   : > { %v1900_v63 = vsel %vm529_vm4, %v1852_v5, %v1853_v8  ;;  %v2002_v32 = vsel %vm802_vm3, %v1954_v39, %v1955_v4  ;;  %v1820_v43 = vadd.f32 %v7971_v44, %v1779_v21  ;;  %v1450_v42 = vpop.f32.mrf.mxu1  ;;  %v1443_v39 = vadd.f32 %v1442_v20, %v7878_v30 }
 0x18f   : > { %v8147_v34 = vmul.f32 %v2002_v32, %v7551_v19  ;;  %v1681_v22 = vpop.f32.mrf.mxu0 }
 0x190   : > { %v1854_v17 = vrot.slane %v1820_v43, 7  ;;  %v1956_v41 = vrot.slane %v1820_v43, 1  ;;  %v2077_v62 = vpack.c.bf16 %v1820_v43, %v1819_v53  ;;  %v1780_v13 = vadd.f32 %v1681_v22, %v1440_v37  ;;  %v5950_v54 = vpop.f32.mrf.mxu1 }
 0x191   : > { %v6015_v38 = vpop.f32.mrf.mxu0  ;;  %v8159_v53 = vmul.f32 %v1900_v63, %v7562_v47 }
 0x192   : > { %v1899_v21 = vsel %vm529_vm4, %v1853_v8, %v1854_v17  ;;  %v2001_v61 = vsel %vm802_vm3, %v1955_v4, %v1956_v41  ;;  %v1821_v32 = vadd.f32 %v7971_v44, %v1780_v13  ;;  %v1455_v19 = vpop.f32.mrf.mxu1  ;;  %6086 = vmatmul.mubr.msk.bf16.gmra.mxu1 %vm2122_vm5, %v2077_v62  ;;  %v1448_v62 = vadd.f32 %v1447_v48, %v7888_v6 }
 0x193   : > { %v8162_v38 = vmul.f32 %v1899_v21, %v7560_v7  ;;  %v1684_v37 = vpop.f32.mrf.mxu0  ;;  %6089 = vmatprep.mubr.msk.bf16.mxu1 %vm6802_vm1, %v10927_v15  ;;  %v8175_v5 = vmul.f32 %v2001_v61, %v7575_v45 }
 0x194   : > { %v1855_v30 = vrot.slane %v1821_v32, 7  ;;  %v1957_v20 = vrot.slane %v1821_v32, 1  ;;  %v1781_v8 = vadd.f32 %v1684_v37, %v1443_v39  ;;  %v5953_v43 = vpop.f32.mrf.mxu1 }
 0x195   : > { %v6016_v4 = vpop.f32.mrf.mxu0 }
 0x196   : > { %v1898_v63 = vsel %vm529_vm4, %v1854_v17, %v1855_v30  ;;  %v2000_v13 = vsel %vm802_vm3, %v1956_v41, %v1957_v20  ;;  %v1822_v54 = vadd.f32 %v7971_v44, %v1781_v8  ;;  %v1458_v21 = vpop.f32.mrf.mxu1  ;;  %v1451_v41 = vadd.f32 %v1450_v42, %v7901_v60 }
 0x197   : > { %v8178_v39 = vmul.f32 %v2000_v13, %v7573_v25  ;;  %v1689_v37 = vpop.f32.mrf.mxu0 }
 0x198   : > { %v1856_v43 = vrot.slane %v1822_v54, 7  ;;  %v1958_v4 = vrot.slane %v1822_v54, 1  ;;  %v2078_v22 = vpack.c.bf16 %v1822_v54, %v1821_v32  ;;  %v1782_v48 = vadd.f32 %v1689_v37, %v1448_v62  ;;  %v5954_v6 = vpop.f32.mrf.mxu1 }
 0x199   : > { %v6019_v7 = vpop.f32.mrf.mxu0  ;;  %v8190_v32 = vmul.f32 %v1898_v63, %v7584_v12 }
 0x19a   : > { %v1897_v8 = vsel %vm529_vm4, %v1855_v30, %v1856_v43  ;;  %v1999_v61 = vsel %vm802_vm3, %v1957_v20, %v1958_v4  ;;  %v1823_v13 = vadd.f32 %v7971_v44, %v1782_v48  ;;  %v1463_v25 = vpop.f32.mrf.mxu1  ;;  %6090 = vmatmul.mubr.msk.bf16.gmra.mxu1 %vm2122_vm5, %v2078_v22  ;;  %v1456_v22 = vadd.f32 %v1455_v19, %v7915_v14 }
 0x19b   : > { %v8193_v7 = vmul.f32 %v1897_v8, %v7582_v36  ;;  %v1692_v62 = vpop.f32.mrf.mxu0  ;;  %6093 = vmatprep.mubr.msk.bf16.mxu1 %vm6802_vm1, %v10927_v15  ;;  %v8206_v17 = vmul.f32 %v1999_v61, %v7597_v55  ;;  %v11031_v55 = vld [vmem:[#allocation41_spill] sm:$0xff] }
 0x19c   : > { %v1857_v60 = vrot.slane %v1823_v13, 7  ;;  %v1959_v42 = vrot.slane %v1823_v13, 1  ;;  %v1783_v30 = vadd.f32 %v1692_v62, %v1451_v41  ;;  %v5957_v54 = vpop.f32.mrf.mxu1 }
 0x19d   : > { %v6020_v20 = vpop.f32.mrf.mxu0 }
 0x19e   : > { %v1896_v63 = vsel %vm529_vm4, %v1856_v43, %v1857_v60  ;;  %v1998_v48 = vsel %vm802_vm3, %v1958_v4, %v1959_v42  ;;  %v1824_v6 = vadd.f32 %v7971_v44, %v1783_v30  ;;  %v1466_v8 = vpop.f32.mrf.mxu1  ;;  %v11027_v4 = vld [vmem:[#allocation70_spill] sm:$0xff]  ;;  %v11030_v43 = vld [vmem:[#allocation71_spill] sm:$0xff] }
 0x19f   : > { %v8209_v41 = vmul.f32 %v1998_v48, %v7595_v50  ;;  %v1697_v62 = vpop.f32.mrf.mxu0  ;;  %v1459_v12 = vadd.f32 %v1458_v21, %v11027_v4 }
 0x1a0   : > { %v1858_v54 = vrot.slane %v1824_v6, 7  ;;  %v1960_v20 = vrot.slane %v1824_v6, 1  ;;  %v2079_v37 = vpack.c.bf16 %v1824_v6, %v1823_v13  ;;  %v1784_v19 = vadd.f32 %v1697_v62, %v1456_v22  ;;  %v5958_v14 = vpop.f32.mrf.mxu1  ;;  %v11028_v13 = vld [vmem:[#allocation39_spill] sm:$0xff] }
 0x1a1   : > { %v6023_v36 = vpop.f32.mrf.mxu0  ;;  %v8221_v22 = vmul.f32 %v1896_v63, %v11028_v13 }
 0x1a2   : > { %v1895_v30 = vsel %vm529_vm4, %v1857_v60, %v1858_v54  ;;  %v1997_v61 = vsel %vm802_vm3, %v1959_v42, %v1960_v20  ;;  %v1825_v48 = vadd.f32 %v7971_v44, %v1784_v19  ;;  %v1471_v50 = vpop.f32.mrf.mxu1  ;;  %6094 = vmatmul.mubr.msk.bf16.gmra.mxu1 %vm2122_vm5, %v2079_v37  ;;  %v11029_v36 = vld [vmem:[#allocation38_spill] sm:$0xff]  ;;  %v1464_v37 = vadd.f32 %v1463_v25, %v11030_v43 }
 0x1a3   : > { %v8224_v6 = vmul.f32 %v1895_v30, %v11029_v36  ;;  %v1700_v62 = vpop.f32.mrf.mxu0  ;;  %6097 = vmatprep.mubr.msk.bf16.mxu1 %vm6802_vm1, %v10927_v15  ;;  %v8237_v45 = vmul.f32 %v1997_v61, %v11031_v55  ;;  %v11037_v55 = vld [vmem:[#allocation45_spill] sm:$0xff] }
 0x1a4   : > { %v1859_v21 = vrot.slane %v1825_v48, 7  ;;  %v1961_v60 = vrot.slane %v1825_v48, 1  ;;  %v1785_v14 = vadd.f32 %v1700_v62, %v1459_v12  ;;  %v5961_v4 = vpop.f32.mrf.mxu1  ;;  %v11032_v12 = vld [vmem:[#allocation40_spill] sm:$0xff] }
 0x1a5   : > { %v6024_v42 = vpop.f32.mrf.mxu0 }
 0x1a6   : > { %v1894_v63 = vsel %vm529_vm4, %v1858_v54, %v1859_v21  ;;  %v1996_v30 = vsel %vm802_vm3, %v1960_v20, %v1961_v60  ;;  %v1826_v36 = vadd.f32 %v7971_v44, %v1785_v14  ;;  %v1474_v13 = vpop.f32.mrf.mxu1  ;;  %v11033_v20 = vld [vmem:[#allocation72_spill] sm:$0xff]  ;;  %v11036_v54 = vld [vmem:[#allocation73_spill] sm:$0xff] }
 0x1a7   : > { %v8240_v62 = vmul.f32 %v1996_v30, %v11032_v12  ;;  %v1705_v4 = vpop.f32.mrf.mxu0  ;;  %v1467_v33 = vadd.f32 %v1466_v8, %v11033_v20 }
 0x1a8   : > { %v1860_v42 = vrot.slane %v1826_v36, 7  ;;  %v1962_v19 = vrot.slane %v1826_v36, 1  ;;  %v2080_v47 = vpack.c.bf16 %v1826_v36, %v1825_v48  ;;  %v1786_v25 = vadd.f32 %v1705_v4, %v1464_v37  ;;  %v5962_v43 = vpop.f32.mrf.mxu1  ;;  %v11034_v48 = vld [vmem:[#allocation43_spill] sm:$0xff] }
 0x1a9   : > { %v6027_v51 = vpop.f32.mrf.mxu0  ;;  %v8252_v36 = vmul.f32 %v1894_v63, %v11034_v48 }
 0x1aa   : > { %v1893_v14 = vsel %vm529_vm4, %v1859_v21, %v1860_v42  ;;  %v1995_v61 = vsel %vm802_vm3, %v1961_v60, %v1962_v19  ;;  %v1827_v30 = vadd.f32 %v7971_v44, %v1786_v25  ;;  %v1479_v12 = vpop.f32.mrf.mxu1  ;;  %6098 = vmatmul.mubr.msk.bf16.gmra.mxu1 %vm2122_vm5, %v2080_v47  ;;  %v11035_v51 = vld [vmem:[#allocation42_spill] sm:$0xff]  ;;  %v1472_v47 = vadd.f32 %v1471_v50, %v11036_v54 }
 0x1ab   : > { %v8255_v37 = vmul.f32 %v1893_v14, %v11035_v51  ;;  %v1708_v4 = vpop.f32.mrf.mxu0  ;;  %6101 = vmatprep.mubr.msk.bf16.mxu1 %vm6802_vm1, %v10927_v15  ;;  %v8268_v1 = vmul.f32 %v1995_v61, %v11037_v55  ;;  %v11044_v55 = vld [vmem:[#allocation49_spill] sm:$0xff] }
 0x1ac   : > { %v1861_v8 = vrot.slane %v1827_v30, 7  ;;  %v1963_v21 = vrot.slane %v1827_v30, 1  ;;  %v1787_v43 = vadd.f32 %v1708_v4, %v1467_v33  ;;  %v5965_v20 = vpop.f32.mrf.mxu1  ;;  %v11038_v33 = vld [vmem:[#allocation44_spill] sm:$0xff] }
 0x1ad   : > { %v6028_v60 = vpop.f32.mrf.mxu0 }
 0x1ae   : > { %v1892_v63 = vsel %vm529_vm4, %v1860_v42, %v1861_v8  ;;  %v1994_v14 = vsel %vm802_vm3, %v1962_v19, %v1963_v21  ;;  %v1828_v51 = vadd.f32 %v7971_v44, %v1787_v43  ;;  %v1482_v48 = vpop.f32.mrf.mxu1  ;;  %v11039_v19 = vld [vmem:[#allocation74_spill] sm:$0xff]  ;;  %v11043_v42 = vld [vmem:[#allocation75_spill] sm:$0xff] }
 0x1af   : > { %v8271_v4 = vmul.f32 %v1994_v14, %v11038_v33  ;;  %v1713_v20 = vpop.f32.mrf.mxu0  ;;  %v1475_v28 = vadd.f32 %v1474_v13, %v11039_v19 }
 0x1b0   : > { %v1862_v60 = vrot.slane %v1828_v51, 7  ;;  %v1964_v25 = vrot.slane %v1828_v51, 1  ;;  %v2081_v0 = vpack.c.bf16 %v1828_v51, %v1827_v30  ;;  %v1788_v50 = vadd.f32 %v1713_v20, %v1472_v47  ;;  %v5966_v54 = vpop.f32.mrf.mxu1  ;;  %v11040_v30 = vld [vmem:[#allocation47_spill] sm:$0xff] }
 0x1b1   : > { %v6031_v2 = vpop.f32.mrf.mxu0  ;;  %v8283_v51 = vmul.f32 %v1892_v63, %v11040_v30 }
 0x1b2   : > { %v1891_v43 = vsel %vm529_vm4, %v1861_v8, %v1862_v60  ;;  %v1993_v61 = vsel %vm802_vm3, %v1963_v21, %v1964_v25  ;;  %v1829_v14 = vadd.f32 %v7971_v44, %v1788_v50  ;;  %v1487_v33 = vpop.f32.mrf.mxu1  ;;  %6102 = vmatmul.mubr.msk.bf16.gmra.mxu1 %vm2122_vm5, %v2081_v0  ;;  %v11042_v2 = vld [vmem:[#allocation46_spill] sm:$0xff]  ;;  %v1480_v0 = vadd.f32 %v1479_v12, %v11043_v42 }
 0x1b3   : > { %11041 = vst [vmem:[#allocation70_spill] sm:$0xff] %v8283_v51  ;;  %v8286_v47 = vmul.f32 %v1891_v43, %v11042_v2  ;;  %v1716_v20 = vpop.f32.mrf.mxu0  ;;  %6105 = vmatprep.mubr.msk.bf16.mxu1 %vm6802_vm1, %v10927_v15  ;;  %v8299_v18 = vmul.f32 %v1993_v61, %v11044_v55  ;;  %v11054_v55 = vld [vmem:[#allocation53_spill] sm:$0xff] }
 0x1b4   : > { %v1863_v13 = vrot.slane %v1829_v14, 7  ;;  %v1965_v8 = vrot.slane %v1829_v14, 1  ;;  %v1789_v54 = vadd.f32 %v1716_v20, %v1475_v28  ;;  %v5969_v19 = vpop.f32.mrf.mxu1  ;;  %v11046_v28 = vld [vmem:[#allocation48_spill] sm:$0xff] }
 0x1b5   : > { %v6032_v21 = vpop.f32.mrf.mxu0  ;;  %11045 = vst [vmem:[#allocation71_spill] sm:$0xff] %v8299_v18 }
 0x1b6   : > { %v1890_v63 = vsel %vm529_vm4, %v1862_v60, %v1863_v13  ;;  %v1992_v43 = vsel %vm802_vm3, %v1964_v25, %v1965_v8  ;;  %v1830_v2 = vadd.f32 %v7971_v44, %v1789_v54  ;;  %v1490_v30 = vpop.f32.mrf.mxu1  ;;  %v11048_v25 = vld [vmem:[#allocation76_spill] sm:$0xff]  ;;  %v11053_v60 = vld [vmem:[#allocation77_spill] sm:$0xff] }
 0x1b7   : > { %v8302_v20 = vmul.f32 %v1992_v43, %v11046_v28  ;;  %v1721_v19 = vpop.f32.mrf.mxu0  ;;  %v1483_v51 = vadd.f32 %v1482_v48, %v11048_v25 }
 0x1b8   : > { %v1864_v21 = vrot.slane %v1830_v2, 7  ;;  %v1966_v50 = vrot.slane %v1830_v2, 1  ;;  %v2082_v10 = vpack.c.bf16 %v1830_v2, %v1829_v14  ;;  %v1790_v12 = vadd.f32 %v1721_v19, %v1480_v0  ;;  %v5970_v42 = vpop.f32.mrf.mxu1  ;;  %v11049_v14 = vld [vmem:[#allocation51_spill] sm:$0xff] }
 0x1b9   : > { %11047 = vst [vmem:[#allocation72_spill] sm:$0xff] %v8302_v20  ;;  %v6035_v29 = vpop.f32.mrf.mxu0  ;;  %v8314_v2 = vmul.f32 %v1890_v63, %v11049_v14 }
 0x1ba   : > { %v1889_v54 = vsel %vm529_vm4, %v1863_v13, %v1864_v21  ;;  %v1991_v61 = vsel %vm802_vm3, %v1965_v8, %v1966_v50  ;;  %v1831_v43 = vadd.f32 %v7971_v44, %v1790_v12  ;;  %v1495_v28 = vpop.f32.mrf.mxu1  ;;  %6106 = vmatmul.mubr.msk.bf16.gmra.mxu1 %vm2122_vm5, %v2082_v10  ;;  %v11051_v29 = vld [vmem:[#allocation50_spill] sm:$0xff]  ;;  %v1488_v10 = vadd.f32 %v1487_v33, %v11053_v60 }
 0x1bb   : > { %11050 = vst [vmem:[#allocation73_spill] sm:$0xff] %v8314_v2  ;;  %v8317_v0 = vmul.f32 %v1889_v54, %v11051_v29  ;;  %v1724_v19 = vpop.f32.mrf.mxu0  ;;  %6109 = vmatprep.mubr.msk.bf16.mxu1 %vm6802_vm1, %v10927_v15  ;;  %v8330_v18 = vmul.f32 %v1991_v61, %v11054_v55  ;;  %v11064_v55 = vld [vmem:[#allocation57_spill] sm:$0xff] }
 0x1bc   : > { %v1865_v48 = vrot.slane %v1831_v43, 7  ;;  %v1967_v13 = vrot.slane %v1831_v43, 1  ;;  %v1791_v42 = vadd.f32 %v1724_v19, %v1483_v51  ;;  %v5973_v25 = vpop.f32.mrf.mxu1  ;;  %v11056_v51 = vld [vmem:[#allocation52_spill] sm:$0xff] }
 0x1bd   : > { %11052 = vst [vmem:[#allocation74_spill] sm:$0xff] %v8317_v0  ;;  %v6036_v8 = vpop.f32.mrf.mxu0  ;;  %11055 = vst [vmem:[#allocation75_spill] sm:$0xff] %v8330_v18 }
 0x1be   : > { %v1888_v63 = vsel %vm529_vm4, %v1864_v21, %v1865_v48  ;;  %v1990_v54 = vsel %vm802_vm3, %v1966_v50, %v1967_v13  ;;  %v1832_v29 = vadd.f32 %v7971_v44, %v1791_v42  ;;  %v1498_v14 = vpop.f32.mrf.mxu1  ;;  %v11058_v50 = vld [vmem:[#allocation78_spill] sm:$0xff]  ;;  %v11063_v21 = vld [vmem:[#allocation79_spill] sm:$0xff] }
 0x1bf   : > { %v8333_v19 = vmul.f32 %v1990_v54, %v11056_v51  ;;  %v1729_v25 = vpop.f32.mrf.mxu0  ;;  %v1491_v20 = vadd.f32 %v1490_v30, %v11058_v50 }
 0x1c0   : > { %v1866_v8 = vrot.slane %v1832_v29, 7  ;;  %v1968_v12 = vrot.slane %v1832_v29, 1  ;;  %v2083_v2 = vpack.c.bf16 %v1832_v29, %v1831_v43  ;;  %v1792_v33 = vadd.f32 %v1729_v25, %v1488_v10  ;;  %v5974_v60 = vpop.f32.mrf.mxu1  ;;  %v11059_v43 = vld [vmem:[#allocation55_spill] sm:$0xff] }
 0x1c1   : > { %11057 = vst [vmem:[#allocation76_spill] sm:$0xff] %v8333_v19  ;;  %v6039_v0 = vpop.f32.mrf.mxu0  ;;  %v8345_v29 = vmul.f32 %v1888_v63, %v11059_v43 }
 0x1c2   : > { %v1887_v42 = vsel %vm529_vm4, %v1865_v48, %v1866_v8  ;;  %v1989_v61 = vsel %vm802_vm3, %v1967_v13, %v1968_v12  ;;  %v1833_v54 = vadd.f32 %v7971_v44, %v1792_v33  ;;  %v1503_v51 = vpop.f32.mrf.mxu1  ;;  %6110 = vmatmul.mubr.msk.bf16.gmra.mxu1 %vm2122_vm5, %v2083_v2  ;;  %v11061_v0 = vld [vmem:[#allocation54_spill] sm:$0xff]  ;;  %v1496_v2 = vadd.f32 %v1495_v28, %v11063_v21 }
 0x1c3   : > { %11060 = vst [vmem:[#allocation77_spill] sm:$0xff] %v8345_v29  ;;  %v8348_v10 = vmul.f32 %v1887_v42, %v11061_v0  ;;  %v1732_v25 = vpop.f32.mrf.mxu0  ;;  %6113 = vmatprep.mubr.msk.bf16.mxu1 %vm6802_vm1, %v10927_v15  ;;  %v8361_v18 = vmul.f32 %v1989_v61, %v11064_v55  ;;  %v11074_v55 = vld [vmem:[#allocation58_spill] sm:$0xff] }
 0x1c4   : > { %v1867_v30 = vrot.slane %v1833_v54, 7  ;;  %v1969_v48 = vrot.slane %v1833_v54, 1  ;;  %v1793_v60 = vadd.f32 %v1732_v25, %v1491_v20  ;;  %v5977_v50 = vpop.f32.mrf.mxu1  ;;  %v11066_v20 = vld [vmem:[#allocation56_spill] sm:$0xff] }
 0x1c5   : > { %11062 = vst [vmem:[#allocation78_spill] sm:$0xff] %v8348_v10  ;;  %v6040_v13 = vpop.f32.mrf.mxu0  ;;  %11065 = vst [vmem:[#allocation79_spill] sm:$0xff] %v8361_v18 }
 0x1c6   : > { %v1886_v63 = vsel %vm529_vm4, %v1866_v8, %v1867_v30  ;;  %v1988_v42 = vsel %vm802_vm3, %v1968_v12, %v1969_v48  ;;  %v1834_v0 = vadd.f32 %v7971_v44, %v1793_v60  ;;  %v1506_v43 = vpop.f32.mrf.mxu1  ;;  %v11068_v12 = vld [vmem:[#allocation80_spill] sm:$0xff]  ;;  %v11073_v8 = vld [vmem:[#allocation81_spill] sm:$0xff] }
 0x1c7   : > { %v8364_v25 = vmul.f32 %v1988_v42, %v11066_v20  ;;  %v1737_v50 = vpop.f32.mrf.mxu0  ;;  %v1499_v19 = vadd.f32 %v1498_v14, %v11068_v12 }
 0x1c8   : > { %v1868_v13 = vrot.slane %v1834_v0, 7  ;;  %v1970_v33 = vrot.slane %v1834_v0, 1  ;;  %v2084_v29 = vpack.c.bf16 %v1834_v0, %v1833_v54  ;;  %v1794_v28 = vadd.f32 %v1737_v50, %v1496_v2  ;;  %v5978_v21 = vpop.f32.mrf.mxu1  ;;  %v11069_v54 = vld [vmem:[#allocation2_spill] sm:$0xff] }
 0x1c9   : > { %11067 = vst [vmem:[#allocation89_spill] sm:$0xff] %v8364_v25  ;;  %v6043_v10 = vpop.f32.mrf.mxu0  ;;  %v8376_v0 = vmul.f32 %v1886_v63, %v11069_v54 }
 0x1ca   : > { %v1885_v60 = vsel %vm529_vm4, %v1867_v30, %v1868_v13  ;;  %v1987_v61 = vsel %vm802_vm3, %v1969_v48, %v1970_v33  ;;  %v1835_v42 = vadd.f32 %v7971_v44, %v1794_v28  ;;  %v1511_v20 = vpop.f32.mrf.mxu1  ;;  %6114 = vmatmul.mubr.msk.bf16.gmra.mxu1 %vm2122_vm5, %v2084_v29  ;;  %v11071_v10 = vld [vmem:[#allocation4_spill] sm:$0xff]  ;;  %v1504_v29 = vadd.f32 %v1503_v51, %v11073_v8 }
 0x1cb   : > { %11070 = vst [vmem:[#allocation80_spill] sm:$0xff] %v8376_v0  ;;  %v8379_v2 = vmul.f32 %v1885_v60, %v11071_v10  ;;  %v1740_v50 = vpop.f32.mrf.mxu0  ;;  %6117 = vmatprep.mubr.msk.bf16.mxu1 %vm6802_vm1, %v10927_v15  ;;  %v8392_v18 = vmul.f32 %v1987_v61, %v11074_v55  ;;  %v11084_v55 = vld [vmem:[#allocation60_spill] sm:$0xff] }
 0x1cc   : > { %v1869_v14 = vrot.slane %v1835_v42, 7  ;;  %v1971_v30 = vrot.slane %v1835_v42, 1  ;;  %v1795_v21 = vadd.f32 %v1740_v50, %v1499_v19  ;;  %v5981_v12 = vpop.f32.mrf.mxu1  ;;  %v11076_v19 = vld [vmem:[#allocation5_spill] sm:$0xff] }
 0x1cd   : > { %11072 = vst [vmem:[#allocation90_spill] sm:$0xff] %v8379_v2  ;;  %v6044_v48 = vpop.f32.mrf.mxu0  ;;  %11075 = vst [vmem:[#allocation81_spill] sm:$0xff] %v8392_v18 }
 0x1ce   : > { %v1884_v63 = vsel %vm529_vm4, %v1868_v13, %v1869_v14  ;;  %v1986_v60 = vsel %vm802_vm3, %v1970_v33, %v1971_v30  ;;  %v1836_v10 = vadd.f32 %v7971_v44, %v1795_v21  ;;  %v1514_v54 = vpop.f32.mrf.mxu1  ;;  %v11078_v33 = vld [vmem:[#allocation82_spill] sm:$0xff]  ;;  %v11083_v13 = vld [vmem:[#allocation83_spill] sm:$0xff] }
 0x1cf   : > { %v8395_v50 = vmul.f32 %v1986_v60, %v11076_v19  ;;  %v1745_v12 = vpop.f32.mrf.mxu0  ;;  %v1507_v25 = vadd.f32 %v1506_v43, %v11078_v33 }
 0x1d0   : > { %v1870_v48 = vrot.slane %v1836_v10, 7  ;;  %v1972_v28 = vrot.slane %v1836_v10, 1  ;;  %v2085_v0 = vpack.c.bf16 %v1836_v10, %v1835_v42  ;;  %v1796_v51 = vadd.f32 %v1745_v12, %v1504_v29  ;;  %v5982_v8 = vpop.f32.mrf.mxu1  ;;  %v11079_v42 = vld [vmem:[#allocation7_spill] sm:$0xff] }
 0x1d1   : > { %11077 = vst [vmem:[#allocation91_spill] sm:$0xff] %v8395_v50  ;;  %v6047_v2 = vpop.f32.mrf.mxu0  ;;  %v8407_v10 = vmul.f32 %v1884_v63, %v11079_v42 }
 0x1d2   : > { %v1883_v21 = vsel %vm529_vm4, %v1869_v14, %v1870_v48  ;;  %v1985_v61 = vsel %vm802_vm3, %v1971_v30, %v1972_v28  ;;  %v1837_v60 = vadd.f32 %v7971_v44, %v1796_v51  ;;  %v1519_v19 = vpop.f32.mrf.mxu1  ;;  %6118 = vmatmul.mubr.msk.bf16.gmra.mxu1 %vm2122_vm5, %v2085_v0  ;;  %v11081_v2 = vld [vmem:[#allocation6_spill] sm:$0xff]  ;;  %v1512_v0 = vadd.f32 %v1511_v20, %v11083_v13 }
 0x1d3   : > { %11080 = vst [vmem:[#allocation82_spill] sm:$0xff] %v8407_v10  ;;  %v8410_v29 = vmul.f32 %v1883_v21, %v11081_v2  ;;  %v1748_v12 = vpop.f32.mrf.mxu0  ;;  %6121 = vmatprep.mubr.msk.bf16.mxu1 %vm6802_vm1, %v10927_v15  ;;  %v8423_v18 = vmul.f32 %v1985_v61, %v11084_v55 }
 0x1d4   : > { %v1871_v43 = vrot.slane %v1837_v60, 7  ;;  %v1973_v14 = vrot.slane %v1837_v60, 1  ;;  %v1797_v8 = vadd.f32 %v1748_v12, %v1507_v25  ;;  %v5985_v33 = vpop.f32.mrf.mxu1  ;;  %v11085_v25 = vld [vmem:[#allocation59_spill] sm:$0xff] }
 0x1d5   : > { %11082 = vst [vmem:[#allocation92_spill] sm:$0xff] %v8410_v29  ;;  %v6048_v30 = vpop.f32.mrf.mxu0 }
 0x1d6   : > { %v1882_v63 = vsel %vm529_vm4, %v1870_v48, %v1871_v43  ;;  %v1984_v21 = vsel %vm802_vm3, %v1972_v28, %v1973_v14  ;;  %v1838_v2 = vadd.f32 %v7971_v44, %v1797_v8  ;;  %v1522_v42 = vpop.f32.mrf.mxu1  ;;  %v11086_v28 = vld [vmem:[#allocation84_spill] sm:$0xff]  ;;  %v11092_v48 = vld [vmem:[#allocation62_spill] sm:$0xff] }
 0x1d7   : > { %v8426_v12 = vmul.f32 %v1984_v21, %v11085_v25  ;;  %v1753_v33 = vpop.f32.mrf.mxu0  ;;  %v1515_v50 = vadd.f32 %v1514_v54, %v11086_v28  ;;  %v11087_v25 = vld [vmem:[#allocation9_spill] sm:$0xff] }
 0x1d8   : > { %v1872_v30 = vrot.slane %v1838_v2, 7  ;;  %v1974_v51 = vrot.slane %v1838_v2, 1  ;;  %v2086_v10 = vpack.c.bf16 %v1838_v2, %v1837_v60  ;;  %v1798_v20 = vadd.f32 %v1753_v33, %v1512_v0  ;;  %v5986_v13 = vpop.f32.mrf.mxu1  ;;  %v11089_v2 = vld [vmem:[#allocation8_spill] sm:$0xff] }
 0x1d9   : > { %v6051_v29 = vpop.f32.mrf.mxu0  ;;  %v8438_v60 = vmul.f32 %v1882_v63, %v11087_v25  ;;  %v11093_v25 = vld [vmem:[#allocation61_spill] sm:$0xff] }
 0x1da   : > { %v1881_v8 = vsel %vm529_vm4, %v1871_v43, %v1872_v30  ;;  %v1983_v61 = vsel %vm802_vm3, %v1973_v14, %v1974_v51  ;;  %v1839_v21 = vadd.f32 %v7971_v44, %v1798_v20  ;;  %6122 = vmatmul.mubr.msk.bf16.gmra.mxu1 %vm2122_vm5, %v2086_v10  ;;  %v11091_v20 = vld [vmem:[#allocation85_spill] sm:$0xff] }
 0x1db   : > { %11088 = vst [vmem:[#allocation83_spill] sm:$0xff] %v8438_v60  ;;  %v8441_v29 = vmul.f32 %v1881_v8, %v11089_v2  ;;  %v1756_v0 = vpop.f32.mrf.mxu0  ;;  %6125 = vmatprep.mubr.msk.bf16.mxu1 %vm6802_vm1, %v10927_v15  ;;  %v1520_v28 = vadd.f32 %v1519_v19, %v11091_v20  ;;  %v8454_v2 = vmul.f32 %v1983_v61, %v11092_v48  ;;  %v11094_v20 = vld [vmem:[#allocation86_spill] sm:$0xff]  ;;  %v11102_v48 = vld [vmem:[#allocation88_spill] sm:$0xff] }
 0x1dc   : > { %v1873_v54 = vrot.slane %v1839_v21, 7  ;;  %v1975_v33 = vrot.slane %v1839_v21, 1  ;;  %v1799_v43 = vadd.f32 %v1756_v0, %v1515_v50 }
 0x1dd   : > { %11090 = vst [vmem:[#allocation84_spill] sm:$0xff] %v8441_v29  ;;  %v6052_v13 = vpop.f32.mrf.mxu0  ;;  %v1523_v29 = vadd.f32 %v1522_v42, %v11094_v20  ;;  %v11099_v20 = vld [vmem:[#allocation66_spill] sm:$0xff] }
 0x1de   : > { %v1880_v10 = vsel %vm529_vm4, %v1872_v30, %v1873_v54  ;;  %v1982_v63 = vsel %vm802_vm3, %v1974_v51, %v1975_v33  ;;  %v1840_v8 = vadd.f32 %v7971_v44, %v1799_v43  ;;  %v11100_v30 = vld [vmem:[#allocation65_spill] sm:$0xff] }
 0x1df   : > { %v8457_v55 = vmul.f32 %v1982_v63, %v11093_v25  ;;  %v1761_v50 = vpop.f32.mrf.mxu0  ;;  %v11095_v63 = vld [vmem:[#allocation64_spill] sm:$0xff] }
 0x1e0   : > { %v1874_v0 = vrot.slane %v1840_v8, 7  ;;  %v1976_v13 = vrot.slane %v1840_v8, 1  ;;  %v2087_v14 = vpack.c.bf16 %v1840_v8, %v1839_v21  ;;  %v1800_v60 = vadd.f32 %v1761_v50, %v1520_v28  ;;  %v11097_v21 = vld [vmem:[#allocation63_spill] sm:$0xff] }
 0x1e1   : > { %v6055_v19 = vpop.f32.mrf.mxu0  ;;  %v8469_v25 = vmul.f32 %v1880_v10, %v11095_v63 }
 0x1e2   : > { %v1879_v51 = vsel %vm529_vm4, %v1873_v54, %v1874_v0  ;;  %v1981_v61 = vsel %vm802_vm3, %v1975_v33, %v1976_v13  ;;  %v1841_v43 = vadd.f32 %v7971_v44, %v1800_v60  ;;  %6126 = vmatmul.mubr.msk.bf16.gmra.mxu1 %vm2122_vm5, %v2087_v14 }
 0x1e3   : > { %11096 = vst [vmem:[#allocation85_spill] sm:$0xff] %v8469_v25  ;;  %v8472_v28 = vmul.f32 %v1879_v51, %v11097_v21  ;;  %v1764_v8 = vpop.f32.mrf.mxu0  ;;  %6129 = vmatprep.mubr.msk.bf16.mxu1 %vm6802_vm1, %v10927_v15  ;;  %v8484_v51 = vmul.f32 %v1981_v61, %v11099_v20  ;;  %v11103_v25 = vld [vmem:[#allocation68_spill] sm:$0xff] }
 0x1e4   : > { %v1875_v42 = vrot.slane %v1841_v43, 7  ;;  %v1977_v50 = vrot.slane %v1841_v43, 1  ;;  %v1801_v54 = vadd.f32 %v1764_v8, %v1523_v29 }
 0x1e5   : > { %11098 = vst [vmem:[#allocation86_spill] sm:$0xff] %v8472_v28  ;;  %v6056_v19 = vpop.f32.mrf.mxu0 }
 0x1e6   : > { %v1878_v60 = vsel %vm529_vm4, %v1874_v0, %v1875_v42  ;;  %v1980_v14 = vsel %vm802_vm3, %v1976_v13, %v1977_v50  ;;  %v1842_v10 = vadd.f32 %v7971_v44, %v1801_v54  ;;  %v11101_v19 = vld [vmem:[#allocation13_spill] sm:$0xff]  ;;  %v11104_v13 = vld [vmem:[#allocation87_spill] sm:$0xff] }
 0x1e7   : > { %v8487_v21 = vmul.f32 %v1980_v14, %v11100_v30  ;;  %v1912_v33 = vmul.f32 %v11102_v48, %v11101_v19  ;;  %v8492_v28 = vmul.f32 %v1878_v60, %v11103_v25  ;;  %v11105_v61 = vrot.slane %v11104_v13, 7  ;;  %v11107_v60 = vld [vmem:[#allocation11_spill] sm:$0xff]  ;;  %v11110_v30 = vld [vmem:[#allocation69_spill] sm:$0xff] }
 0x1e8   : > { %v1876_v63 = vrot.slane %v1842_v10, 7  ;;  %v1978_v29 = vrot.slane %v1842_v10, 1  ;;  %v2088_v8 = vpack.c.bf16 %v1842_v10, %v1841_v43  ;;  %v11106_v14 = vrot.slane %v11104_v13, 1  ;;  %v11108_v0 = vld [vmem:[#allocation67_spill] sm:$0xff]  ;;  %v6767_v13 = vld [vmem:[%s10664_s7 + $0x30] sm:$0xff]  }
 0x1ea   : > { %v1877_v44 = vsel %vm529_vm4, %v1875_v42, %v1876_v63  ;;  %v1910_v54 = vsel %vm529_vm4, %v1876_v63, %v11105_v61  ;;  %v1979_v43 = vsel %vm802_vm3, %v1977_v50, %v1978_v29  ;;  %v2012_v48 = vsel %vm802_vm3, %v1978_v29, %v11106_v14  ;;  %6130 = vmatmul.mubr.msk.bf16.gmra.mxu1 %vm2122_vm5, %v2088_v8  ;;  %v11109_v42 = vld [vmem:[#allocation3_spill] sm:$0xff]  ;;  %v6766_v50 = vld [vmem:[%s10664_s7 + $0x38] sm:$0xff]  }
 0x1eb   : > { %v1911_v10 = vmul.f32 %v1910_v54, %v11107_v60  ;;  %v8511_v25 = vmul.f32 %v1877_v44, %v11108_v0  ;;  %v8514_v19 = vmul.f32 %v1979_v43, %v11109_v42  ;;  %v8517_v63 = vmul.f32 %v2012_v48, %v11110_v30  ;;  %6217 = vmatprep.mubr.msk.bf16.mxu1 %vm6802_vm1, %v10927_v15  ;;  %v11136_v48 = vld [vmem:[#allocation76_spill] sm:$0xff] }
 0x1ec   : > { %v11112_v61 = vpack.c.bf16 %v8033_v11, %v8030_v27  ;;  %v11113_v54 = vpack.c.bf16 %v8053_v58, %v8050_v16  ;;  %v11115_v27 = vpack.c.bf16 %v8085_v23, %v8082_v24  ;;  %v11116_v11 = vpack.c.bf16 %v8100_v57, %v8097_v35  ;;  %v6769_v23 = vld [vmem:[%s10664_s7 + $0x20] sm:$0xff]  }
 0x1ed   : > { %v2047_v29 = vpack.c.bf16 %v1912_v33, %v1911_v10  ;;  %v2063_v8 = vpack.c.bf16 %v8511_v25, %v8492_v28  ;;  %v2603_v44 = vpack.c.bf16 %v8517_v63, %v8514_v19  ;;  %v11111_v33 = vpack.c.bf16 %v8014_v31, %v8011_v3  ;;  %v6768_v3 = vld [vmem:[%s10664_s7 + $0x28] sm:$0xff]  }
 0x1ee   : > { %v11114_v31 = vpack.c.bf16 %v8069_v59, %v8066_v52  ;;  %v11117_v16 = vpack.c.bf16 %v8116_v49, %v8113_v26  ;;  %v11118_v58 = vpack.c.bf16 %v8131_v46, %v8128_v9  ;;  %v11119_v24 = vpack.c.bf16 %v8147_v34, %v8144_v56  ;;  %v11137_v10 = vld [vmem:[#allocation75_spill] sm:$0xff] }
 0x1ef   : > { %6142 = vmatmul.mubr.msk.bf16.vlgmr.msra.gmra.mxu0 %vm2122_vm5, %v2047_v29  ;;  %v11120_v52 = vpack.c.bf16 %v8162_v38, %v8159_v53  ;;  %v11121_v59 = vpack.c.bf16 %v8178_v39, %v8175_v5  ;;  %v11122_v26 = vpack.c.bf16 %v8193_v7, %v8190_v32  ;;  %v11123_v35 = vpack.c.bf16 %v8209_v41, %v8206_v17  ;;  %v11128_v17 = vld [vmem:[#allocation70_spill] sm:$0xff]  ;;  %v6774_v63 = vld [vmem:[%s10664_s7 + $0x8] sm:$0xff]  }
 0x1f0   : > { %6145 = vmatprep.mubr.msk.bf16.mxu0 %vm6802_vm1, %v10927_v15  ;;  %6286 = vmatpush3.bf16.msra.mxu0 %v6766_v50  ;;  %v11124_v57 = vpack.c.bf16 %v8224_v6, %v8221_v22  ;;  %v11125_v56 = vpack.c.bf16 %v8240_v62, %v8237_v45  ;;  %v11126_v34 = vpack.c.bf16 %v8255_v37, %v8252_v36  ;;  %v11131_v22 = vld [vmem:[#allocation71_spill] sm:$0xff]  ;;  %v11133_v37 = vld [vmem:[#allocation74_spill] sm:$0xff] }
 0x1f1   : > { %6287 = vmatprep.subr.bf16.mxu0 %v10927_v15  ;;  %v11127_v45 = vpack.c.bf16 %v8271_v4, %v8268_v1  ;;  %v11129_v32 = vpack.c.bf16 %v8286_v47, %v11128_v17  ;;  %v11130_v1 = vld [vmem:[#allocation72_spill] sm:$0xff]  ;;  %v11134_v4 = vld [vmem:[#allocation73_spill] sm:$0xff]  ;;  %v11138_v50 = vpack.c.bf16 %v11136_v48, %v11137_v10  ;;  %v11152_v17 = vld [vmem:[#allocation82_spill] sm:$0xff] }
 0x1f2   : > { %6218 = vmatmul.mubr.msk.bf16.vlgmr.msra.gmra.mxu1 %vm2122_vm5, %v11111_v33  ;;  %v11132_v6 = vpack.c.bf16 %v11130_v1, %v11131_v22  ;;  %v11135_v47 = vpack.c.bf16 %v11133_v37, %v11134_v4  ;;  %v6770_v33 = vld [vmem:[%s10664_s7 + $0x18] sm:$0xff]   ;;  %v11154_v22 = vpack.c.bf16 %v8426_v12, %v8423_v18  ;;  %v11155_v37 = vld [vmem:[#allocation84_spill] sm:$0xff]  ;;  %v11156_v4 = vld [vmem:[#allocation83_spill] sm:$0xff]  ;;  %v11158_v18 = vpack.c.bf16 %v8457_v55, %v8454_v2 }
 0x1f3   : > { %6221 = vmatprep.mubr.msk.bf16.mxu1 %vm6802_vm1, %v10927_v15  ;;  %6362 = vmatpush3.bf16.msra.mxu1 %v6770_v33  ;;  %v6772_v55 = vld [vmem:[%s10664_s7 + $0x10] sm:$0xff]  }
 0x1f4   : > { %6288 = vmatpush3.bf16.msra.mxu0 %v6767_v13  ;;  %6363 = vmatprep.subr.bf16.mxu1 %v10927_v15 }
 0x1f5   : > { %6289 = vmatprep.subr.bf16.mxu0 %v10927_v15 }
 0x1f7   : > { %6146 = vmatmul.mubr.msk.bf16.gmra.mxu0 %vm2122_vm5, %v11112_v61  ;;  %v11139_v61 = vld [vmem:[#allocation78_spill] sm:$0xff]  ;;  %6364 = vmatpush3.bf16.msra.mxu1 %v6772_v55 }
 0x1f8   : > { %6149 = vmatprep.mubr.msk.bf16.mxu0 %vm6802_vm1, %v10927_v15  ;;  %6290 = vmatpush3.bf16.msra.mxu0 %v6768_v3 }
 0x1f9   : > { %6291 = vmatprep.subr.bf16.mxu0 %v10927_v15  ;;  %6365 = vmatprep.subr.bf16.mxu1 %v10927_v15 }
 0x1fa   : > { %6222 = vmatmul.mubr.msk.bf16.gmra.mxu1 %vm2122_vm5, %v11113_v54  ;;  %v11140_v54 = vld [vmem:[#allocation77_spill] sm:$0xff] }
 0x1fb   : > { %6225 = vmatprep.mubr.msk.bf16.mxu1 %vm6802_vm1, %v10927_v15  ;;  %v11141_v3 = vpack.c.bf16 %v11139_v61, %v11140_v54  ;;  %v11162_v54 = vpack.c.bf16 %v8487_v21, %v8484_v51  ;;  %6366 = vmatpush3.bf16.msra.mxu1 %v6774_v63 }
 0x1fc   : > { %6292 = vmatpush3.bf16.msra.mxu0 %v6769_v23  ;;  %v11146_v23 = vld [vmem:[#allocation80_spill] sm:$0xff]  ;;  %6367 = vmatprep.subr.bf16.mxu1 %v10927_v15 }
 0x1fd   : > { %6437 = vmatprep.subr.bf16.mxu0 %v10927_v15 }
 0x1ff   : > { %6150 = vmatmul.mubr.msk.bf16.gmra.mxu0 %vm2122_vm5, %v11114_v31 }
 0x200   : > { %6153 = vmatprep.mubr.msk.bf16.mxu0 %vm6802_vm1, %v10927_v15 }
 0x202   : > { %6226 = vmatmul.mubr.msk.bf16.gmra.mxu1 %vm2122_vm5, %v11115_v27 }
 0x203   : > { %6229 = vmatprep.mubr.msk.bf16.mxu1 %vm6802_vm1, %v10927_v15 }
 0x207   : > { %6154 = vmatmul.mubr.msk.bf16.gmra.mxu0 %vm2122_vm5, %v11116_v11  ;;  %v11142_v11 = vld [vmem:[#allocation89_spill] sm:$0xff] }
 0x208   : > { %6157 = vmatprep.mubr.msk.bf16.mxu0 %vm6802_vm1, %v10927_v15 }
 0x20a   : > { %6230 = vmatmul.mubr.msk.bf16.gmra.mxu1 %vm2122_vm5, %v11117_v16  ;;  %v11143_v16 = vld [vmem:[#allocation79_spill] sm:$0xff] }
 0x20b   : > { %6233 = vmatprep.mubr.msk.bf16.mxu1 %vm6802_vm1, %v10927_v15 }
 0x20f   : > { %6158 = vmatmul.mubr.msk.bf16.gmra.mxu0 %vm2122_vm5, %v11118_v58  ;;  %v11144_v58 = vpack.c.bf16 %v11142_v11, %v11143_v16 }
 0x210   : > { %6161 = vmatprep.mubr.msk.bf16.mxu0 %vm6802_vm1, %v10927_v15 }
 0x212   : > { %6234 = vmatmul.mubr.msk.bf16.gmra.mxu1 %vm2122_vm5, %v11119_v24 }
 0x213   : > { %6237 = vmatprep.mubr.msk.bf16.mxu1 %vm6802_vm1, %v10927_v15 }
 0x217   : > { %6162 = vmatmul.mubr.msk.bf16.gmra.mxu0 %vm2122_vm5, %v11120_v52 }
 0x218   : > { %6165 = vmatprep.mubr.msk.bf16.mxu0 %vm6802_vm1, %v10927_v15 }
 0x21a   : > { %6238 = vmatmul.mubr.msk.bf16.gmra.mxu1 %vm2122_vm5, %v11121_v59  ;;  %v11145_v59 = vld [vmem:[#allocation90_spill] sm:$0xff] }
 0x21b   : > { %6241 = vmatprep.mubr.msk.bf16.mxu1 %vm6802_vm1, %v10927_v15 }
 0x21f   : > { %6166 = vmatmul.mubr.msk.bf16.gmra.mxu0 %vm2122_vm5, %v11122_v26  ;;  %v11147_v26 = vpack.c.bf16 %v11145_v59, %v11146_v23 }
 0x220   : > { %6169 = vmatprep.mubr.msk.bf16.mxu0 %vm6802_vm1, %v10927_v15 }
 0x222   : > { %6242 = vmatmul.mubr.msk.bf16.gmra.mxu1 %vm2122_vm5, %v11123_v35 }
 0x223   : > { %6245 = vmatprep.mubr.msk.bf16.mxu1 %vm6802_vm1, %v10927_v15 }
 0x227   : > { %6170 = vmatmul.mubr.msk.bf16.gmra.mxu0 %vm2122_vm5, %v11124_v57 }
 0x228   : > { %6173 = vmatprep.mubr.msk.bf16.mxu0 %vm6802_vm1, %v10927_v15 }
 0x22a   : > { %v8628_v49 = vpop.f32.mrf.mxu1  ;;  %6246 = vmatmul.mubr.msk.bf16.gmra.mxu1 %vm2122_vm5, %v11125_v56  ;;  %v11148_v56 = vld [vmem:[#allocation91_spill] sm:$0xff] }
 0x22b   : > { %6249 = vmatprep.mubr.msk.bf16.mxu1 %vm6802_vm1, %v10927_v15 }
 0x22c   : > { %v6067_v9 = vpop.f32.mrf.mxu1 }
 0x22d   : > { %v11149_v9 = vld [vmem:[#allocation81_spill] sm:$0xff] }
 0x22e   : > { %v8636_v46 = vpop.f32.mrf.mxu1 }
 0x22f   : > { %6174 = vmatmul.mubr.msk.bf16.gmra.mxu0 %vm2122_vm5, %v11126_v34  ;;  %v11150_v34 = vpack.c.bf16 %v11148_v56, %v11149_v9 }
 0x230   : > { %v6068_v5 = vpop.f32.mrf.mxu1  ;;  %6177 = vmatprep.mubr.msk.bf16.mxu0 %vm6802_vm1, %v10927_v15 }
 0x232   : > { %v8644_v53 = vpop.f32.mrf.mxu1  ;;  %6250 = vmatmul.mubr.msk.bf16.gmra.mxu1 %vm2122_vm5, %v11127_v45 }
 0x233   : > { %6253 = vmatprep.mubr.msk.bf16.mxu1 %vm6802_vm1, %v10927_v15 }
 0x234   : > { %v6071_v38 = vpop.f32.mrf.mxu1 }
 0x235   : > { %v11151_v38 = vld [vmem:[#allocation92_spill] sm:$0xff] }
 0x236   : > { %v8652_v39 = vpop.f32.mrf.mxu1 }
 0x237   : > { %6178 = vmatmul.mubr.msk.bf16.gmra.mxu0 %vm2122_vm5, %v11129_v32  ;;  %v11153_v32 = vpack.c.bf16 %v11151_v38, %v11152_v17 }
 0x238   : > { %v6072_v7 = vpop.f32.mrf.mxu1  ;;  %6181 = vmatprep.mubr.msk.bf16.mxu0 %vm6802_vm1, %v10927_v15 }
 0x23a   : > { %v8660_v41 = vpop.f32.mrf.mxu1  ;;  %6254 = vmatmul.mubr.msk.bf16.gmra.mxu1 %vm2122_vm5, %v11132_v6 }
 0x23b   : > { %6257 = vmatprep.mubr.msk.bf16.mxu1 %vm6802_vm1, %v10927_v15 }
 0x23c   : > { %v6075_v62 = vpop.f32.mrf.mxu1 }
 0x23e   : > { %v8668_v36 = vpop.f32.mrf.mxu1 }
 0x23f   : > { %6182 = vmatmul.mubr.msk.bf16.gmra.mxu0 %vm2122_vm5, %v11135_v47  ;;  %v11157_v47 = vpack.c.bf16 %v11155_v37, %v11156_v4 }
 0x240   : > { %v6076_v43 = vpop.f32.mrf.mxu1  ;;  %6185 = vmatprep.mubr.msk.bf16.mxu0 %vm6802_vm1, %v10927_v15 }
 0x242   : > { %v8676_v14 = vpop.f32.mrf.mxu1  ;;  %6258 = vmatmul.mubr.msk.bf16.gmra.mxu1 %vm2122_vm5, %v11138_v50  ;;  %v11159_v50 = vld [vmem:[#allocation86_spill] sm:$0xff] }
 0x243   : > { %6261 = vmatprep.mubr.msk.bf16.mxu1 %vm6802_vm1, %v10927_v15 }
 0x244   : > { %v6079_v29 = vpop.f32.mrf.mxu1 }
 0x245   : > { %v11160_v29 = vld [vmem:[#allocation85_spill] sm:$0xff] }
 0x246   : > { %v8684_v13 = vpop.f32.mrf.mxu1  ;;  %v11161_v33 = vpack.c.bf16 %v11159_v50, %v11160_v29  ;;  %v6776_v50 = vld [vmem:[%s10664_s7] sm:$0xff]  }
 0x247   : > { %6186 = vmatmul.mubr.msk.bf16.gmra.mxu0 %vm2122_vm5, %v11141_v3  ;;  %6368 = vmatpush3.bf16.msra.mxu1 %v6776_v50 }
 0x248   : > { %v6080_v31 = vpop.f32.mrf.mxu1  ;;  %6189 = vmatprep.mubr.msk.bf16.mxu0 %vm6802_vm1, %v10927_v15  ;;  %6513 = vmatprep.subr.bf16.mxu1 %v10927_v15 }
 0x24a   : > { %v8696_v27 = vpop.f32.mrf.mxu1  ;;  %6262 = vmatmul.mubr.msk.bf16.gmra.mxu1 %vm2122_vm5, %v11144_v58 }
 0x24b   : > { %6265 = vmatprep.mubr.msk.bf16.mxu1 %vm6802_vm1, %v10927_v15 }
 0x24c   : > { %v6083_v24 = vpop.f32.mrf.mxu1 }
 0x24e   : > { %v8704_v52 = vpop.f32.mrf.mxu1 }
 0x24f   : > { %6190 = vmatmul.mubr.msk.bf16.gmra.mxu0 %vm2122_vm5, %v11147_v26 }
 0x250   : > { %v6084_v35 = vpop.f32.mrf.mxu1  ;;  %6193 = vmatprep.mubr.msk.bf16.mxu0 %vm6802_vm1, %v10927_v15 }
 0x252   : > { %v8712_v57 = vpop.f32.mrf.mxu1  ;;  %6266 = vmatmul.mubr.msk.bf16.gmra.mxu1 %vm2122_vm5, %v11150_v34 }
 0x253   : > { %6269 = vmatprep.mubr.msk.bf16.mxu1 %vm6802_vm1, %v10927_v15 }
 0x254   : > { %v6087_v5 = vpop.f32.mrf.mxu1 }
 0x256   : > { %v8720_v45 = vpop.f32.mrf.mxu1 }
 0x257   : > { %6194 = vmatmul.mubr.msk.bf16.gmra.mxu0 %vm2122_vm5, %v11153_v32 }
 0x258   : > { %v6088_v7 = vpop.f32.mrf.mxu1  ;;  %6197 = vmatprep.mubr.msk.bf16.mxu0 %vm6802_vm1, %v10927_v15 }
 0x25a   : > { %v8728_v1 = vpop.f32.mrf.mxu1  ;;  %6270 = vmatmul.mubr.msk.bf16.gmra.mxu1 %vm2122_vm5, %v11154_v22 }
 0x25b   : > { %6273 = vmatprep.mubr.msk.bf16.mxu1 %vm6802_vm1, %v10927_v15 }
 0x25c   : > { %v6091_v6 = vpop.f32.mrf.mxu1 }
 0x25e   : > { %v8736_v62 = vpop.f32.mrf.mxu1 }
 0x25f   : > { %6198 = vmatmul.mubr.msk.bf16.gmra.mxu0 %vm2122_vm5, %v11157_v47 }
 0x260   : > { %v6092_v43 = vpop.f32.mrf.mxu1  ;;  %6201 = vmatprep.mubr.msk.bf16.mxu0 %vm6802_vm1, %v10927_v15 }
 0x262   : > { %v8744_v48 = vpop.f32.mrf.mxu1  ;;  %6274 = vmatmul.mubr.msk.bf16.gmra.mxu1 %vm2122_vm5, %v11158_v18 }
 0x263   : > { %6277 = vmatprep.mubr.msk.bf16.mxu1 %vm6802_vm1, %v10927_v15 }
 0x264   : > { %v6095_v12 = vpop.f32.mrf.mxu1 }
 0x266   : > { %v8752_v10 = vpop.f32.mrf.mxu1 }
 0x267   : > { %6202 = vmatmul.mubr.msk.bf16.gmra.mxu0 %vm2122_vm5, %v11161_v33 }
 0x268   : > { %v6096_v61 = vpop.f32.mrf.mxu1  ;;  %6205 = vmatprep.mubr.msk.bf16.mxu0 %vm6802_vm1, %v10927_v15 }
 0x26a   : > { %v8763_v2 = vpop.f32.mrf.mxu1  ;;  %6278 = vmatmul.mubr.msk.bf16.gmra.mxu1 %vm2122_vm5, %v11162_v54 }
 0x26b   : > { %6281 = vmatprep.mubr.msk.bf16.mxu1 %vm6802_vm1, %v10927_v15 }
 0x26c   : > { %v6099_v3 = vpop.f32.mrf.mxu1 }
 0x26e   : > { %v8772_v31 = vpop.f32.mrf.mxu1 }
 0x26f   : > { %6206 = vmatmul.mubr.msk.bf16.gmra.mxu0 %vm2122_vm5, %v2063_v8 }
 0x270   : > { %v6100_v11 = vpop.f32.mrf.mxu1  ;;  %6293 = vmatprep.mubr.msk.bf16.mxu0 %vm6802_vm1, %v10927_v15 }
 0x271   : > { %v8830_v11 = vld [vmem:[%s10663_s6] ss:$0 sm:$0xff] }
 0x272   : > { %v8780_v21 = vpop.f32.mrf.mxu1  ;;  %6282 = vmatmul.mubr.msk.bf16.gmra.mxu1 %vm2122_vm5, %v2603_v44 }
 0x273   : > { %6369 = vmatprep.mubr.msk.bf16.mxu1 %vm6802_vm1, %v10927_v15 }
 0x274   : > { %v6103_v51 = vpop.f32.mrf.mxu1 }
 0x276   : > { %v8788_v16 = vpop.f32.mrf.mxu1 }
 0x278   : > { %v6104_v25 = vpop.f32.mrf.mxu1 }
 0x27a   : > { %v8790_v28 = vpop.f32.mrf.mxu1 }
 0x27c   : > { %v6107_v8 = vpop.f32.mrf.mxu1 }
 0x27e   : > { %v8792_v58 = vpop.f32.mrf.mxu1 }
 0x280   : > { %v6108_v24 = vpop.f32.mrf.mxu1 }
 0x282   : > { %v8794_v59 = vpop.f32.mrf.mxu1 }
 0x284   : > { %v6111_v23 = vpop.f32.mrf.mxu1 }
 0x286   : > { %v8796_v26 = vpop.f32.mrf.mxu1 }
 0x288   : > { %v6112_v19 = vpop.f32.mrf.mxu1 }
 0x28a   : > { %v8801_v44 = vpop.f32.mrf.mxu1 }
 0x28c   : > { %v6115_v35 = vpop.f32.mrf.mxu1 }
 0x28e   : > { %v8804_v56 = vpop.f32.mrf.mxu1 }
 0x290   : > { %v6116_v9 = vpop.f32.mrf.mxu1 }
 0x292   : > { %v8806_v34 = vpop.f32.mrf.mxu1 }
 0x294   : > { %v6119_v5 = vpop.f32.mrf.mxu1 }
 0x296   : > { %v8808_v38 = vpop.f32.mrf.mxu1 }
 0x298   : > { %v6120_v17 = vpop.f32.mrf.mxu1 }
 0x29a   : > { %v8810_v32 = vpop.f32.mrf.mxu1 }
 0x29c   : > { %v6123_v7 = vpop.f32.mrf.mxu1 }
 0x29e   : > { %v8812_v22 = vpop.f32.mrf.mxu1 }
 0x2a0   : > { %v6124_v6 = vpop.f32.mrf.mxu1 }
 0x2a2   : > { %v8814_v37 = vpop.f32.mrf.mxu1 }
 0x2a4   : > { %v6127_v4 = vpop.f32.mrf.mxu1 }
 0x2a6   : > { %v8816_v47 = vpop.f32.mrf.mxu1 }
 0x2a8   : > { %v6128_v43 = vpop.f32.mrf.mxu1 }
 0x2aa   : > { %v8818_v18 = vpop.f32.mrf.mxu1 }
 0x2ac   : > { %v6131_v12 = vpop.f32.mrf.mxu1 }
 0x2ae   : > { %v8823_v29 = vpop.f32.mrf.mxu1 }
 0x2af   : > { %v2452_v33 = vpop.f32.mrf.mxu0 }
 0x2b0   : > { %v2453_v61 = vadd.f32 %v2452_v33, %v8628_v49  ;;  %v6132_v55 = vpop.f32.mrf.mxu1 }
 0x2b1   : > { %v6143_v54 = vpop.f32.mrf.mxu0  ;;  %v6771_v55 = vld [vmem:[%s10664_s7 + $0x58] sm:$0xff]  }
 0x2b2   : > { %v2722_v3 = vpop.f32.mrf.mxu1 }
 0x2b3   : > { %v2857_v51 = vadd.f32 %v2722_v3, %v2453_v61  ;;  %v2455_v25 = vpop.f32.mrf.mxu0 }
 0x2b4   : > { %v2456_v8 = vadd.f32 %v2455_v25, %v8636_v46  ;;  %v6219_v24 = vpop.f32.mrf.mxu1 }
 0x2b5   : > { %v2898_v23 = vadd.f32 %v8830_v11, %v2857_v51  ;;  %v6144_v19 = vpop.f32.mrf.mxu0 }
 0x2b6   : > { %v2725_v63 = vpop.f32.mrf.mxu1 }
 0x2b7   : > { %v2858_v35 = vadd.f32 %v2725_v63, %v2456_v8  ;;  %v2460_v9 = vpop.f32.mrf.mxu0  ;;  %v8834_v49 = vmax.f32 %v2898_v23, 0.0 }
 0x2b8   : > { %v2461_v5 = vadd.f32 %v2460_v9, %v8644_v53  ;;  %v6220_v17 = vpop.f32.mrf.mxu1 }
 0x2b9   : > { %v2899_v7 = vadd.f32 %v8830_v11, %v2858_v35  ;;  %v6147_v6 = vpop.f32.mrf.mxu0  ;;  %v10851_v46 = vrot.slane %v8834_v49, 7  ;;  %v10850_v24 = vrot.slane %v8834_v49, 1 }
 0x2ba   : > { %v2730_v4 = vpop.f32.mrf.mxu1 }
 0x2bb   : > { %v2933_v43 = vmax.f32 %v2899_v7, 0.0  ;;  %v2859_v12 = vadd.f32 %v2730_v4, %v2461_v5  ;;  %v2463_v50 = vpop.f32.mrf.mxu0  ;;  %v6773_v5 = vld [vmem:[%s10664_s7 + $0x50] sm:$0xff]  }
 0x2bc   : > { %v2464_v33 = vadd.f32 %v2463_v50, %v8652_v39  ;;  %v6223_v61 = vpop.f32.mrf.mxu1 }
 0x2bd   : > { %v2967_v54 = vrot.slane %v2933_v43, 7  ;;  %v3069_v3 = vrot.slane %v2933_v43, 1  ;;  %v3195_v53 = vpack.c.bf16 %v2933_v43, %v8834_v49  ;;  %v2900_v51 = vadd.f32 %v8830_v11, %v2859_v12  ;;  %v6148_v25 = vpop.f32.mrf.mxu0 }
 0x2be   : > { %v2733_v8 = vpop.f32.mrf.mxu1  ;;  %v11164_v25 = vld [vmem:[#allocation12_spill] sm:$0xff] }
 0x2bf   : > { %v8850_v39 = vsel %vm529_vm4, %v10851_v46, %v2967_v54  ;;  %v2934_v23 = vmax.f32 %v2900_v51, 0.0  ;;  %v2860_v19 = vadd.f32 %v2733_v8, %v2464_v33  ;;  %v2468_v63 = vpop.f32.mrf.mxu0  ;;  %6294 = vmatmul.mubr.msk.bf16.vlgmr.msra.gmra.mxu0 %vm2122_vm5, %v3195_v53  ;;  %v3134_v17 = vsel %vm802_vm3, %v10850_v24, %v3069_v3  ;;  %v11163_v53 = vld [vmem:[#allocation10_spill] sm:$0xff]  ;;  %v11169_v46 = vld [vmem:[#allocation17_spill] sm:$0xff] }
 0x2c0   : > { %v2469_v35 = vadd.f32 %v2468_v63, %v8660_v41  ;;  %6438 = vmatpush3.bf16.msra.mxu0 %v6771_v55  ;;  %v6224_v9 = vpop.f32.mrf.mxu1  ;;  %6297 = vmatprep.mubr.msk.bf16.mxu0 %vm6802_vm1, %v10927_v15  ;;  %v8870_v51 = vmul.f32 %v3134_v17, %v11163_v53 }
 0x2c1   : > { %v2968_v7 = vrot.slane %v2934_v23, 7  ;;  %v3070_v6 = vrot.slane %v2934_v23, 1  ;;  %v2901_v4 = vadd.f32 %v8830_v11, %v2860_v19  ;;  %v6151_v43 = vpop.f32.mrf.mxu0  ;;  %6439 = vmatprep.subr.bf16.mxu0 %v10927_v15 }
 0x2c2   : > { %v2738_v41 = vpop.f32.mrf.mxu1 }
 0x2c3   : > { %v3031_v12 = vsel %vm529_vm4, %v2967_v54, %v2968_v7  ;;  %v3133_v50 = vsel %vm802_vm3, %v3069_v3, %v3070_v6  ;;  %v2935_v33 = vmax.f32 %v2901_v4, 0.0  ;;  %v2861_v61 = vadd.f32 %v2738_v41, %v2469_v35  ;;  %v2471_v55 = vpop.f32.mrf.mxu0  ;;  %v6775_v54 = vld [vmem:[%s10664_s7 + $0x48] sm:$0xff]  }
 0x2c4   : > { %v8873_v8 = vmul.f32 %v3133_v50, %v11164_v25  ;;  %v2472_v19 = vadd.f32 %v2471_v55, %v8668_v36  ;;  %v6227_v63 = vpop.f32.mrf.mxu1  ;;  %6440 = vmatpush3.bf16.msra.mxu0 %v6773_v5 }
 0x2c5   : > { %v2969_v9 = vrot.slane %v2935_v33, 7  ;;  %v3071_v43 = vrot.slane %v2935_v33, 1  ;;  %v3196_v3 = vpack.c.bf16 %v2935_v33, %v2934_v23  ;;  %v2902_v35 = vadd.f32 %v8830_v11, %v2861_v61  ;;  %v6152_v4 = vpop.f32.mrf.mxu0  ;;  %6441 = vmatprep.subr.bf16.mxu0 %v10927_v15  ;;  %v11165_v23 = vld [vmem:[#allocation15_spill] sm:$0xff]  ;;  %v11167_v61 = vld [vmem:[#allocation14_spill] sm:$0xff] }
 0x2c6   : > { %v2741_v41 = vpop.f32.mrf.mxu1  ;;  %v8889_v33 = vmul.f32 %v3031_v12, %v11165_v23 }
 0x2c7   : > { %v3030_v36 = vsel %vm529_vm4, %v2968_v7, %v2969_v9  ;;  %v3132_v5 = vsel %vm802_vm3, %v3070_v6, %v3071_v43  ;;  %v2936_v50 = vmax.f32 %v2902_v35, 0.0  ;;  %v2862_v55 = vadd.f32 %v2741_v41, %v2472_v19  ;;  %v2476_v63 = vpop.f32.mrf.mxu0  ;;  %6298 = vmatmul.mubr.msk.bf16.gmra.mxu0 %vm2122_vm5, %v3196_v3  ;;  %v6777_v7 = vld [vmem:[%s10664_s7 + $0x40] sm:$0xff]  }
 0x2c8   : > { %11166 = vst [vmem:[#allocation66_spill] sm:$0xff] %v8889_v33  ;;  %v8892_v4 = vmul.f32 %v3030_v36, %v11167_v61  ;;  %v2477_v17 = vadd.f32 %v2476_v63, %v8676_v14  ;;  %v6228_v24 = vpop.f32.mrf.mxu1  ;;  %6301 = vmatprep.mubr.msk.bf16.mxu0 %vm6802_vm1, %v10927_v15  ;;  %6442 = vmatpush3.bf16.msra.mxu0 %v6775_v54 }
 0x2c9   : > { %v2970_v6 = vrot.slane %v2936_v50, 7  ;;  %v3072_v19 = vrot.slane %v2936_v50, 1  ;;  %v2903_v3 = vadd.f32 %v8830_v11, %v2862_v55  ;;  %v6155_v12 = vpop.f32.mrf.mxu0  ;;  %6443 = vmatprep.subr.bf16.mxu0 %v10927_v15  ;;  %v8909_v61 = vmul.f32 %v3132_v5, %v11169_v46  ;;  %v11170_v55 = vld [vmem:[#allocation16_spill] sm:$0xff] }
 0x2ca   : > { %11168 = vst [vmem:[#allocation88_spill] sm:$0xff] %v8892_v4  ;;  %v2746_v35 = vpop.f32.mrf.mxu1 }
 0x2cb   : > { %v3029_v24 = vsel %vm529_vm4, %v2969_v9, %v2970_v6  ;;  %v3131_v54 = vsel %vm802_vm3, %v3071_v43, %v3072_v19  ;;  %v2937_v41 = vmax.f32 %v2903_v3, 0.0  ;;  %v2863_v36 = vadd.f32 %v2746_v35, %v2477_v17  ;;  %v2479_v63 = vpop.f32.mrf.mxu0 }
 0x2cc   : > { %v8912_v12 = vmul.f32 %v3131_v54, %v11170_v55  ;;  %v2480_v23 = vadd.f32 %v2479_v63, %v8684_v13  ;;  %v6231_v25 = vpop.f32.mrf.mxu1  ;;  %6444 = vmatpush3.bf16.msra.mxu0 %v6777_v7 }
 0x2cd   : > { %v2971_v14 = vrot.slane %v2937_v41, 7  ;;  %v3073_v53 = vrot.slane %v2937_v41, 1  ;;  %v3197_v33 = vpack.c.bf16 %v2937_v41, %v2936_v50  ;;  %v2904_v9 = vadd.f32 %v8830_v11, %v2863_v36  ;;  %v6156_v4 = vpop.f32.mrf.mxu0  ;;  %6589 = vmatprep.subr.bf16.mxu0 %v10927_v15  ;;  %v11171_v50 = vld [vmem:[#allocation19_spill] sm:$0xff] }
 0x2ce   : > { %v2749_v43 = vpop.f32.mrf.mxu1  ;;  %v8925_v35 = vmul.f32 %v3029_v24, %v11171_v50  ;;  %v11173_v4 = vld [vmem:[#allocation18_spill] sm:$0xff] }
 0x2cf   : > { %v3028_v5 = vsel %vm529_vm4, %v2970_v6, %v2971_v14  ;;  %v3130_v13 = vsel %vm802_vm3, %v3072_v19, %v3073_v53  ;;  %v2938_v25 = vmax.f32 %v2904_v9, 0.0  ;;  %v2864_v7 = vadd.f32 %v2749_v43, %v2480_v23  ;;  %v2484_v3 = vpop.f32.mrf.mxu0  ;;  %6302 = vmatmul.mubr.msk.bf16.gmra.mxu0 %vm2122_vm5, %v3197_v33 }
 0x2d0   : > { %11172 = vst [vmem:[#allocation87_spill] sm:$0xff] %v8925_v35  ;;  %v8928_v54 = vmul.f32 %v3028_v5, %v11173_v4  ;;  %v2485_v41 = vadd.f32 %v2484_v3, %v8696_v27  ;;  %v6232_v36 = vpop.f32.mrf.mxu1  ;;  %6305 = vmatprep.mubr.msk.bf16.mxu0 %vm6802_vm1, %v10927_v15  ;;  %v11176_v4 = vld [vmem:[#allocation20_spill] sm:$0xff] }
 0x2d1   : > { %v2972_v6 = vrot.slane %v2938_v25, 7  ;;  %v3074_v63 = vrot.slane %v2938_v25, 1  ;;  %v2905_v19 = vadd.f32 %v8830_v11, %v2864_v7  ;;  %v6159_v23 = vpop.f32.mrf.mxu0  ;;  %v11175_v36 = vld [vmem:[#allocation21_spill] sm:$0xff] }
 0x2d2   : > { %11174 = vst [vmem:[#allocation70_spill] sm:$0xff] %v8928_v54  ;;  %v2754_v9 = vpop.f32.mrf.mxu1  ;;  %v8941_v17 = vmul.f32 %v3130_v13, %v11175_v36 }
 0x2d3   : > { %v3027_v24 = vsel %vm529_vm4, %v2971_v14, %v2972_v6  ;;  %v3129_v43 = vsel %vm802_vm3, %v3073_v53, %v3074_v63  ;;  %v2939_v27 = vmax.f32 %v2905_v19, 0.0  ;;  %v2865_v5 = vadd.f32 %v2754_v9, %v2485_v41  ;;  %v2487_v3 = vpop.f32.mrf.mxu0 }
 0x2d4   : > { %v8944_v50 = vmul.f32 %v3129_v43, %v11176_v4  ;;  %v2488_v7 = vadd.f32 %v2487_v3, %v8704_v52  ;;  %v6235_v23 = vpop.f32.mrf.mxu1  ;;  %v11177_v43 = vld [vmem:[#allocation23_spill] sm:$0xff] }
 0x2d5   : > { %v2973_v55 = vrot.slane %v2939_v27, 7  ;;  %v3075_v33 = vrot.slane %v2939_v27, 1  ;;  %v3198_v46 = vpack.c.bf16 %v2939_v27, %v2938_v25  ;;  %v2906_v14 = vadd.f32 %v8830_v11, %v2865_v5  ;;  %v6160_v35 = vpop.f32.mrf.mxu0  ;;  %v11179_v27 = vld [vmem:[#allocation22_spill] sm:$0xff] }
 0x2d6   : > { %v2757_v54 = vpop.f32.mrf.mxu1  ;;  %v8956_v25 = vmul.f32 %v3027_v24, %v11177_v43 }
 0x2d7   : > { %v3026_v13 = vsel %vm529_vm4, %v2972_v6, %v2973_v55  ;;  %v3128_v41 = vsel %vm802_vm3, %v3074_v63, %v3075_v33  ;;  %v2940_v19 = vmax.f32 %v2906_v14, 0.0  ;;  %v2866_v9 = vadd.f32 %v2757_v54, %v2488_v7  ;;  %v2492_v52 = vpop.f32.mrf.mxu0  ;;  %6306 = vmatmul.mubr.msk.bf16.gmra.mxu0 %vm2122_vm5, %v3198_v46 }
 0x2d8   : > { %11178 = vst [vmem:[#allocation72_spill] sm:$0xff] %v8956_v25  ;;  %v8959_v35 = vmul.f32 %v3026_v13, %v11179_v27  ;;  %v2493_v5 = vadd.f32 %v2492_v52, %v8712_v57  ;;  %v6236_v3 = vpop.f32.mrf.mxu1  ;;  %6309 = vmatprep.mubr.msk.bf16.mxu0 %vm6802_vm1, %v10927_v15  ;;  %v11182_v27 = vld [vmem:[#allocation24_spill] sm:$0xff] }
 0x2d9   : > { %v2974_v6 = vrot.slane %v2940_v19, 7  ;;  %v3076_v23 = vrot.slane %v2940_v19, 1  ;;  %v2907_v63 = vadd.f32 %v8830_v11, %v2866_v9  ;;  %v6163_v54 = vpop.f32.mrf.mxu0  ;;  %v11181_v3 = vld [vmem:[#allocation25_spill] sm:$0xff] }
 0x2da   : > { %11180 = vst [vmem:[#allocation71_spill] sm:$0xff] %v8959_v35  ;;  %v2762_v7 = vpop.f32.mrf.mxu1  ;;  %v8972_v53 = vmul.f32 %v3128_v41, %v11181_v3 }
 0x2db   : > { %v3025_v24 = vsel %vm529_vm4, %v2973_v55, %v2974_v6  ;;  %v3127_v14 = vsel %vm802_vm3, %v3075_v33, %v3076_v23  ;;  %v2941_v57 = vmax.f32 %v2907_v63, 0.0  ;;  %v2867_v13 = vadd.f32 %v2762_v7, %v2493_v5  ;;  %v2495_v52 = vpop.f32.mrf.mxu0 }
 0x2dc   : > { %v8975_v43 = vmul.f32 %v3127_v14, %v11182_v27  ;;  %v2496_v9 = vadd.f32 %v2495_v52, %v8720_v45  ;;  %v6239_v54 = vpop.f32.mrf.mxu1  ;;  %v11183_v14 = vld [vmem:[#allocation27_spill] sm:$0xff] }
 0x2dd   : > { %v2975_v4 = vrot.slane %v2941_v57, 7  ;;  %v3077_v46 = vrot.slane %v2941_v57, 1  ;;  %v3199_v36 = vpack.c.bf16 %v2941_v57, %v2940_v19  ;;  %v2908_v55 = vadd.f32 %v8830_v11, %v2867_v13  ;;  %v6164_v25 = vpop.f32.mrf.mxu0  ;;  %v11185_v57 = vld [vmem:[#allocation26_spill] sm:$0xff] }
 0x2de   : > { %v2765_v35 = vpop.f32.mrf.mxu1  ;;  %v8987_v19 = vmul.f32 %v3025_v24, %v11183_v14 }
 0x2df   : > { %v3024_v41 = vsel %vm529_vm4, %v2974_v6, %v2975_v4  ;;  %v3126_v5 = vsel %vm802_vm3, %v3076_v23, %v3077_v46  ;;  %v2942_v63 = vmax.f32 %v2908_v55, 0.0  ;;  %v2868_v7 = vadd.f32 %v2765_v35, %v2496_v9  ;;  %v2500_v45 = vpop.f32.mrf.mxu0  ;;  %6310 = vmatmul.mubr.msk.bf16.gmra.mxu0 %vm2122_vm5, %v3199_v36 }
 0x2e0   : > { %11184 = vst [vmem:[#allocation74_spill] sm:$0xff] %v8987_v19  ;;  %v8990_v25 = vmul.f32 %v3024_v41, %v11185_v57  ;;  %v2501_v13 = vadd.f32 %v2500_v45, %v8728_v1  ;;  %v6240_v52 = vpop.f32.mrf.mxu1  ;;  %6313 = vmatprep.mubr.msk.bf16.mxu0 %vm6802_vm1, %v10927_v15  ;;  %v11188_v57 = vld [vmem:[#allocation28_spill] sm:$0xff] }
 0x2e1   : > { %v2976_v6 = vrot.slane %v2942_v63, 7  ;;  %v3078_v54 = vrot.slane %v2942_v63, 1  ;;  %v2909_v23 = vadd.f32 %v8830_v11, %v2868_v7  ;;  %v6167_v35 = vpop.f32.mrf.mxu0  ;;  %v11187_v52 = vld [vmem:[#allocation29_spill] sm:$0xff] }
 0x2e2   : > { %11186 = vst [vmem:[#allocation73_spill] sm:$0xff] %v8990_v25  ;;  %v2770_v9 = vpop.f32.mrf.mxu1  ;;  %v9003_v33 = vmul.f32 %v3126_v5, %v11187_v52 }
 0x2e3   : > { %v3023_v24 = vsel %vm529_vm4, %v2975_v4, %v2976_v6  ;;  %v3125_v55 = vsel %vm802_vm3, %v3077_v46, %v3078_v54  ;;  %v2943_v1 = vmax.f32 %v2909_v23, 0.0  ;;  %v2869_v41 = vadd.f32 %v2770_v9, %v2501_v13  ;;  %v2503_v45 = vpop.f32.mrf.mxu0 }
 0x2e4   : > { %v9006_v14 = vmul.f32 %v3125_v55, %v11188_v57  ;;  %v2504_v7 = vadd.f32 %v2503_v45, %v8736_v62  ;;  %v6243_v35 = vpop.f32.mrf.mxu1  ;;  %v11189_v55 = vld [vmem:[#allocation31_spill] sm:$0xff] }
 0x2e5   : > { %v2977_v27 = vrot.slane %v2943_v1, 7  ;;  %v3079_v36 = vrot.slane %v2943_v1, 1  ;;  %v3200_v3 = vpack.c.bf16 %v2943_v1, %v2942_v63  ;;  %v2910_v4 = vadd.f32 %v8830_v11, %v2869_v41  ;;  %v6168_v19 = vpop.f32.mrf.mxu0  ;;  %v11191_v1 = vld [vmem:[#allocation30_spill] sm:$0xff] }
 0x2e6   : > { %v2773_v25 = vpop.f32.mrf.mxu1  ;;  %v9018_v63 = vmul.f32 %v3023_v24, %v11189_v55 }
 0x2e7   : > { %v3022_v5 = vsel %vm529_vm4, %v2976_v6, %v2977_v27  ;;  %v3124_v13 = vsel %vm802_vm3, %v3078_v54, %v3079_v36  ;;  %v2944_v23 = vmax.f32 %v2910_v4, 0.0  ;;  %v2870_v9 = vadd.f32 %v2773_v25, %v2504_v7  ;;  %v2508_v62 = vpop.f32.mrf.mxu0  ;;  %6314 = vmatmul.mubr.msk.bf16.gmra.mxu0 %vm2122_vm5, %v3200_v3 }
 0x2e8   : > { %11190 = vst [vmem:[#allocation76_spill] sm:$0xff] %v9018_v63  ;;  %v9021_v19 = vmul.f32 %v3022_v5, %v11191_v1  ;;  %v2509_v41 = vadd.f32 %v2508_v62, %v8744_v48  ;;  %v6244_v45 = vpop.f32.mrf.mxu1  ;;  %6317 = vmatprep.mubr.msk.bf16.mxu0 %vm6802_vm1, %v10927_v15  ;;  %v11194_v1 = vld [vmem:[#allocation32_spill] sm:$0xff] }
 0x2e9   : > { %v2978_v6 = vrot.slane %v2944_v23, 7  ;;  %v3080_v35 = vrot.slane %v2944_v23, 1  ;;  %v2911_v54 = vadd.f32 %v8830_v11, %v2870_v9  ;;  %v6171_v25 = vpop.f32.mrf.mxu0  ;;  %v11193_v45 = vld [vmem:[#allocation33_spill] sm:$0xff] }
 0x2ea   : > { %11192 = vst [vmem:[#allocation75_spill] sm:$0xff] %v9021_v19  ;;  %v2778_v7 = vpop.f32.mrf.mxu1  ;;  %v9034_v46 = vmul.f32 %v3124_v13, %v11193_v45 }
 0x2eb   : > { %v3021_v24 = vsel %vm529_vm4, %v2977_v27, %v2978_v6  ;;  %v3123_v4 = vsel %vm802_vm3, %v3079_v36, %v3080_v35  ;;  %v2945_v48 = vmax.f32 %v2911_v54, 0.0  ;;  %v2871_v5 = vadd.f32 %v2778_v7, %v2509_v41  ;;  %v2511_v62 = vpop.f32.mrf.mxu0 }
 0x2ec   : > { %v9037_v55 = vmul.f32 %v3123_v4, %v11194_v1  ;;  %v2512_v9 = vadd.f32 %v2511_v62, %v8752_v10  ;;  %v6247_v25 = vpop.f32.mrf.mxu1  ;;  %v11195_v4 = vld [vmem:[#allocation35_spill] sm:$0xff] }
 0x2ed   : > { %v2979_v57 = vrot.slane %v2945_v48, 7  ;;  %v3081_v3 = vrot.slane %v2945_v48, 1  ;;  %v3201_v52 = vpack.c.bf16 %v2945_v48, %v2944_v23  ;;  %v2912_v27 = vadd.f32 %v8830_v11, %v2871_v5  ;;  %v6172_v63 = vpop.f32.mrf.mxu0  ;;  %v11197_v48 = vld [vmem:[#allocation34_spill] sm:$0xff] }
 0x2ee   : > { %v2781_v19 = vpop.f32.mrf.mxu1  ;;  %v9049_v23 = vmul.f32 %v3021_v24, %v11195_v4 }
 0x2ef   : > { %v3020_v13 = vsel %vm529_vm4, %v2978_v6, %v2979_v57  ;;  %v3122_v41 = vsel %vm802_vm3, %v3080_v35, %v3081_v3  ;;  %v2946_v54 = vmax.f32 %v2912_v27, 0.0  ;;  %v2872_v7 = vadd.f32 %v2781_v19, %v2512_v9  ;;  %v2516_v10 = vpop.f32.mrf.mxu0  ;;  %6318 = vmatmul.mubr.msk.bf16.gmra.mxu0 %vm2122_vm5, %v3201_v52 }
 0x2f0   : > { %11196 = vst [vmem:[#allocation78_spill] sm:$0xff] %v9049_v23  ;;  %v9052_v63 = vmul.f32 %v3020_v13, %v11197_v48  ;;  %v2517_v5 = vadd.f32 %v2516_v10, %v8763_v2  ;;  %v6248_v62 = vpop.f32.mrf.mxu1  ;;  %6321 = vmatprep.mubr.msk.bf16.mxu0 %vm6802_vm1, %v10927_v15  ;;  %v11200_v48 = vld [vmem:[#allocation36_spill] sm:$0xff] }
 0x2f1   : > { %v2980_v6 = vrot.slane %v2946_v54, 7  ;;  %v3082_v25 = vrot.slane %v2946_v54, 1  ;;  %v2913_v35 = vadd.f32 %v8830_v11, %v2872_v7  ;;  %v6175_v19 = vpop.f32.mrf.mxu0  ;;  %v11199_v62 = vld [vmem:[#allocation37_spill] sm:$0xff] }
 0x2f2   : > { %11198 = vst [vmem:[#allocation77_spill] sm:$0xff] %v9052_v63  ;;  %v2786_v9 = vpop.f32.mrf.mxu1  ;;  %v9065_v36 = vmul.f32 %v3122_v41, %v11199_v62 }
 0x2f3   : > { %v3019_v24 = vsel %vm529_vm4, %v2979_v57, %v2980_v6  ;;  %v3121_v27 = vsel %vm802_vm3, %v3081_v3, %v3082_v25  ;;  %v2947_v2 = vmax.f32 %v2913_v35, 0.0  ;;  %v2873_v13 = vadd.f32 %v2786_v9, %v2517_v5  ;;  %v2519_v10 = vpop.f32.mrf.mxu0 }
 0x2f4   : > { %v9068_v4 = vmul.f32 %v3121_v27, %v11200_v48  ;;  %v2520_v7 = vadd.f32 %v2519_v10, %v8772_v31  ;;  %v6251_v19 = vpop.f32.mrf.mxu1  ;;  %v11201_v27 = vld [vmem:[#allocation39_spill] sm:$0xff] }
 0x2f5   : > { %v2981_v1 = vrot.slane %v2947_v2, 7  ;;  %v3083_v52 = vrot.slane %v2947_v2, 1  ;;  %v3202_v45 = vpack.c.bf16 %v2947_v2, %v2946_v54  ;;  %v2914_v57 = vadd.f32 %v8830_v11, %v2873_v13  ;;  %v6176_v23 = vpop.f32.mrf.mxu0  ;;  %v11203_v2 = vld [vmem:[#allocation38_spill] sm:$0xff] }
 0x2f6   : > { %v2789_v63 = vpop.f32.mrf.mxu1  ;;  %v9080_v54 = vmul.f32 %v3019_v24, %v11201_v27 }
 0x2f7   : > { %v3018_v41 = vsel %vm529_vm4, %v2980_v6, %v2981_v1  ;;  %v3120_v5 = vsel %vm802_vm3, %v3082_v25, %v3083_v52  ;;  %v2948_v35 = vmax.f32 %v2914_v57, 0.0  ;;  %v2874_v9 = vadd.f32 %v2789_v63, %v2520_v7  ;;  %v2524_v31 = vpop.f32.mrf.mxu0  ;;  %6322 = vmatmul.mubr.msk.bf16.gmra.mxu0 %vm2122_vm5, %v3202_v45 }
 0x2f8   : > { %11202 = vst [vmem:[#allocation89_spill] sm:$0xff] %v9080_v54  ;;  %v9083_v23 = vmul.f32 %v3018_v41, %v11203_v2  ;;  %v2525_v13 = vadd.f32 %v2524_v31, %v8780_v21  ;;  %v6252_v10 = vpop.f32.mrf.mxu1  ;;  %6325 = vmatprep.mubr.msk.bf16.mxu0 %vm6802_vm1, %v10927_v15  ;;  %v11206_v2 = vld [vmem:[#allocation40_spill] sm:$0xff] }
 0x2f9   : > { %v2982_v6 = vrot.slane %v2948_v35, 7  ;;  %v3084_v19 = vrot.slane %v2948_v35, 1  ;;  %v2915_v25 = vadd.f32 %v8830_v11, %v2874_v9  ;;  %v6179_v63 = vpop.f32.mrf.mxu0  ;;  %v11205_v10 = vld [vmem:[#allocation41_spill] sm:$0xff] }
 0x2fa   : > { %11204 = vst [vmem:[#allocation79_spill] sm:$0xff] %v9083_v23  ;;  %v2794_v7 = vpop.f32.mrf.mxu1  ;;  %v9096_v3 = vmul.f32 %v3120_v5, %v11205_v10 }
 0x2fb   : > { %v3017_v24 = vsel %vm529_vm4, %v2981_v1, %v2982_v6  ;;  %v3119_v57 = vsel %vm802_vm3, %v3083_v52, %v3084_v19  ;;  %v2949_v21 = vmax.f32 %v2915_v25, 0.0  ;;  %v2875_v41 = vadd.f32 %v2794_v7, %v2525_v13  ;;  %v2527_v31 = vpop.f32.mrf.mxu0 }
 0x2fc   : > { %v9099_v27 = vmul.f32 %v3119_v57, %v11206_v2  ;;  %v2528_v9 = vadd.f32 %v2527_v31, %v8788_v16  ;;  %v6255_v63 = vpop.f32.mrf.mxu1  ;;  %v11207_v57 = vld [vmem:[#allocation43_spill] sm:$0xff] }
 0x2fd   : > { %v2983_v48 = vrot.slane %v2949_v21, 7  ;;  %v3085_v45 = vrot.slane %v2949_v21, 1  ;;  %v3203_v62 = vpack.c.bf16 %v2949_v21, %v2948_v35  ;;  %v2916_v1 = vadd.f32 %v8830_v11, %v2875_v41  ;;  %v6180_v54 = vpop.f32.mrf.mxu0  ;;  %v11209_v21 = vld [vmem:[#allocation42_spill] sm:$0xff] }
 0x2fe   : > { %v2797_v23 = vpop.f32.mrf.mxu1  ;;  %v9111_v35 = vmul.f32 %v3017_v24, %v11207_v57 }
 0x2ff   : > { %v3016_v5 = vsel %vm529_vm4, %v2982_v6, %v2983_v48  ;;  %v3118_v13 = vsel %vm802_vm3, %v3084_v19, %v3085_v45  ;;  %v2950_v25 = vmax.f32 %v2916_v1, 0.0  ;;  %v2876_v7 = vadd.f32 %v2797_v23, %v2528_v9  ;;  %v2532_v16 = vpop.f32.mrf.mxu0  ;;  %6326 = vmatmul.mubr.msk.bf16.gmra.mxu0 %vm2122_vm5, %v3203_v62 }
 0x300   : > { %11208 = vst [vmem:[#allocation90_spill] sm:$0xff] %v9111_v35  ;;  %v9114_v54 = vmul.f32 %v3016_v5, %v11209_v21  ;;  %v2533_v41 = vadd.f32 %v2532_v16, %v8790_v28  ;;  %v6256_v31 = vpop.f32.mrf.mxu1  ;;  %6329 = vmatprep.mubr.msk.bf16.mxu0 %vm6802_vm1, %v10927_v15  ;;  %v11212_v21 = vld [vmem:[#allocation44_spill] sm:$0xff] }
 0x301   : > { %v2984_v6 = vrot.slane %v2950_v25, 7  ;;  %v3086_v63 = vrot.slane %v2950_v25, 1  ;;  %v2917_v19 = vadd.f32 %v8830_v11, %v2876_v7  ;;  %v6183_v23 = vpop.f32.mrf.mxu0  ;;  %v11211_v31 = vld [vmem:[#allocation45_spill] sm:$0xff] }
 0x302   : > { %11210 = vst [vmem:[#allocation80_spill] sm:$0xff] %v9114_v54  ;;  %v2802_v9 = vpop.f32.mrf.mxu1  ;;  %v9127_v52 = vmul.f32 %v3118_v13, %v11211_v31 }
 0x303   : > { %v3015_v24 = vsel %vm529_vm4, %v2983_v48, %v2984_v6  ;;  %v3117_v1 = vsel %vm802_vm3, %v3085_v45, %v3086_v63  ;;  %v2951_v28 = vmax.f32 %v2917_v19, 0.0  ;;  %v2877_v5 = vadd.f32 %v2802_v9, %v2533_v41  ;;  %v2535_v16 = vpop.f32.mrf.mxu0 }
 0x304   : > { %v9130_v57 = vmul.f32 %v3117_v1, %v11212_v21  ;;  %v2536_v7 = vadd.f32 %v2535_v16, %v8792_v58  ;;  %v6259_v23 = vpop.f32.mrf.mxu1  ;;  %v11213_v1 = vld [vmem:[#allocation47_spill] sm:$0xff] }
 0x305   : > { %v2985_v2 = vrot.slane %v2951_v28, 7  ;;  %v3087_v62 = vrot.slane %v2951_v28, 1  ;;  %v3204_v10 = vpack.c.bf16 %v2951_v28, %v2950_v25  ;;  %v2918_v48 = vadd.f32 %v8830_v11, %v2877_v5  ;;  %v6184_v35 = vpop.f32.mrf.mxu0  ;;  %v11215_v28 = vld [vmem:[#allocation46_spill] sm:$0xff] }
 0x306   : > { %v2805_v54 = vpop.f32.mrf.mxu1  ;;  %v9142_v25 = vmul.f32 %v3015_v24, %v11213_v1 }
 0x307   : > { %v3014_v13 = vsel %vm529_vm4, %v2984_v6, %v2985_v2  ;;  %v3116_v41 = vsel %vm802_vm3, %v3086_v63, %v3087_v62  ;;  %v2952_v19 = vmax.f32 %v2918_v48, 0.0  ;;  %v2878_v9 = vadd.f32 %v2805_v54, %v2536_v7  ;;  %v2540_v58 = vpop.f32.mrf.mxu0  ;;  %6330 = vmatmul.mubr.msk.bf16.gmra.mxu0 %vm2122_vm5, %v3204_v10 }
 0x308   : > { %11214 = vst [vmem:[#allocation91_spill] sm:$0xff] %v9142_v25  ;;  %v9145_v35 = vmul.f32 %v3014_v13, %v11215_v28  ;;  %v2541_v5 = vadd.f32 %v2540_v58, %v8794_v59  ;;  %v6260_v16 = vpop.f32.mrf.mxu1  ;;  %6333 = vmatprep.mubr.msk.bf16.mxu0 %vm6802_vm1, %v10927_v15  ;;  %v11218_v28 = vld [vmem:[#allocation48_spill] sm:$0xff] }
 0x309   : > { %v2986_v6 = vrot.slane %v2952_v19, 7  ;;  %v3088_v23 = vrot.slane %v2952_v19, 1  ;;  %v2919_v63 = vadd.f32 %v8830_v11, %v2878_v9  ;;  %v6187_v54 = vpop.f32.mrf.mxu0  ;;  %v11217_v16 = vld [vmem:[#allocation49_spill] sm:$0xff] }
 0x30a   : > { %11216 = vst [vmem:[#allocation81_spill] sm:$0xff] %v9145_v35  ;;  %v2810_v7 = vpop.f32.mrf.mxu1  ;;  %v9158_v45 = vmul.f32 %v3116_v41, %v11217_v16 }
 0x30b   : > { %v3013_v24 = vsel %vm529_vm4, %v2985_v2, %v2986_v6  ;;  %v3115_v48 = vsel %vm802_vm3, %v3087_v62, %v3088_v23  ;;  %v2953_v59 = vmax.f32 %v2919_v63, 0.0  ;;  %v2879_v13 = vadd.f32 %v2810_v7, %v2541_v5  ;;  %v2543_v58 = vpop.f32.mrf.mxu0 }
 0x30c   : > { %v9161_v1 = vmul.f32 %v3115_v48, %v11218_v28  ;;  %v2544_v9 = vadd.f32 %v2543_v58, %v8796_v26  ;;  %v6263_v54 = vpop.f32.mrf.mxu1  ;;  %v11219_v48 = vld [vmem:[#allocation51_spill] sm:$0xff] }
 0x30d   : > { %v2987_v21 = vrot.slane %v2953_v59, 7  ;;  %v3089_v10 = vrot.slane %v2953_v59, 1  ;;  %v3205_v31 = vpack.c.bf16 %v2953_v59, %v2952_v19  ;;  %v2920_v2 = vadd.f32 %v8830_v11, %v2879_v13  ;;  %v6188_v25 = vpop.f32.mrf.mxu0  ;;  %v11221_v59 = vld [vmem:[#allocation50_spill] sm:$0xff] }
 0x30e   : > { %v2813_v35 = vpop.f32.mrf.mxu1  ;;  %v9173_v19 = vmul.f32 %v3013_v24, %v11219_v48 }
 0x30f   : > { %v3012_v41 = vsel %vm529_vm4, %v2986_v6, %v2987_v21  ;;  %v3114_v5 = vsel %vm802_vm3, %v3088_v23, %v3089_v10  ;;  %v2954_v63 = vmax.f32 %v2920_v2, 0.0  ;;  %v2880_v7 = vadd.f32 %v2813_v35, %v2544_v9  ;;  %v2548_v26 = vpop.f32.mrf.mxu0  ;;  %6334 = vmatmul.mubr.msk.bf16.gmra.mxu0 %vm2122_vm5, %v3205_v31 }
 0x310   : > { %11220 = vst [vmem:[#allocation92_spill] sm:$0xff] %v9173_v19  ;;  %v9176_v25 = vmul.f32 %v3012_v41, %v11221_v59  ;;  %v2549_v13 = vadd.f32 %v2548_v26, %v8801_v44  ;;  %v6264_v58 = vpop.f32.mrf.mxu1  ;;  %6337 = vmatprep.mubr.msk.bf16.mxu0 %vm6802_vm1, %v10927_v15  ;;  %v11224_v59 = vld [vmem:[#allocation52_spill] sm:$0xff] }
 0x311   : > { %v2988_v6 = vrot.slane %v2954_v63, 7  ;;  %v3090_v54 = vrot.slane %v2954_v63, 1  ;;  %v2921_v23 = vadd.f32 %v8830_v11, %v2880_v7  ;;  %v6191_v35 = vpop.f32.mrf.mxu0  ;;  %v11223_v58 = vld [vmem:[#allocation53_spill] sm:$0xff] }
 0x312   : > { %11222 = vst [vmem:[#allocation82_spill] sm:$0xff] %v9176_v25  ;;  %v2818_v9 = vpop.f32.mrf.mxu1  ;;  %v9189_v62 = vmul.f32 %v3114_v5, %v11223_v58 }
 0x313   : > { %v3011_v24 = vsel %vm529_vm4, %v2987_v21, %v2988_v6  ;;  %v3113_v2 = vsel %vm802_vm3, %v3089_v10, %v3090_v54  ;;  %v2955_v44 = vmax.f32 %v2921_v23, 0.0  ;;  %v2881_v41 = vadd.f32 %v2818_v9, %v2549_v13  ;;  %v2551_v26 = vpop.f32.mrf.mxu0 }
 0x314   : > { %v9192_v48 = vmul.f32 %v3113_v2, %v11224_v59  ;;  %v2552_v7 = vadd.f32 %v2551_v26, %v8804_v56  ;;  %v6267_v35 = vpop.f32.mrf.mxu1  ;;  %v11225_v2 = vld [vmem:[#allocation55_spill] sm:$0xff] }
 0x315   : > { %v2989_v28 = vrot.slane %v2955_v44, 7  ;;  %v3091_v31 = vrot.slane %v2955_v44, 1  ;;  %v3206_v16 = vpack.c.bf16 %v2955_v44, %v2954_v63  ;;  %v2922_v21 = vadd.f32 %v8830_v11, %v2881_v41  ;;  %v6192_v19 = vpop.f32.mrf.mxu0  ;;  %v11227_v44 = vld [vmem:[#allocation54_spill] sm:$0xff] }
 0x316   : > { %v2821_v25 = vpop.f32.mrf.mxu1  ;;  %v9204_v63 = vmul.f32 %v3011_v24, %v11225_v2 }
 0x317   : > { %v3010_v5 = vsel %vm529_vm4, %v2988_v6, %v2989_v28  ;;  %v3112_v13 = vsel %vm802_vm3, %v3090_v54, %v3091_v31  ;;  %v2956_v23 = vmax.f32 %v2922_v21, 0.0  ;;  %v2882_v9 = vadd.f32 %v2821_v25, %v2552_v7  ;;  %v2556_v56 = vpop.f32.mrf.mxu0  ;;  %6338 = vmatmul.mubr.msk.bf16.gmra.mxu0 %vm2122_vm5, %v3206_v16 }
 0x318   : > { %11226 = vst [vmem:[#allocation84_spill] sm:$0xff] %v9204_v63  ;;  %v9207_v19 = vmul.f32 %v3010_v5, %v11227_v44  ;;  %v2557_v41 = vadd.f32 %v2556_v56, %v8806_v34  ;;  %v6268_v26 = vpop.f32.mrf.mxu1  ;;  %6341 = vmatprep.mubr.msk.bf16.mxu0 %vm6802_vm1, %v10927_v15  ;;  %v11230_v44 = vld [vmem:[#allocation56_spill] sm:$0xff] }
 0x319   : > { %v2990_v6 = vrot.slane %v2956_v23, 7  ;;  %v3092_v35 = vrot.slane %v2956_v23, 1  ;;  %v2923_v54 = vadd.f32 %v8830_v11, %v2882_v9  ;;  %v6195_v25 = vpop.f32.mrf.mxu0  ;;  %v11229_v26 = vld [vmem:[#allocation57_spill] sm:$0xff] }
 0x31a   : > { %11228 = vst [vmem:[#allocation83_spill] sm:$0xff] %v9207_v19  ;;  %v2826_v7 = vpop.f32.mrf.mxu1  ;;  %v9220_v10 = vmul.f32 %v3112_v13, %v11229_v26 }
 0x31b   : > { %v3009_v24 = vsel %vm529_vm4, %v2989_v28, %v2990_v6  ;;  %v3111_v21 = vsel %vm802_vm3, %v3091_v31, %v3092_v35  ;;  %v2957_v34 = vmax.f32 %v2923_v54, 0.0  ;;  %v2883_v5 = vadd.f32 %v2826_v7, %v2557_v41  ;;  %v2559_v56 = vpop.f32.mrf.mxu0 }
 0x31c   : > { %v9223_v2 = vmul.f32 %v3111_v21, %v11230_v44  ;;  %v2560_v9 = vadd.f32 %v2559_v56, %v8808_v38  ;;  %v6271_v25 = vpop.f32.mrf.mxu1  ;;  %v11231_v21 = vld [vmem:[#allocation2_spill] sm:$0xff] }
 0x31d   : > { %v2991_v59 = vrot.slane %v2957_v34, 7  ;;  %v3093_v16 = vrot.slane %v2957_v34, 1  ;;  %v3207_v58 = vpack.c.bf16 %v2957_v34, %v2956_v23  ;;  %v2924_v28 = vadd.f32 %v8830_v11, %v2883_v5  ;;  %v6196_v63 = vpop.f32.mrf.mxu0  ;;  %v11233_v34 = vld [vmem:[#allocation4_spill] sm:$0xff] }
 0x31e   : > { %v2829_v19 = vpop.f32.mrf.mxu1  ;;  %v9235_v23 = vmul.f32 %v3009_v24, %v11231_v21 }
 0x31f   : > { %v3008_v13 = vsel %vm529_vm4, %v2990_v6, %v2991_v59  ;;  %v3110_v41 = vsel %vm802_vm3, %v3092_v35, %v3093_v16  ;;  %v2958_v54 = vmax.f32 %v2924_v28, 0.0  ;;  %v2884_v7 = vadd.f32 %v2829_v19, %v2560_v9  ;;  %v2564_v38 = vpop.f32.mrf.mxu0  ;;  %6342 = vmatmul.mubr.msk.bf16.gmra.mxu0 %vm2122_vm5, %v3207_v58 }
 0x320   : > { %11232 = vst [vmem:[#allocation86_spill] sm:$0xff] %v9235_v23  ;;  %v9238_v63 = vmul.f32 %v3008_v13, %v11233_v34  ;;  %v2565_v5 = vadd.f32 %v2564_v38, %v8810_v32  ;;  %v6272_v56 = vpop.f32.mrf.mxu1  ;;  %6345 = vmatprep.mubr.msk.bf16.mxu0 %vm6802_vm1, %v10927_v15  ;;  %v11236_v34 = vld [vmem:[#allocation5_spill] sm:$0xff] }
 0x321   : > { %v2992_v6 = vrot.slane %v2958_v54, 7  ;;  %v3094_v25 = vrot.slane %v2958_v54, 1  ;;  %v2925_v35 = vadd.f32 %v8830_v11, %v2884_v7  ;;  %v6199_v19 = vpop.f32.mrf.mxu0  ;;  %v11235_v56 = vld [vmem:[#allocation58_spill] sm:$0xff] }
 0x322   : > { %11234 = vst [vmem:[#allocation85_spill] sm:$0xff] %v9238_v63  ;;  %v2834_v9 = vpop.f32.mrf.mxu1  ;;  %v9251_v31 = vmul.f32 %v3110_v41, %v11235_v56 }
 0x323   : > { %v3007_v24 = vsel %vm529_vm4, %v2991_v59, %v2992_v6  ;;  %v3109_v28 = vsel %vm802_vm3, %v3093_v16, %v3094_v25  ;;  %v2959_v32 = vmax.f32 %v2925_v35, 0.0  ;;  %v2885_v13 = vadd.f32 %v2834_v9, %v2565_v5  ;;  %v2567_v38 = vpop.f32.mrf.mxu0 }
 0x324   : > { %v9254_v21 = vmul.f32 %v3109_v28, %v11236_v34  ;;  %v2568_v7 = vadd.f32 %v2567_v38, %v8812_v22  ;;  %v6275_v19 = vpop.f32.mrf.mxu1  ;;  %v11237_v28 = vld [vmem:[#allocation7_spill] sm:$0xff] }
 0x325   : > { %v2993_v44 = vrot.slane %v2959_v32, 7  ;;  %v3095_v58 = vrot.slane %v2959_v32, 1  ;;  %v3208_v26 = vpack.c.bf16 %v2959_v32, %v2958_v54  ;;  %v2926_v59 = vadd.f32 %v8830_v11, %v2885_v13  ;;  %v6200_v23 = vpop.f32.mrf.mxu0  ;;  %v11239_v32 = vld [vmem:[#allocation6_spill] sm:$0xff] }
 0x326   : > { %v2837_v63 = vpop.f32.mrf.mxu1  ;;  %v9266_v54 = vmul.f32 %v3007_v24, %v11237_v28 }
 0x327   : > { %v3006_v41 = vsel %vm529_vm4, %v2992_v6, %v2993_v44  ;;  %v3108_v5 = vsel %vm802_vm3, %v3094_v25, %v3095_v58  ;;  %v2960_v35 = vmax.f32 %v2926_v59, 0.0  ;;  %v2886_v9 = vadd.f32 %v2837_v63, %v2568_v7  ;;  %v2572_v22 = vpop.f32.mrf.mxu0  ;;  %6346 = vmatmul.mubr.msk.bf16.gmra.mxu0 %vm2122_vm5, %v3208_v26 }
 0x328   : > { %11238 = vst [vmem:[#allocation93_spill] sm:$0xff] %v9266_v54  ;;  %v9269_v23 = vmul.f32 %v3006_v41, %v11239_v32  ;;  %v2573_v13 = vadd.f32 %v2572_v22, %v8814_v37  ;;  %v6276_v38 = vpop.f32.mrf.mxu1  ;;  %6349 = vmatprep.mubr.msk.bf16.mxu0 %vm6802_vm1, %v10927_v15  ;;  %v11242_v32 = vld [vmem:[#allocation59_spill] sm:$0xff] }
 0x329   : > { %v2994_v6 = vrot.slane %v2960_v35, 7  ;;  %v3096_v19 = vrot.slane %v2960_v35, 1  ;;  %v2927_v25 = vadd.f32 %v8830_v11, %v2886_v9  ;;  %v6203_v63 = vpop.f32.mrf.mxu0  ;;  %v11241_v38 = vld [vmem:[#allocation60_spill] sm:$0xff] }
 0x32a   : > { %11240 = vst [vmem:[#allocation94_spill] sm:$0xff] %v9269_v23  ;;  %v2842_v7 = vpop.f32.mrf.mxu1  ;;  %v9282_v16 = vmul.f32 %v3108_v5, %v11241_v38 }
 0x32b   : > { %v3005_v24 = vsel %vm529_vm4, %v2993_v44, %v2994_v6  ;;  %v3107_v59 = vsel %vm802_vm3, %v3095_v58, %v3096_v19  ;;  %v2961_v37 = vmax.f32 %v2927_v25, 0.0  ;;  %v2887_v41 = vadd.f32 %v2842_v7, %v2573_v13  ;;  %v2575_v22 = vpop.f32.mrf.mxu0 }
 0x32c   : > { %v9285_v28 = vmul.f32 %v3107_v59, %v11242_v32  ;;  %v2576_v9 = vadd.f32 %v2575_v22, %v8816_v47  ;;  %v6279_v63 = vpop.f32.mrf.mxu1  ;;  %v11243_v59 = vld [vmem:[#allocation9_spill] sm:$0xff] }
 0x32d   : > { %v2995_v34 = vrot.slane %v2961_v37, 7  ;;  %v3097_v26 = vrot.slane %v2961_v37, 1  ;;  %v3209_v56 = vpack.c.bf16 %v2961_v37, %v2960_v35  ;;  %v2928_v44 = vadd.f32 %v8830_v11, %v2887_v41  ;;  %v6204_v54 = vpop.f32.mrf.mxu0  ;;  %v11245_v11 = vld [vmem:[#allocation8_spill] sm:$0xff] }
 0x32e   : > { %v2845_v23 = vpop.f32.mrf.mxu1  ;;  %v9297_v35 = vmul.f32 %v3005_v24, %v11243_v59 }
 0x32f   : > { %v3004_v5 = vsel %vm529_vm4, %v2994_v6, %v2995_v34  ;;  %v3106_v13 = vsel %vm802_vm3, %v3096_v19, %v3097_v26  ;;  %v2962_v25 = vmax.f32 %v2928_v44, 0.0  ;;  %v2888_v7 = vadd.f32 %v2845_v23, %v2576_v9  ;;  %v2580_v47 = vpop.f32.mrf.mxu0  ;;  %6350 = vmatmul.mubr.msk.bf16.gmra.mxu0 %vm2122_vm5, %v3209_v56  ;;  %v6790_v23 = vld [vmem:[%s10663_s6] ss:$0 sm:$0xff] }
 0x330   : > { %11244 = vst [vmem:[#allocation95_spill] sm:$0xff] %v9297_v35  ;;  %v9300_v54 = vmul.f32 %v3004_v5, %v11245_v11  ;;  %v2581_v37 = vadd.f32 %v2580_v47, %v8818_v18  ;;  %v6280_v41 = vpop.f32.mrf.mxu1  ;;  %6353 = vmatprep.mubr.msk.bf16.mxu0 %vm6802_vm1, %v10927_v15  ;;  %v11248_v11 = vld [vmem:[#allocation61_spill] sm:$0xff] }
 0x331   : > { %v2996_v6 = vrot.slane %v2962_v25, 7  ;;  %v3098_v22 = vrot.slane %v2962_v25, 1  ;;  %v2929_v19 = vadd.f32 %v6790_v23, %v2888_v7  ;;  %v6207_v56 = vpop.f32.mrf.mxu0  ;;  %v11247_v41 = vld [vmem:[#allocation62_spill] sm:$0xff] }
 0x332   : > { %11246 = vst [vmem:[#allocation96_spill] sm:$0xff] %v9300_v54  ;;  %v2850_v9 = vpop.f32.mrf.mxu1  ;;  %v9315_v58 = vmul.f32 %v3106_v13, %v11247_v41 }
 0x333   : > { %v3003_v63 = vsel %vm529_vm4, %v2995_v34, %v2996_v6  ;;  %v3105_v18 = vsel %vm802_vm3, %v3097_v26, %v3098_v22  ;;  %v2963_v44 = vmax.f32 %v2929_v19, 0.0  ;;  %v2889_v5 = vadd.f32 %v2850_v9, %v2581_v37  ;;  %v2583_v47 = vpop.f32.mrf.mxu0 }
 0x334   : > { %v9318_v59 = vmul.f32 %v3105_v18, %v11248_v11  ;;  %v2584_v7 = vadd.f32 %v2583_v47, %v8823_v29  ;;  %v6283_v56 = vpop.f32.mrf.mxu1  ;;  %v11249_v29 = vld [vmem:[#allocation64_spill] sm:$0xff] }
 0x335   : > { %v2997_v32 = vrot.slane %v2963_v44, 7  ;;  %v3099_v24 = vrot.slane %v2963_v44, 1  ;;  %v3210_v38 = vpack.c.bf16 %v2963_v44, %v2962_v25  ;;  %v2930_v35 = vadd.f32 %v6790_v23, %v2889_v5  ;;  %v6208_v34 = vpop.f32.mrf.mxu0  ;;  %v11250_v25 = vld [vmem:[#allocation63_spill] sm:$0xff] }
 0x336   : > { %v2853_v54 = vpop.f32.mrf.mxu1  ;;  %v9329_v18 = vmul.f32 %v3003_v63, %v11249_v29 }
 0x337   : > { %v3002_v37 = vsel %vm529_vm4, %v2996_v6, %v2997_v32  ;;  %v3104_v13 = vsel %vm802_vm3, %v3098_v22, %v3099_v24  ;;  %v2964_v19 = vmax.f32 %v2930_v35, 0.0  ;;  %v2890_v9 = vadd.f32 %v2853_v54, %v2584_v7  ;;  %6354 = vmatmul.mubr.msk.bf16.gmra.mxu0 %vm2122_vm5, %v3210_v38  ;;  %v11251_v7 = vld [vmem:[#allocation65_spill] sm:$0xff]  ;;  %v11253_v22 = vld [vmem:[#allocation68_spill] sm:$0xff] }
 0x338   : > { %v9332_v44 = vmul.f32 %v3002_v37, %v11250_v25  ;;  %v6284_v5 = vpop.f32.mrf.mxu1  ;;  %6357 = vmatprep.mubr.msk.bf16.mxu0 %vm6802_vm1, %v10927_v15  ;;  %v9343_v63 = vmul.f32 %v3104_v13, %v11099_v20  ;;  %v11254_v13 = vrot.slane %v8834_v49, 7 }
 0x339   : > { %v2998_v47 = vrot.slane %v2964_v19, 7  ;;  %v3100_v56 = vrot.slane %v2964_v19, 1  ;;  %v2931_v6 = vadd.f32 %v6790_v23, %v2890_v9  ;;  %v11252_v23 = vld [vmem:[#allocation13_spill] sm:$0xff] }
 0x33a   : > { %v3035_v9 = vmul.f32 %v8850_v39, %v11252_v23 }
 0x33b   : > { %v3001_v35 = vsel %vm529_vm4, %v2997_v32, %v2998_v47  ;;  %v3103_v38 = vsel %vm802_vm3, %v3099_v24, %v3100_v56  ;;  %v2965_v54 = vmax.f32 %v2931_v6, 0.0 }
 0x33c   : > { %v9346_v34 = vmul.f32 %v3103_v38, %v11251_v7  ;;  %v9351_v25 = vmul.f32 %v3001_v35, %v11253_v22  ;;  %v11255_v38 = vrot.slane %v8834_v49, 1  ;;  %v6778_v49 = vld [vmem:[%s10666_s9 + $0x38] sm:$0xff]  }
 0x33d   : > { %v2999_v37 = vrot.slane %v2965_v54, 7  ;;  %v3101_v5 = vrot.slane %v2965_v54, 1  ;;  %v3211_v26 = vpack.c.bf16 %v2965_v54, %v2964_v19 }
 0x33e   : > { %v3724_v32 = vpack.c.bf16 %v9346_v34, %v9343_v63 }
 0x33f   : > { %v3000_v24 = vsel %vm529_vm4, %v2998_v47, %v2999_v37  ;;  %v3033_v6 = vsel %vm529_vm4, %v2999_v37, %v11254_v13  ;;  %v3102_v19 = vsel %vm802_vm3, %v3100_v56, %v3101_v5  ;;  %v3135_v39 = vsel %vm802_vm3, %v3101_v5, %v11255_v38  ;;  %6358 = vmatmul.mubr.msk.bf16.gmra.mxu0 %vm2122_vm5, %v3211_v26  ;;  %v11257_v13 = vld [vmem:[#allocation88_spill] sm:$0xff] }
 0x340   : > { %v3034_v35 = vmul.f32 %v3033_v6, %v11107_v60  ;;  %v9370_v54 = vmul.f32 %v3000_v24, %v11108_v0  ;;  %v9373_v47 = vmul.f32 %v3102_v19, %v11109_v42  ;;  %v9376_v37 = vmul.f32 %v3135_v39, %v11110_v30  ;;  %6445 = vmatprep.mubr.msk.bf16.mxu0 %vm6802_vm1, %v10927_v15  ;;  %v6779_v24 = vld [vmem:[%s10666_s9 + $0x30] sm:$0xff]   ;;  %v11258_v6 = vld [vmem:[#allocation66_spill] sm:$0xff]  ;;  %v11262_v39 = vld [vmem:[#allocation87_spill] sm:$0xff] }
 0x341   : > { %v11259_v19 = vpack.c.bf16 %v11257_v13, %v11258_v6  ;;  %v11260_v38 = vpack.c.bf16 %v8912_v12, %v8909_v61  ;;  %v11264_v61 = vpack.c.bf16 %v8944_v50, %v8941_v17  ;;  %v11265_v12 = vld [vmem:[#allocation71_spill] sm:$0xff]  ;;  %v11269_v17 = vld [vmem:[#allocation73_spill] sm:$0xff]  ;;  %v11270_v50 = vld [vmem:[#allocation74_spill] sm:$0xff]  ;;  %v11272_v13 = vpack.c.bf16 %v9006_v14, %v9003_v33 }
 0x342   : > { %v3170_v56 = vpack.c.bf16 %v3035_v9, %v3034_v35  ;;  %v3186_v26 = vpack.c.bf16 %v9370_v54, %v9351_v25  ;;  %v3725_v5 = vpack.c.bf16 %v9376_v37, %v9373_v47  ;;  %v11256_v9 = vpack.c.bf16 %v8873_v8, %v8870_v51  ;;  %v6780_v51 = vld [vmem:[%s10666_s9 + $0x28] sm:$0xff]   ;;  %v11261_v8 = vld [vmem:[#allocation70_spill] sm:$0xff]  ;;  %v11277_v14 = vld [vmem:[#allocation77_spill] sm:$0xff] }
 0x343   : > { %v11263_v35 = vpack.c.bf16 %v11261_v8, %v11262_v39  ;;  %v6781_v33 = vld [vmem:[%s10666_s9 + $0x20] sm:$0xff]   ;;  %v11282_v8 = vld [vmem:[#allocation89_spill] sm:$0xff]  ;;  %v6786_v37 = vld [vmem:[%s10666_s9 + $0x8] sm:$0xff]  }
 0x344   : > { %6370 = vmatmul.mubr.msk.bf16.vlgmr.msra.gmra.mxu1 %vm2122_vm5, %v3170_v56 }
 0x345   : > { %6373 = vmatprep.mubr.msk.bf16.mxu1 %vm6802_vm1, %v10927_v15  ;;  %6514 = vmatpush3.bf16.msra.mxu1 %v6778_v49  ;;  %v11266_v49 = vld [vmem:[#allocation72_spill] sm:$0xff] }
 0x346   : > { %6515 = vmatprep.subr.bf16.mxu1 %v10927_v15  ;;  %v11267_v56 = vpack.c.bf16 %v11265_v12, %v11266_v49  ;;  %v11285_v12 = vld [vmem:[#allocation80_spill] sm:$0xff]  ;;  %v11286_v49 = vld [vmem:[#allocation90_spill] sm:$0xff] }
 0x347   : > { %6446 = vmatmul.mubr.msk.bf16.vlgmr.msra.gmra.mxu0 %vm2122_vm5, %v11256_v9  ;;  %v11271_v9 = vpack.c.bf16 %v11269_v17, %v11270_v50 }
 0x348   : > { %6449 = vmatprep.mubr.msk.bf16.mxu0 %vm6802_vm1, %v10927_v15 }
 0x349   : > { %6516 = vmatpush3.bf16.msra.mxu1 %v6779_v24  ;;  %v11268_v24 = vpack.c.bf16 %v8975_v43, %v8972_v53  ;;  %v11273_v53 = vld [vmem:[#allocation75_spill] sm:$0xff]  ;;  %v11274_v43 = vld [vmem:[#allocation76_spill] sm:$0xff] }
 0x34a   : > { %6517 = vmatprep.subr.bf16.mxu1 %v10927_v15  ;;  %v11275_v6 = vpack.c.bf16 %v11273_v53, %v11274_v43 }
 0x34c   : > { %6374 = vmatmul.mubr.msk.bf16.gmra.mxu1 %vm2122_vm5, %v11259_v19  ;;  %v11276_v19 = vpack.c.bf16 %v9037_v55, %v9034_v46  ;;  %v11280_v46 = vpack.c.bf16 %v9068_v4, %v9065_v36  ;;  %v11281_v55 = vld [vmem:[#allocation79_spill] sm:$0xff] }
 0x34d   : > { %6377 = vmatprep.mubr.msk.bf16.mxu1 %vm6802_vm1, %v10927_v15  ;;  %6518 = vmatpush3.bf16.msra.mxu1 %v6780_v51  ;;  %v11283_v39 = vpack.c.bf16 %v11281_v55, %v11282_v8  ;;  %v6782_v8 = vld [vmem:[%s10666_s9 + $0x18] sm:$0xff]  }
 0x34e   : > { %6519 = vmatprep.subr.bf16.mxu1 %v10927_v15  ;;  %6590 = vmatpush3.bf16.msra.mxu0 %v6782_v8 }
 0x34f   : > { %6450 = vmatmul.mubr.msk.bf16.gmra.mxu0 %vm2122_vm5, %v11260_v38  ;;  %v11278_v38 = vld [vmem:[#allocation78_spill] sm:$0xff]  ;;  %6591 = vmatprep.subr.bf16.mxu0 %v10927_v15 }
 0x350   : > { %6453 = vmatprep.mubr.msk.bf16.mxu0 %vm6802_vm1, %v10927_v15  ;;  %v11279_v51 = vpack.c.bf16 %v11277_v14, %v11278_v38  ;;  %v11294_v14 = vld [vmem:[#allocation92_spill] sm:$0xff] }
 0x351   : > { %6520 = vmatpush3.bf16.msra.mxu1 %v6781_v33  ;;  %v11293_v33 = vld [vmem:[#allocation82_spill] sm:$0xff] }
 0x352   : > { %6665 = vmatprep.subr.bf16.mxu1 %v10927_v15  ;;  %v11295_v38 = vpack.c.bf16 %v11293_v33, %v11294_v14 }
 0x354   : > { %6378 = vmatmul.mubr.msk.bf16.gmra.mxu1 %vm2122_vm5, %v11263_v35 }
 0x355   : > { %6381 = vmatprep.mubr.msk.bf16.mxu1 %vm6802_vm1, %v10927_v15 }
 0x357   : > { %6454 = vmatmul.mubr.msk.bf16.gmra.mxu0 %vm2122_vm5, %v11264_v61  ;;  %v11284_v61 = vpack.c.bf16 %v9099_v27, %v9096_v3  ;;  %v11288_v3 = vpack.c.bf16 %v9130_v57, %v9127_v52  ;;  %v11292_v52 = vpack.c.bf16 %v9161_v1, %v9158_v45  ;;  %v11296_v45 = vpack.c.bf16 %v9192_v48, %v9189_v62 }
 0x358   : > { %6457 = vmatprep.mubr.msk.bf16.mxu0 %vm6802_vm1, %v10927_v15  ;;  %v11300_v48 = vpack.c.bf16 %v9223_v2, %v9220_v10  ;;  %v11304_v10 = vpack.c.bf16 %v9254_v21, %v9251_v31  ;;  %v11308_v31 = vpack.c.bf16 %v9285_v28, %v9282_v16  ;;  %v11312_v16 = vpack.c.bf16 %v9318_v59, %v9315_v58  ;;  %v6784_v58 = vld [vmem:[%s10666_s9 + $0x10] sm:$0xff]  }
 0x359   : > { %6592 = vmatpush3.bf16.msra.mxu0 %v6784_v58 }
 0x35a   : > { %6593 = vmatprep.subr.bf16.mxu0 %v10927_v15 }
 0x35c   : > { %6382 = vmatmul.mubr.msk.bf16.gmra.mxu1 %vm2122_vm5, %v11267_v56  ;;  %v11287_v56 = vpack.c.bf16 %v11285_v12, %v11286_v49 }
 0x35d   : > { %6385 = vmatprep.mubr.msk.bf16.mxu1 %vm6802_vm1, %v10927_v15  ;;  %6594 = vmatpush3.bf16.msra.mxu0 %v6786_v37 }
 0x35e   : > { %6595 = vmatprep.subr.bf16.mxu0 %v10927_v15 }
 0x35f   : > { %6458 = vmatmul.mubr.msk.bf16.gmra.mxu0 %vm2122_vm5, %v11268_v24 }
 0x360   : > { %6461 = vmatprep.mubr.msk.bf16.mxu0 %vm6802_vm1, %v10927_v15 }
 0x364   : > { %6386 = vmatmul.mubr.msk.bf16.gmra.mxu1 %vm2122_vm5, %v11271_v9  ;;  %v11289_v9 = vld [vmem:[#allocation81_spill] sm:$0xff] }
 0x365   : > { %6389 = vmatprep.mubr.msk.bf16.mxu1 %vm6802_vm1, %v10927_v15 }
 0x367   : > { %6462 = vmatmul.mubr.msk.bf16.gmra.mxu0 %vm2122_vm5, %v11272_v13  ;;  %v11290_v13 = vld [vmem:[#allocation91_spill] sm:$0xff] }
 0x368   : > { %6465 = vmatprep.mubr.msk.bf16.mxu0 %vm6802_vm1, %v10927_v15  ;;  %v11291_v53 = vpack.c.bf16 %v11289_v9, %v11290_v13 }
 0x36c   : > { %6390 = vmatmul.mubr.msk.bf16.gmra.mxu1 %vm2122_vm5, %v11275_v6 }
 0x36d   : > { %6393 = vmatprep.mubr.msk.bf16.mxu1 %vm6802_vm1, %v10927_v15 }
 0x36f   : > { %6466 = vmatmul.mubr.msk.bf16.gmra.mxu0 %vm2122_vm5, %v11276_v19 }
 0x370   : > { %6469 = vmatprep.mubr.msk.bf16.mxu0 %vm6802_vm1, %v10927_v15 }
 0x374   : > { %6394 = vmatmul.mubr.msk.bf16.gmra.mxu1 %vm2122_vm5, %v11279_v51 }
 0x375   : > { %6397 = vmatprep.mubr.msk.bf16.mxu1 %vm6802_vm1, %v10927_v15 }
 0x377   : > { %6470 = vmatmul.mubr.msk.bf16.gmra.mxu0 %vm2122_vm5, %v11280_v46 }
 0x378   : > { %6473 = vmatprep.mubr.msk.bf16.mxu0 %vm6802_vm1, %v10927_v15 }
 0x37c   : > { %6398 = vmatmul.mubr.msk.bf16.gmra.mxu1 %vm2122_vm5, %v11283_v39  ;;  %v11297_v39 = vld [vmem:[#allocation83_spill] sm:$0xff] }
 0x37d   : > { %6401 = vmatprep.mubr.msk.bf16.mxu1 %vm6802_vm1, %v10927_v15 }
 0x37f   : > { %v9487_v35 = vpop.f32.mrf.mxu0  ;;  %6474 = vmatmul.mubr.msk.bf16.gmra.mxu0 %vm2122_vm5, %v11284_v61  ;;  %v11298_v61 = vld [vmem:[#allocation84_spill] sm:$0xff] }
 0x380   : > { %6477 = vmatprep.mubr.msk.bf16.mxu0 %vm6802_vm1, %v10927_v15 }
 0x381   : > { %v6295_v36 = vpop.f32.mrf.mxu0 }
 0x382   : > { %v11299_v36 = vpack.c.bf16 %v11297_v39, %v11298_v61 }
 0x383   : > { %v9495_v4 = vpop.f32.mrf.mxu0 }
 0x384   : > { %6402 = vmatmul.mubr.msk.bf16.gmra.mxu1 %vm2122_vm5, %v11287_v56 }
 0x385   : > { %v6296_v24 = vpop.f32.mrf.mxu0  ;;  %6405 = vmatprep.mubr.msk.bf16.mxu1 %vm6802_vm1, %v10927_v15 }
 0x386   : > { %v11301_v24 = vld [vmem:[#allocation85_spill] sm:$0xff] }
 0x387   : > { %v9503_v17 = vpop.f32.mrf.mxu0  ;;  %6478 = vmatmul.mubr.msk.bf16.gmra.mxu0 %vm2122_vm5, %v11288_v3  ;;  %v11302_v3 = vld [vmem:[#allocation86_spill] sm:$0xff] }
 0x388   : > { %6481 = vmatprep.mubr.msk.bf16.mxu0 %vm6802_vm1, %v10927_v15 }
 0x389   : > { %v6299_v27 = vpop.f32.mrf.mxu0 }
 0x38a   : > { %v11303_v27 = vpack.c.bf16 %v11301_v24, %v11302_v3 }
 0x38b   : > { %v9511_v50 = vpop.f32.mrf.mxu0 }
 0x38c   : > { %6406 = vmatmul.mubr.msk.bf16.gmra.mxu1 %vm2122_vm5, %v11291_v53 }
 0x38d   : > { %v6300_v43 = vpop.f32.mrf.mxu0  ;;  %6409 = vmatprep.mubr.msk.bf16.mxu1 %vm6802_vm1, %v10927_v15 }
 0x38e   : > { %v11305_v43 = vld [vmem:[#allocation94_spill] sm:$0xff] }
 0x38f   : > { %v9519_v6 = vpop.f32.mrf.mxu0  ;;  %6482 = vmatmul.mubr.msk.bf16.gmra.mxu0 %vm2122_vm5, %v11292_v52  ;;  %v11306_v52 = vld [vmem:[#allocation93_spill] sm:$0xff] }
 0x390   : > { %6485 = vmatprep.mubr.msk.bf16.mxu0 %vm6802_vm1, %v10927_v15 }
 0x391   : > { %v6303_v57 = vpop.f32.mrf.mxu0 }
 0x392   : > { %v11307_v57 = vpack.c.bf16 %v11305_v43, %v11306_v52 }
 0x393   : > { %v9527_v19 = vpop.f32.mrf.mxu0 }
 0x394   : > { %6410 = vmatmul.mubr.msk.bf16.gmra.mxu1 %vm2122_vm5, %v11295_v38 }
 0x395   : > { %v6304_v51 = vpop.f32.mrf.mxu0  ;;  %6413 = vmatprep.mubr.msk.bf16.mxu1 %vm6802_vm1, %v10927_v15 }
 0x396   : > { %v11309_v51 = vld [vmem:[#allocation96_spill] sm:$0xff] }
 0x397   : > { %v9535_v46 = vpop.f32.mrf.mxu0  ;;  %6486 = vmatmul.mubr.msk.bf16.gmra.mxu0 %vm2122_vm5, %v11296_v45  ;;  %v11310_v45 = vld [vmem:[#allocation95_spill] sm:$0xff] }
 0x398   : > { %6489 = vmatprep.mubr.msk.bf16.mxu0 %vm6802_vm1, %v10927_v15 }
 0x399   : > { %v6307_v1 = vpop.f32.mrf.mxu0 }
 0x39a   : > { %v11311_v1 = vpack.c.bf16 %v11309_v51, %v11310_v45 }
 0x39b   : > { %v9543_v55 = vpop.f32.mrf.mxu0 }
 0x39c   : > { %6414 = vmatmul.mubr.msk.bf16.gmra.mxu1 %vm2122_vm5, %v11299_v36  ;;  %v11313_v36 = vpack.c.bf16 %v9332_v44, %v9329_v18 }
 0x39d   : > { %v6308_v12 = vpop.f32.mrf.mxu0  ;;  %6417 = vmatprep.mubr.msk.bf16.mxu1 %vm6802_vm1, %v10927_v15 }
 0x39f   : > { %v9555_v62 = vpop.f32.mrf.mxu0  ;;  %6490 = vmatmul.mubr.msk.bf16.gmra.mxu0 %vm2122_vm5, %v11300_v48 }
 0x3a0   : > { %6493 = vmatprep.mubr.msk.bf16.mxu0 %vm6802_vm1, %v10927_v15 }
 0x3a1   : > { %v6311_v49 = vpop.f32.mrf.mxu0 }
 0x3a3   : > { %v9563_v56 = vpop.f32.mrf.mxu0 }
 0x3a4   : > { %6418 = vmatmul.mubr.msk.bf16.gmra.mxu1 %vm2122_vm5, %v11303_v27 }
 0x3a5   : > { %v6312_v9 = vpop.f32.mrf.mxu0  ;;  %6421 = vmatprep.mubr.msk.bf16.mxu1 %vm6802_vm1, %v10927_v15 }
 0x3a7   : > { %v9571_v13 = vpop.f32.mrf.mxu0  ;;  %6494 = vmatmul.mubr.msk.bf16.gmra.mxu0 %vm2122_vm5, %v11304_v10 }
 0x3a8   : > { %6497 = vmatprep.mubr.msk.bf16.mxu0 %vm6802_vm1, %v10927_v15 }
 0x3a9   : > { %v6315_v2 = vpop.f32.mrf.mxu0 }
 0x3ab   : > { %v9579_v53 = vpop.f32.mrf.mxu0 }
 0x3ac   : > { %6422 = vmatmul.mubr.msk.bf16.gmra.mxu1 %vm2122_vm5, %v11307_v57 }
 0x3ad   : > { %v6316_v33 = vpop.f32.mrf.mxu0  ;;  %6425 = vmatprep.mubr.msk.bf16.mxu1 %vm6802_vm1, %v10927_v15 }
 0x3af   : > { %v9587_v14 = vpop.f32.mrf.mxu0  ;;  %6498 = vmatmul.mubr.msk.bf16.gmra.mxu0 %vm2122_vm5, %v11308_v31 }
 0x3b0   : > { %6501 = vmatprep.mubr.msk.bf16.mxu0 %vm6802_vm1, %v10927_v15 }
 0x3b1   : > { %v6319_v21 = vpop.f32.mrf.mxu0 }
 0x3b3   : > { %v9595_v38 = vpop.f32.mrf.mxu0 }
 0x3b4   : > { %6426 = vmatmul.mubr.msk.bf16.gmra.mxu1 %vm2122_vm5, %v11311_v1 }
 0x3b5   : > { %v6320_v8 = vpop.f32.mrf.mxu0  ;;  %6429 = vmatprep.mubr.msk.bf16.mxu1 %vm6802_vm1, %v10927_v15 }
 0x3b7   : > { %v9603_v39 = vpop.f32.mrf.mxu0  ;;  %6502 = vmatmul.mubr.msk.bf16.gmra.mxu0 %vm2122_vm5, %v11312_v16 }
 0x3b8   : > { %6505 = vmatprep.mubr.msk.bf16.mxu0 %vm6802_vm1, %v10927_v15 }
 0x3b9   : > { %v6323_v28 = vpop.f32.mrf.mxu0 }
 0x3bb   : > { %v9611_v61 = vpop.f32.mrf.mxu0 }
 0x3bc   : > { %6430 = vmatmul.mubr.msk.bf16.gmra.mxu1 %vm2122_vm5, %v11313_v36 }
 0x3bd   : > { %v6324_v12 = vpop.f32.mrf.mxu0  ;;  %6433 = vmatprep.mubr.msk.bf16.mxu1 %vm6802_vm1, %v10927_v15 }
 0x3bf   : > { %v9622_v59 = vpop.f32.mrf.mxu0  ;;  %6506 = vmatmul.mubr.msk.bf16.gmra.mxu0 %vm2122_vm5, %v3724_v32 }
 0x3c0   : > { %6509 = vmatprep.mubr.msk.bf16.mxu0 %vm6802_vm1, %v10927_v15 }
 0x3c1   : > { %v6327_v18 = vpop.f32.mrf.mxu0 }
 0x3c2   : > { %v6788_v18 = vld [vmem:[%s10666_s9] sm:$0xff]  }
 0x3c3   : > { %v9631_v44 = vpop.f32.mrf.mxu0  ;;  %6596 = vmatpush3.bf16.msra.mxu0 %v6788_v18 }
 0x3c4   : > { %6434 = vmatmul.mubr.msk.bf16.gmra.mxu1 %vm2122_vm5, %v3186_v26 }
 0x3c5   : > { %v6328_v48 = vpop.f32.mrf.mxu0  ;;  %6521 = vmatprep.mubr.msk.bf16.mxu1 %vm6802_vm1, %v10927_v15 }
 0x3c7   : > { %v9639_v63 = vpop.f32.mrf.mxu0  ;;  %6510 = vmatmul.mubr.msk.bf16.gmra.mxu0 %vm2122_vm5, %v3725_v5 }
 0x3c8   : > { %6597 = vmatprep.mubr.msk.bf16.mxu0 %vm6802_vm1, %v10927_v15 }
 0x3c9   : > { %v6331_v34 = vpop.f32.mrf.mxu0 }
 0x3cb   : > { %v9647_v32 = vpop.f32.mrf.mxu0 }
 0x3cd   : > { %v6332_v25 = vpop.f32.mrf.mxu0 }
 0x3cf   : > { %v9649_v54 = vpop.f32.mrf.mxu0 }
 0x3d1   : > { %v6335_v26 = vpop.f32.mrf.mxu0 }
 0x3d3   : > { %v9651_v49 = vpop.f32.mrf.mxu0 }
 0x3d5   : > { %v6336_v24 = vpop.f32.mrf.mxu0 }
 0x3d7   : > { %v9653_v3 = vpop.f32.mrf.mxu0 }
 0x3d9   : > { %v6339_v27 = vpop.f32.mrf.mxu0 }
 0x3db   : > { %v9655_v9 = vpop.f32.mrf.mxu0 }
 0x3dd   : > { %v6340_v47 = vpop.f32.mrf.mxu0 }
 0x3de   : > { %v9688_v47 = vld [vmem:[%s10665_s8] ss:$0 sm:$0xff] }
 0x3df   : > { %v9660_v5 = vpop.f32.mrf.mxu0 }
 0x3e1   : > { %v6343_v10 = vpop.f32.mrf.mxu0 }
 0x3e3   : > { %v9663_v2 = vpop.f32.mrf.mxu0 }
 0x3e5   : > { %v6344_v43 = vpop.f32.mrf.mxu0 }
 0x3e7   : > { %v9665_v52 = vpop.f32.mrf.mxu0 }
 0x3e9   : > { %v6347_v57 = vpop.f32.mrf.mxu0 }
 0x3eb   : > { %v9667_v33 = vpop.f32.mrf.mxu0 }
 0x3ed   : > { %v6348_v31 = vpop.f32.mrf.mxu0 }
 0x3ef   : > { %v9669_v21 = vpop.f32.mrf.mxu0 }
 0x3f1   : > { %v6351_v51 = vpop.f32.mrf.mxu0 }
 0x3f3   : > { %v9671_v45 = vpop.f32.mrf.mxu0 }
 0x3f5   : > { %v6352_v1 = vpop.f32.mrf.mxu0 }
 0x3f7   : > { %v9673_v8 = vpop.f32.mrf.mxu0 }
 0x3f9   : > { %v6355_v16 = vpop.f32.mrf.mxu0 }
 0x3fb   : > { %v9675_v28 = vpop.f32.mrf.mxu0 }
 0x3fd   : > { %v6356_v36 = vpop.f32.mrf.mxu0 }
 0x3ff   : > { %v9677_v12 = vpop.f32.mrf.mxu0 }
 0x401   : > { %v6359_v58 = vpop.f32.mrf.mxu0 }
 0x403   : > { %v9682_v48 = vpop.f32.mrf.mxu0 }
 0x404   : > { %v3574_v34 = vpop.f32.mrf.mxu1 }
 0x405   : > { %v3575_v25 = vadd.f32 %v3574_v34, %v9487_v35  ;;  %v6360_v26 = vpop.f32.mrf.mxu0 }
 0x406   : > { %v6371_v24 = vpop.f32.mrf.mxu1 }
 0x407   : > { %v3844_v27 = vpop.f32.mrf.mxu0 }
 0x408   : > { %v3979_v37 = vadd.f32 %v3844_v27, %v3575_v25  ;;  %v3577_v10 = vpop.f32.mrf.mxu1 }
 0x409   : > { %v3578_v43 = vadd.f32 %v3577_v10, %v9495_v4  ;;  %v6447_v57 = vpop.f32.mrf.mxu0 }
 0x40a   : > { %v4020_v31 = vadd.f32 %v9688_v47, %v3979_v37  ;;  %v6372_v51 = vpop.f32.mrf.mxu1 }
 0x40b   : > { %v3847_v1 = vpop.f32.mrf.mxu0 }
 0x40c   : > { %v3980_v16 = vadd.f32 %v3847_v1, %v3578_v43  ;;  %v3582_v36 = vpop.f32.mrf.mxu1  ;;  %v9692_v35 = vmax.f32 %v4020_v31, 0.0  ;;  %v6783_v43 = vld [vmem:[%s10666_s9 + $0x58] sm:$0xff]  }
 0x40d   : > { %v3583_v58 = vadd.f32 %v3582_v36, %v9503_v17  ;;  %v6448_v18 = vpop.f32.mrf.mxu0 }
 0x40e   : > { %v4021_v34 = vadd.f32 %v9688_v47, %v3980_v16  ;;  %v6375_v26 = vpop.f32.mrf.mxu1  ;;  %v10881_v4 = vrot.slane %v9692_v35, 7  ;;  %v10882_v36 = vrot.slane %v9692_v35, 1 }
 0x40f   : > { %v3852_v24 = vpop.f32.mrf.mxu0 }
 0x410   : > { %v4055_v25 = vmax.f32 %v4021_v34, 0.0  ;;  %v3981_v27 = vadd.f32 %v3852_v24, %v3583_v58  ;;  %v3585_v30 = vpop.f32.mrf.mxu1  ;;  %v6785_v24 = vld [vmem:[%s10666_s9 + $0x50] sm:$0xff]  }
 0x411   : > { %v3586_v37 = vadd.f32 %v3585_v30, %v9511_v50  ;;  %v6451_v10 = vpop.f32.mrf.mxu0 }
 0x412   : > { %v4089_v57 = vrot.slane %v4055_v25, 7  ;;  %v4191_v31 = vrot.slane %v4055_v25, 1  ;;  %v4317_v17 = vpack.c.bf16 %v4055_v25, %v9692_v35  ;;  %v4022_v51 = vadd.f32 %v9688_v47, %v3981_v27  ;;  %v6376_v1 = vpop.f32.mrf.mxu1 }
 0x413   : > { %v3855_v16 = vpop.f32.mrf.mxu0 }
 0x414   : > { %v9708_v30 = vsel %vm529_vm4, %v10881_v4, %v4089_v57  ;;  %v4056_v50 = vmax.f32 %v4022_v51, 0.0  ;;  %v3982_v58 = vadd.f32 %v3855_v16, %v3586_v37  ;;  %v3590_v18 = vpop.f32.mrf.mxu1  ;;  %6522 = vmatmul.mubr.msk.bf16.vlgmr.msra.gmra.mxu1 %vm2122_vm5, %v4317_v17  ;;  %v4256_v25 = vsel %vm802_vm3, %v10882_v36, %v4191_v31  ;;  %v11316_v36 = vld [vmem:[#allocation12_spill] sm:$0xff] }
 0x415   : > { %v3591_v34 = vadd.f32 %v3590_v18, %v9519_v6  ;;  %6666 = vmatpush3.bf16.msra.mxu1 %v6783_v43  ;;  %v6452_v26 = vpop.f32.mrf.mxu0  ;;  %6525 = vmatprep.mubr.msk.bf16.mxu1 %vm6802_vm1, %v10927_v15 }
 0x416   : > { %v4090_v27 = vrot.slane %v4056_v50, 7  ;;  %v4192_v37 = vrot.slane %v4056_v50, 1  ;;  %v4023_v10 = vadd.f32 %v9688_v47, %v3982_v58  ;;  %v6379_v17 = vpop.f32.mrf.mxu1  ;;  %6667 = vmatprep.subr.bf16.mxu1 %v10927_v15  ;;  %v11314_v26 = vld [vmem:[#allocation10_spill] sm:$0xff] }
 0x417   : > { %v3860_v6 = vpop.f32.mrf.mxu0  ;;  %v9728_v4 = vmul.f32 %v4256_v25, %v11314_v26 }
 0x418   : > { %v4153_v43 = vsel %vm529_vm4, %v4089_v57, %v4090_v27  ;;  %v4255_v51 = vsel %vm802_vm3, %v4191_v31, %v4192_v37  ;;  %v4057_v1 = vmax.f32 %v4023_v10, 0.0  ;;  %v3983_v16 = vadd.f32 %v3860_v6, %v3591_v34  ;;  %v3593_v18 = vpop.f32.mrf.mxu1  ;;  %v6787_v57 = vld [vmem:[%s10666_s9 + $0x48] sm:$0xff]  }
 0x419   : > { %11315 = vst [vmem:[#allocation62_spill] sm:$0xff] %v9728_v4  ;;  %v9731_v42 = vmul.f32 %v4255_v51, %v11316_v36  ;;  %v3594_v58 = vadd.f32 %v3593_v18, %v9527_v19  ;;  %v6455_v17 = vpop.f32.mrf.mxu0  ;;  %6668 = vmatpush3.bf16.msra.mxu1 %v6785_v24 }
 0x41a   : > { %v4091_v0 = vrot.slane %v4057_v1, 7  ;;  %v4193_v60 = vrot.slane %v4057_v1, 1  ;;  %v4318_v31 = vpack.c.bf16 %v4057_v1, %v4056_v50  ;;  %v4024_v34 = vadd.f32 %v9688_v47, %v3983_v16  ;;  %v6380_v10 = vpop.f32.mrf.mxu1  ;;  %6669 = vmatprep.subr.bf16.mxu1 %v10927_v15  ;;  %v11318_v50 = vld [vmem:[#allocation15_spill] sm:$0xff]  ;;  %v11320_v16 = vld [vmem:[#allocation14_spill] sm:$0xff] }
 0x41b   : > { %11317 = vst [vmem:[#allocation61_spill] sm:$0xff] %v9731_v42  ;;  %v3863_v25 = vpop.f32.mrf.mxu0  ;;  %v9747_v1 = vmul.f32 %v4153_v43, %v11318_v50 }
 0x41c   : > { %v4152_v19 = vsel %vm529_vm4, %v4090_v27, %v4091_v0  ;;  %v4254_v24 = vsel %vm802_vm3, %v4192_v37, %v4193_v60  ;;  %v4058_v6 = vmax.f32 %v4024_v34, 0.0  ;;  %v3984_v51 = vadd.f32 %v3863_v25, %v3594_v58  ;;  %v3598_v18 = vpop.f32.mrf.mxu1  ;;  %6526 = vmatmul.mubr.msk.bf16.gmra.mxu1 %vm2122_vm5, %v4318_v31  ;;  %v6789_v27 = vld [vmem:[%s10666_s9 + $0x40] sm:$0xff]  }
 0x41d   : > { %11319 = vst [vmem:[#allocation64_spill] sm:$0xff] %v9747_v1  ;;  %v9750_v26 = vmul.f32 %v4152_v19, %v11320_v16  ;;  %v3599_v17 = vadd.f32 %v3598_v18, %v9535_v46  ;;  %v6456_v10 = vpop.f32.mrf.mxu0  ;;  %6529 = vmatprep.mubr.msk.bf16.mxu1 %vm6802_vm1, %v10927_v15  ;;  %6670 = vmatpush3.bf16.msra.mxu1 %v6787_v57  ;;  %v11322_v16 = vld [vmem:[#allocation17_spill] sm:$0xff] }
 0x41e   : > { %v4092_v37 = vrot.slane %v4058_v6, 7  ;;  %v4194_v58 = vrot.slane %v4058_v6, 1  ;;  %v4025_v31 = vadd.f32 %v9688_v47, %v3984_v51  ;;  %v6383_v43 = vpop.f32.mrf.mxu1  ;;  %6671 = vmatprep.subr.bf16.mxu1 %v10927_v15  ;;  %v9767_v10 = vmul.f32 %v4254_v24, %v11322_v16  ;;  %v11323_v51 = vld [vmem:[#allocation16_spill] sm:$0xff] }
 0x41f   : > { %11321 = vst [vmem:[#allocation65_spill] sm:$0xff] %v9750_v26  ;;  %v3868_v34 = vpop.f32.mrf.mxu0 }
 0x420   : > { %v4151_v25 = vsel %vm529_vm4, %v4091_v0, %v4092_v37  ;;  %v4253_v57 = vsel %vm802_vm3, %v4193_v60, %v4194_v58  ;;  %v4059_v19 = vmax.f32 %v4025_v31, 0.0  ;;  %v3985_v18 = vadd.f32 %v3868_v34, %v3599_v17  ;;  %v3601_v50 = vpop.f32.mrf.mxu1 }
 0x421   : > { %v9770_v43 = vmul.f32 %v4253_v57, %v11323_v51  ;;  %v3602_v36 = vadd.f32 %v3601_v50, %v9543_v55  ;;  %v6459_v4 = vpop.f32.mrf.mxu0  ;;  %6672 = vmatpush3.bf16.msra.mxu1 %v6789_v27  ;;  %v11324_v27 = vld [vmem:[#allocation19_spill] sm:$0xff]  ;;  %v11326_v57 = vld [vmem:[#allocation18_spill] sm:$0xff] }
 0x422   : > { %v4093_v46 = vrot.slane %v4059_v19, 7  ;;  %v4195_v1 = vrot.slane %v4059_v19, 1  ;;  %v4319_v26 = vpack.c.bf16 %v4059_v19, %v4058_v6  ;;  %v4026_v0 = vadd.f32 %v9688_v47, %v3985_v18  ;;  %v6384_v42 = vpop.f32.mrf.mxu1 }
 0x423   : > { %v3871_v60 = vpop.f32.mrf.mxu0  ;;  %v9782_v6 = vmul.f32 %v4151_v25, %v11324_v27  ;;  %v11329_v27 = vld [vmem:[#allocation20_spill] sm:$0xff] }
 0x424   : > { %v4150_v24 = vsel %vm529_vm4, %v4092_v37, %v4093_v46  ;;  %v4252_v31 = vsel %vm802_vm3, %v4194_v58, %v4195_v1  ;;  %v4060_v34 = vmax.f32 %v4026_v0, 0.0  ;;  %v3986_v55 = vadd.f32 %v3871_v60, %v3602_v36  ;;  %v3606_v4 = vpop.f32.mrf.mxu1  ;;  %6530 = vmatmul.mubr.msk.bf16.gmra.mxu1 %vm2122_vm5, %v4319_v26 }
 0x425   : > { %11325 = vst [vmem:[#allocation13_spill] sm:$0xff] %v9782_v6  ;;  %v9785_v42 = vmul.f32 %v4150_v24, %v11326_v57  ;;  %v3607_v19 = vadd.f32 %v3606_v4, %v9555_v62  ;;  %v6460_v18 = vpop.f32.mrf.mxu0  ;;  %6533 = vmatprep.mubr.msk.bf16.mxu1 %vm6802_vm1, %v10927_v15  ;;  %v11328_v24 = vld [vmem:[#allocation21_spill] sm:$0xff] }
 0x426   : > { %v4094_v37 = vrot.slane %v4060_v34, 7  ;;  %v4196_v50 = vrot.slane %v4060_v34, 1  ;;  %v4027_v58 = vadd.f32 %v9688_v47, %v3986_v55  ;;  %v6387_v36 = vpop.f32.mrf.mxu1  ;;  %v9798_v4 = vmul.f32 %v4252_v31, %v11328_v24 }
 0x427   : > { %11327 = vst [vmem:[#allocation68_spill] sm:$0xff] %v9785_v42  ;;  %v3876_v16 = vpop.f32.mrf.mxu0 }
 0x428   : > { %v4149_v25 = vsel %vm529_vm4, %v4093_v46, %v4094_v37  ;;  %v4251_v51 = vsel %vm802_vm3, %v4195_v1, %v4196_v50  ;;  %v4061_v62 = vmax.f32 %v4027_v58, 0.0  ;;  %v3987_v0 = vadd.f32 %v3876_v16, %v3607_v19  ;;  %v3609_v60 = vpop.f32.mrf.mxu1 }
 0x429   : > { %v9801_v57 = vmul.f32 %v4251_v51, %v11329_v27  ;;  %v3610_v55 = vadd.f32 %v3609_v60, %v9563_v56  ;;  %v6463_v18 = vpop.f32.mrf.mxu0  ;;  %v11330_v51 = vld [vmem:[#allocation23_spill] sm:$0xff] }
 0x42a   : > { %v4095_v36 = vrot.slane %v4061_v62, 7  ;;  %v4197_v26 = vrot.slane %v4061_v62, 1  ;;  %v4320_v17 = vpack.c.bf16 %v4061_v62, %v4060_v34  ;;  %v4028_v46 = vadd.f32 %v9688_v47, %v3987_v0  ;;  %v6388_v6 = vpop.f32.mrf.mxu1  ;;  %v11332_v62 = vld [vmem:[#allocation22_spill] sm:$0xff] }
 0x42b   : > { %v3879_v42 = vpop.f32.mrf.mxu0  ;;  %v9813_v34 = vmul.f32 %v4149_v25, %v11330_v51  ;;  %v11335_v51 = vld [vmem:[#allocation24_spill] sm:$0xff] }
 0x42c   : > { %v4148_v31 = vsel %vm529_vm4, %v4094_v37, %v4095_v36  ;;  %v4250_v19 = vsel %vm802_vm3, %v4196_v50, %v4197_v26  ;;  %v4062_v58 = vmax.f32 %v4028_v46, 0.0  ;;  %v3988_v16 = vadd.f32 %v3879_v42, %v3610_v55  ;;  %v3614_v56 = vpop.f32.mrf.mxu1  ;;  %6534 = vmatmul.mubr.msk.bf16.gmra.mxu1 %vm2122_vm5, %v4320_v17 }
 0x42d   : > { %11331 = vst [vmem:[#allocation88_spill] sm:$0xff] %v9813_v34  ;;  %v9816_v6 = vmul.f32 %v4148_v31, %v11332_v62  ;;  %v3615_v0 = vadd.f32 %v3614_v56, %v9571_v13  ;;  %v6464_v60 = vpop.f32.mrf.mxu0  ;;  %6537 = vmatprep.mubr.msk.bf16.mxu1 %vm6802_vm1, %v10927_v15  ;;  %v11334_v31 = vld [vmem:[#allocation25_spill] sm:$0xff] }
 0x42e   : > { %v4096_v37 = vrot.slane %v4062_v58, 7  ;;  %v4198_v24 = vrot.slane %v4062_v58, 1  ;;  %v4029_v50 = vadd.f32 %v9688_v47, %v3988_v16  ;;  %v6391_v42 = vpop.f32.mrf.mxu1  ;;  %v9829_v56 = vmul.f32 %v4250_v19, %v11334_v31 }
 0x42f   : > { %11333 = vst [vmem:[#allocation66_spill] sm:$0xff] %v9816_v6  ;;  %v3884_v27 = vpop.f32.mrf.mxu0 }
 0x430   : > { %v4147_v25 = vsel %vm529_vm4, %v4095_v36, %v4096_v37  ;;  %v4249_v55 = vsel %vm802_vm3, %v4197_v26, %v4198_v24  ;;  %v4063_v13 = vmax.f32 %v4029_v50, 0.0  ;;  %v3989_v18 = vadd.f32 %v3884_v27, %v3615_v0  ;;  %v3617_v46 = vpop.f32.mrf.mxu1 }
 0x431   : > { %v9832_v62 = vmul.f32 %v4249_v55, %v11335_v51  ;;  %v3618_v16 = vadd.f32 %v3617_v46, %v9579_v53  ;;  %v6467_v60 = vpop.f32.mrf.mxu0  ;;  %v11336_v55 = vld [vmem:[#allocation27_spill] sm:$0xff] }
 0x432   : > { %v4097_v42 = vrot.slane %v4063_v13, 7  ;;  %v4199_v17 = vrot.slane %v4063_v13, 1  ;;  %v4321_v1 = vpack.c.bf16 %v4063_v13, %v4062_v58  ;;  %v4030_v36 = vadd.f32 %v9688_v47, %v3989_v18  ;;  %v6392_v34 = vpop.f32.mrf.mxu1  ;;  %v11338_v13 = vld [vmem:[#allocation26_spill] sm:$0xff] }
 0x433   : > { %v3887_v6 = vpop.f32.mrf.mxu0  ;;  %v9844_v58 = vmul.f32 %v4147_v25, %v11336_v55  ;;  %v11341_v55 = vld [vmem:[#allocation28_spill] sm:$0xff] }
 0x434   : > { %v4146_v19 = vsel %vm529_vm4, %v4096_v37, %v4097_v42  ;;  %v4248_v0 = vsel %vm802_vm3, %v4198_v24, %v4199_v17  ;;  %v4064_v50 = vmax.f32 %v4030_v36, 0.0  ;;  %v3990_v27 = vadd.f32 %v3887_v6, %v3618_v16  ;;  %v3622_v53 = vpop.f32.mrf.mxu1  ;;  %6538 = vmatmul.mubr.msk.bf16.gmra.mxu1 %vm2122_vm5, %v4321_v1 }
 0x435   : > { %11337 = vst [vmem:[#allocation70_spill] sm:$0xff] %v9844_v58  ;;  %v9847_v34 = vmul.f32 %v4146_v19, %v11338_v13  ;;  %v3623_v18 = vadd.f32 %v3622_v53, %v9587_v14  ;;  %v6468_v46 = vpop.f32.mrf.mxu0  ;;  %6541 = vmatprep.mubr.msk.bf16.mxu1 %vm6802_vm1, %v10927_v15  ;;  %v11340_v19 = vld [vmem:[#allocation29_spill] sm:$0xff] }
 0x436   : > { %v4098_v37 = vrot.slane %v4064_v50, 7  ;;  %v4200_v31 = vrot.slane %v4064_v50, 1  ;;  %v4031_v24 = vadd.f32 %v9688_v47, %v3990_v27  ;;  %v6395_v6 = vpop.f32.mrf.mxu1  ;;  %v9860_v53 = vmul.f32 %v4248_v0, %v11340_v19 }
 0x437   : > { %11339 = vst [vmem:[#allocation87_spill] sm:$0xff] %v9847_v34  ;;  %v3892_v51 = vpop.f32.mrf.mxu0 }
 0x438   : > { %v4145_v25 = vsel %vm529_vm4, %v4097_v42, %v4098_v37  ;;  %v4247_v16 = vsel %vm802_vm3, %v4199_v17, %v4200_v31  ;;  %v4065_v14 = vmax.f32 %v4031_v24, 0.0  ;;  %v3991_v60 = vadd.f32 %v3892_v51, %v3623_v18  ;;  %v3625_v36 = vpop.f32.mrf.mxu1 }
 0x439   : > { %v9863_v13 = vmul.f32 %v4247_v16, %v11341_v55  ;;  %v3626_v27 = vadd.f32 %v3625_v36, %v9595_v38  ;;  %v6471_v46 = vpop.f32.mrf.mxu0  ;;  %v11342_v16 = vld [vmem:[#allocation31_spill] sm:$0xff] }
 0x43a   : > { %v4099_v6 = vrot.slane %v4065_v14, 7  ;;  %v4201_v1 = vrot.slane %v4065_v14, 1  ;;  %v4322_v26 = vpack.c.bf16 %v4065_v14, %v4064_v50  ;;  %v4032_v42 = vadd.f32 %v9688_v47, %v3991_v60  ;;  %v6396_v58 = vpop.f32.mrf.mxu1  ;;  %v11344_v14 = vld [vmem:[#allocation30_spill] sm:$0xff] }
 0x43b   : > { %v3895_v34 = vpop.f32.mrf.mxu0  ;;  %v9875_v50 = vmul.f32 %v4145_v25, %v11342_v16  ;;  %v11347_v16 = vld [vmem:[#allocation32_spill] sm:$0xff] }
 0x43c   : > { %v4144_v0 = vsel %vm529_vm4, %v4098_v37, %v4099_v6  ;;  %v4246_v18 = vsel %vm802_vm3, %v4200_v31, %v4201_v1  ;;  %v4066_v24 = vmax.f32 %v4032_v42, 0.0  ;;  %v3992_v51 = vadd.f32 %v3895_v34, %v3626_v27  ;;  %v3630_v38 = vpop.f32.mrf.mxu1  ;;  %6542 = vmatmul.mubr.msk.bf16.gmra.mxu1 %vm2122_vm5, %v4322_v26 }
 0x43d   : > { %11343 = vst [vmem:[#allocation71_spill] sm:$0xff] %v9875_v50  ;;  %v9878_v58 = vmul.f32 %v4144_v0, %v11344_v14  ;;  %v3631_v60 = vadd.f32 %v3630_v38, %v9603_v39  ;;  %v6472_v36 = vpop.f32.mrf.mxu0  ;;  %6545 = vmatprep.mubr.msk.bf16.mxu1 %vm6802_vm1, %v10927_v15  ;;  %v11346_v0 = vld [vmem:[#allocation33_spill] sm:$0xff] }
 0x43e   : > { %v4100_v37 = vrot.slane %v4066_v24, 7  ;;  %v4202_v19 = vrot.slane %v4066_v24, 1  ;;  %v4033_v31 = vadd.f32 %v9688_v47, %v3992_v51  ;;  %v6399_v34 = vpop.f32.mrf.mxu1  ;;  %v9891_v38 = vmul.f32 %v4246_v18, %v11346_v0 }
 0x43f   : > { %11345 = vst [vmem:[#allocation72_spill] sm:$0xff] %v9878_v58  ;;  %v3900_v55 = vpop.f32.mrf.mxu0 }
 0x440   : > { %v4143_v25 = vsel %vm529_vm4, %v4099_v6, %v4100_v37  ;;  %v4245_v27 = vsel %vm802_vm3, %v4201_v1, %v4202_v19  ;;  %v4067_v39 = vmax.f32 %v4033_v31, 0.0  ;;  %v3993_v46 = vadd.f32 %v3900_v55, %v3631_v60  ;;  %v3633_v42 = vpop.f32.mrf.mxu1 }
 0x441   : > { %v9894_v14 = vmul.f32 %v4245_v27, %v11347_v16  ;;  %v3634_v51 = vadd.f32 %v3633_v42, %v9611_v61  ;;  %v6475_v36 = vpop.f32.mrf.mxu0  ;;  %v11348_v27 = vld [vmem:[#allocation35_spill] sm:$0xff] }
 0x442   : > { %v4101_v34 = vrot.slane %v4067_v39, 7  ;;  %v4203_v26 = vrot.slane %v4067_v39, 1  ;;  %v4323_v17 = vpack.c.bf16 %v4067_v39, %v4066_v24  ;;  %v4034_v6 = vadd.f32 %v9688_v47, %v3993_v46  ;;  %v6400_v50 = vpop.f32.mrf.mxu1  ;;  %v11350_v39 = vld [vmem:[#allocation34_spill] sm:$0xff] }
 0x443   : > { %v3903_v58 = vpop.f32.mrf.mxu0  ;;  %v9906_v24 = vmul.f32 %v4143_v25, %v11348_v27  ;;  %v11353_v27 = vld [vmem:[#allocation36_spill] sm:$0xff] }
 0x444   : > { %v4142_v18 = vsel %vm529_vm4, %v4100_v37, %v4101_v34  ;;  %v4244_v60 = vsel %vm802_vm3, %v4202_v19, %v4203_v26  ;;  %v4068_v31 = vmax.f32 %v4034_v6, 0.0  ;;  %v3994_v55 = vadd.f32 %v3903_v58, %v3634_v51  ;;  %v3638_v61 = vpop.f32.mrf.mxu1  ;;  %6546 = vmatmul.mubr.msk.bf16.gmra.mxu1 %vm2122_vm5, %v4323_v17 }
 0x445   : > { %11349 = vst [vmem:[#allocation73_spill] sm:$0xff] %v9906_v24  ;;  %v9909_v50 = vmul.f32 %v4142_v18, %v11350_v39  ;;  %v3639_v46 = vadd.f32 %v3638_v61, %v9622_v59  ;;  %v6476_v42 = vpop.f32.mrf.mxu0  ;;  %6549 = vmatprep.mubr.msk.bf16.mxu1 %vm6802_vm1, %v10927_v15  ;;  %v11352_v18 = vld [vmem:[#allocation37_spill] sm:$0xff] }
 0x446   : > { %v4102_v37 = vrot.slane %v4068_v31, 7  ;;  %v4204_v0 = vrot.slane %v4068_v31, 1  ;;  %v4035_v19 = vadd.f32 %v9688_v47, %v3994_v55  ;;  %v6403_v58 = vpop.f32.mrf.mxu1  ;;  %v9922_v61 = vmul.f32 %v4244_v60, %v11352_v18 }
 0x447   : > { %11351 = vst [vmem:[#allocation74_spill] sm:$0xff] %v9909_v50  ;;  %v3908_v16 = vpop.f32.mrf.mxu0 }
 0x448   : > { %v4141_v25 = vsel %vm529_vm4, %v4101_v34, %v4102_v37  ;;  %v4243_v51 = vsel %vm802_vm3, %v4203_v26, %v4204_v0  ;;  %v4069_v59 = vmax.f32 %v4035_v19, 0.0  ;;  %v3995_v36 = vadd.f32 %v3908_v16, %v3639_v46  ;;  %v3641_v6 = vpop.f32.mrf.mxu1 }
 0x449   : > { %v9925_v39 = vmul.f32 %v4243_v51, %v11353_v27  ;;  %v3642_v55 = vadd.f32 %v3641_v6, %v9631_v44  ;;  %v6479_v42 = vpop.f32.mrf.mxu0  ;;  %v11354_v51 = vld [vmem:[#allocation39_spill] sm:$0xff] }
 0x44a   : > { %v4103_v58 = vrot.slane %v4069_v59, 7  ;;  %v4205_v17 = vrot.slane %v4069_v59, 1  ;;  %v4324_v1 = vpack.c.bf16 %v4069_v59, %v4068_v31  ;;  %v4036_v34 = vadd.f32 %v9688_v47, %v3995_v36  ;;  %v6404_v24 = vpop.f32.mrf.mxu1  ;;  %v11356_v59 = vld [vmem:[#allocation38_spill] sm:$0xff] }
 0x44b   : > { %v3911_v50 = vpop.f32.mrf.mxu0  ;;  %v9937_v31 = vmul.f32 %v4141_v25, %v11354_v51  ;;  %v11359_v51 = vld [vmem:[#allocation40_spill] sm:$0xff] }
 0x44c   : > { %v4140_v60 = vsel %vm529_vm4, %v4102_v37, %v4103_v58  ;;  %v4242_v46 = vsel %vm802_vm3, %v4204_v0, %v4205_v17  ;;  %v4070_v19 = vmax.f32 %v4036_v34, 0.0  ;;  %v3996_v16 = vadd.f32 %v3911_v50, %v3642_v55  ;;  %v3646_v44 = vpop.f32.mrf.mxu1  ;;  %6550 = vmatmul.mubr.msk.bf16.gmra.mxu1 %vm2122_vm5, %v4324_v1 }
 0x44d   : > { %11355 = vst [vmem:[#allocation75_spill] sm:$0xff] %v9937_v31  ;;  %v9940_v24 = vmul.f32 %v4140_v60, %v11356_v59  ;;  %v3647_v36 = vadd.f32 %v3646_v44, %v9639_v63  ;;  %v6480_v6 = vpop.f32.mrf.mxu0  ;;  %6553 = vmatprep.mubr.msk.bf16.mxu1 %vm6802_vm1, %v10927_v15  ;;  %v11358_v60 = vld [vmem:[#allocation41_spill] sm:$0xff] }
 0x44e   : > { %v4104_v37 = vrot.slane %v4070_v19, 7  ;;  %v4206_v18 = vrot.slane %v4070_v19, 1  ;;  %v4037_v0 = vadd.f32 %v9688_v47, %v3996_v16  ;;  %v6407_v50 = vpop.f32.mrf.mxu1  ;;  %v9953_v44 = vmul.f32 %v4242_v46, %v11358_v60 }
 0x44f   : > { %11357 = vst [vmem:[#allocation76_spill] sm:$0xff] %v9940_v24  ;;  %v3916_v27 = vpop.f32.mrf.mxu0 }
 0x450   : > { %v4139_v25 = vsel %vm529_vm4, %v4103_v58, %v4104_v37  ;;  %v4241_v55 = vsel %vm802_vm3, %v4205_v17, %v4206_v18  ;;  %v4071_v63 = vmax.f32 %v4037_v0, 0.0  ;;  %v3997_v42 = vadd.f32 %v3916_v27, %v3647_v36  ;;  %v3649_v34 = vpop.f32.mrf.mxu1 }
 0x451   : > { %v9956_v59 = vmul.f32 %v4241_v55, %v11359_v51  ;;  %v3650_v16 = vadd.f32 %v3649_v34, %v9647_v32  ;;  %v6483_v6 = vpop.f32.mrf.mxu0  ;;  %v11360_v55 = vld [vmem:[#allocation43_spill] sm:$0xff] }
 0x452   : > { %v4105_v50 = vrot.slane %v4071_v63, 7  ;;  %v4207_v1 = vrot.slane %v4071_v63, 1  ;;  %v4325_v26 = vpack.c.bf16 %v4071_v63, %v4070_v19  ;;  %v4038_v58 = vadd.f32 %v9688_v47, %v3997_v42  ;;  %v6408_v31 = vpop.f32.mrf.mxu1  ;;  %v11362_v63 = vld [vmem:[#allocation42_spill] sm:$0xff] }
 0x453   : > { %v3919_v24 = vpop.f32.mrf.mxu0  ;;  %v9968_v19 = vmul.f32 %v4139_v25, %v11360_v55  ;;  %v11365_v55 = vld [vmem:[#allocation44_spill] sm:$0xff] }
 0x454   : > { %v4138_v46 = vsel %vm529_vm4, %v4104_v37, %v4105_v50  ;;  %v4240_v36 = vsel %vm802_vm3, %v4206_v18, %v4207_v1  ;;  %v4072_v0 = vmax.f32 %v4038_v58, 0.0  ;;  %v3998_v27 = vadd.f32 %v3919_v24, %v3650_v16  ;;  %v3654_v32 = vpop.f32.mrf.mxu1  ;;  %6554 = vmatmul.mubr.msk.bf16.gmra.mxu1 %vm2122_vm5, %v4325_v26 }
 0x455   : > { %11361 = vst [vmem:[#allocation77_spill] sm:$0xff] %v9968_v19  ;;  %v9971_v31 = vmul.f32 %v4138_v46, %v11362_v63  ;;  %v3655_v42 = vadd.f32 %v3654_v32, %v9649_v54  ;;  %v6484_v34 = vpop.f32.mrf.mxu0  ;;  %6557 = vmatprep.mubr.msk.bf16.mxu1 %vm6802_vm1, %v10927_v15  ;;  %v11364_v46 = vld [vmem:[#allocation45_spill] sm:$0xff] }
 0x456   : > { %v4106_v37 = vrot.slane %v4072_v0, 7  ;;  %v4208_v60 = vrot.slane %v4072_v0, 1  ;;  %v4039_v18 = vadd.f32 %v9688_v47, %v3998_v27  ;;  %v6411_v24 = vpop.f32.mrf.mxu1  ;;  %v9984_v32 = vmul.f32 %v4240_v36, %v11364_v46 }
 0x457   : > { %11363 = vst [vmem:[#allocation78_spill] sm:$0xff] %v9971_v31  ;;  %v3924_v51 = vpop.f32.mrf.mxu0 }
 0x458   : > { %v4137_v25 = vsel %vm529_vm4, %v4105_v50, %v4106_v37  ;;  %v4239_v16 = vsel %vm802_vm3, %v4207_v1, %v4208_v60  ;;  %v4073_v54 = vmax.f32 %v4039_v18, 0.0  ;;  %v3999_v6 = vadd.f32 %v3924_v51, %v3655_v42  ;;  %v3657_v58 = vpop.f32.mrf.mxu1 }
 0x459   : > { %v9987_v63 = vmul.f32 %v4239_v16, %v11365_v55  ;;  %v3658_v27 = vadd.f32 %v3657_v58, %v9651_v49  ;;  %v6487_v34 = vpop.f32.mrf.mxu0  ;;  %v11366_v16 = vld [vmem:[#allocation47_spill] sm:$0xff] }
 0x45a   : > { %v4107_v24 = vrot.slane %v4073_v54, 7  ;;  %v4209_v26 = vrot.slane %v4073_v54, 1  ;;  %v4326_v17 = vpack.c.bf16 %v4073_v54, %v4072_v0  ;;  %v4040_v50 = vadd.f32 %v9688_v47, %v3999_v6  ;;  %v6412_v19 = vpop.f32.mrf.mxu1  ;;  %v11368_v54 = vld [vmem:[#allocation46_spill] sm:$0xff] }
 0x45b   : > { %v3927_v31 = vpop.f32.mrf.mxu0  ;;  %v9999_v0 = vmul.f32 %v4137_v25, %v11366_v16  ;;  %v11371_v16 = vld [vmem:[#allocation48_spill] sm:$0xff] }
 0x45c   : > { %v4136_v36 = vsel %vm529_vm4, %v4106_v37, %v4107_v24  ;;  %v4238_v42 = vsel %vm802_vm3, %v4208_v60, %v4209_v26  ;;  %v4074_v18 = vmax.f32 %v4040_v50, 0.0  ;;  %v4000_v51 = vadd.f32 %v3927_v31, %v3658_v27  ;;  %v3662_v49 = vpop.f32.mrf.mxu1  ;;  %6558 = vmatmul.mubr.msk.bf16.gmra.mxu1 %vm2122_vm5, %v4326_v17 }
 0x45d   : > { %11367 = vst [vmem:[#allocation79_spill] sm:$0xff] %v9999_v0  ;;  %v10002_v19 = vmul.f32 %v4136_v36, %v11368_v54  ;;  %v3663_v6 = vadd.f32 %v3662_v49, %v9653_v3  ;;  %v6488_v58 = vpop.f32.mrf.mxu0  ;;  %6561 = vmatprep.mubr.msk.bf16.mxu1 %vm6802_vm1, %v10927_v15  ;;  %v11370_v36 = vld [vmem:[#allocation49_spill] sm:$0xff] }
 0x45e   : > { %v4108_v37 = vrot.slane %v4074_v18, 7  ;;  %v4210_v46 = vrot.slane %v4074_v18, 1  ;;  %v4041_v60 = vadd.f32 %v9688_v47, %v4000_v51  ;;  %v6415_v31 = vpop.f32.mrf.mxu1  ;;  %v10015_v49 = vmul.f32 %v4238_v42, %v11370_v36 }
 0x45f   : > { %11369 = vst [vmem:[#allocation89_spill] sm:$0xff] %v10002_v19  ;;  %v3932_v55 = vpop.f32.mrf.mxu0 }
 0x460   : > { %v4135_v25 = vsel %vm529_vm4, %v4107_v24, %v4108_v37  ;;  %v4237_v27 = vsel %vm802_vm3, %v4209_v26, %v4210_v46  ;;  %v4075_v3 = vmax.f32 %v4041_v60, 0.0  ;;  %v4001_v34 = vadd.f32 %v3932_v55, %v3663_v6  ;;  %v3665_v50 = vpop.f32.mrf.mxu1 }
 0x461   : > { %v10018_v54 = vmul.f32 %v4237_v27, %v11371_v16  ;;  %v3666_v51 = vadd.f32 %v3665_v50, %v9655_v9  ;;  %v6491_v58 = vpop.f32.mrf.mxu0  ;;  %v11372_v27 = vld [vmem:[#allocation51_spill] sm:$0xff] }
 0x462   : > { %v4109_v31 = vrot.slane %v4075_v3, 7  ;;  %v4211_v17 = vrot.slane %v4075_v3, 1  ;;  %v4327_v1 = vpack.c.bf16 %v4075_v3, %v4074_v18  ;;  %v4042_v24 = vadd.f32 %v9688_v47, %v4001_v34  ;;  %v6416_v0 = vpop.f32.mrf.mxu1  ;;  %v11374_v3 = vld [vmem:[#allocation50_spill] sm:$0xff] }
 0x463   : > { %v3935_v19 = vpop.f32.mrf.mxu0  ;;  %v10030_v18 = vmul.f32 %v4135_v25, %v11372_v27  ;;  %v11377_v27 = vld [vmem:[#allocation52_spill] sm:$0xff] }
 0x464   : > { %v4134_v42 = vsel %vm529_vm4, %v4108_v37, %v4109_v31  ;;  %v4236_v6 = vsel %vm802_vm3, %v4210_v46, %v4211_v17  ;;  %v4076_v60 = vmax.f32 %v4042_v24, 0.0  ;;  %v4002_v55 = vadd.f32 %v3935_v19, %v3666_v51  ;;  %v3670_v9 = vpop.f32.mrf.mxu1  ;;  %6562 = vmatmul.mubr.msk.bf16.gmra.mxu1 %vm2122_vm5, %v4327_v1 }
 0x465   : > { %11373 = vst [vmem:[#allocation80_spill] sm:$0xff] %v10030_v18  ;;  %v10033_v0 = vmul.f32 %v4134_v42, %v11374_v3  ;;  %v3671_v34 = vadd.f32 %v3670_v9, %v9660_v5  ;;  %v6492_v50 = vpop.f32.mrf.mxu0  ;;  %6565 = vmatprep.mubr.msk.bf16.mxu1 %vm6802_vm1, %v10927_v15  ;;  %v11376_v42 = vld [vmem:[#allocation53_spill] sm:$0xff] }
 0x466   : > { %v4110_v37 = vrot.slane %v4076_v60, 7  ;;  %v4212_v36 = vrot.slane %v4076_v60, 1  ;;  %v4043_v46 = vadd.f32 %v9688_v47, %v4002_v55  ;;  %v6419_v19 = vpop.f32.mrf.mxu1  ;;  %v10046_v9 = vmul.f32 %v4236_v6, %v11376_v42 }
 0x467   : > { %11375 = vst [vmem:[#allocation90_spill] sm:$0xff] %v10033_v0  ;;  %v3940_v16 = vpop.f32.mrf.mxu0 }
 0x468   : > { %v4133_v25 = vsel %vm529_vm4, %v4109_v31, %v4110_v37  ;;  %v4235_v51 = vsel %vm802_vm3, %v4211_v17, %v4212_v36  ;;  %v4077_v5 = vmax.f32 %v4043_v46, 0.0  ;;  %v4003_v58 = vadd.f32 %v3940_v16, %v3671_v34  ;;  %v3673_v24 = vpop.f32.mrf.mxu1 }
 0x469   : > { %v10049_v3 = vmul.f32 %v4235_v51, %v11377_v27  ;;  %v3674_v55 = vadd.f32 %v3673_v24, %v9663_v2  ;;  %v6495_v50 = vpop.f32.mrf.mxu0  ;;  %v11378_v51 = vld [vmem:[#allocation55_spill] sm:$0xff] }
 0x46a   : > { %v4111_v19 = vrot.slane %v4077_v5, 7  ;;  %v4213_v1 = vrot.slane %v4077_v5, 1  ;;  %v4328_v26 = vpack.c.bf16 %v4077_v5, %v4076_v60  ;;  %v4044_v31 = vadd.f32 %v9688_v47, %v4003_v58  ;;  %v6420_v18 = vpop.f32.mrf.mxu1  ;;  %v11380_v5 = vld [vmem:[#allocation54_spill] sm:$0xff] }
 0x46b   : > { %v3943_v0 = vpop.f32.mrf.mxu0  ;;  %v10061_v60 = vmul.f32 %v4133_v25, %v11378_v51  ;;  %v11383_v51 = vld [vmem:[#allocation56_spill] sm:$0xff] }
 0x46c   : > { %v4132_v6 = vsel %vm529_vm4, %v4110_v37, %v4111_v19  ;;  %v4234_v34 = vsel %vm802_vm3, %v4212_v36, %v4213_v1  ;;  %v4078_v46 = vmax.f32 %v4044_v31, 0.0  ;;  %v4004_v16 = vadd.f32 %v3943_v0, %v3674_v55  ;;  %v3678_v2 = vpop.f32.mrf.mxu1  ;;  %6566 = vmatmul.mubr.msk.bf16.gmra.mxu1 %vm2122_vm5, %v4328_v26 }
 0x46d   : > { %11379 = vst [vmem:[#allocation81_spill] sm:$0xff] %v10061_v60  ;;  %v10064_v18 = vmul.f32 %v4132_v6, %v11380_v5  ;;  %v3679_v58 = vadd.f32 %v3678_v2, %v9665_v52  ;;  %v6496_v24 = vpop.f32.mrf.mxu0  ;;  %6569 = vmatprep.mubr.msk.bf16.mxu1 %vm6802_vm1, %v10927_v15  ;;  %v11382_v6 = vld [vmem:[#allocation57_spill] sm:$0xff] }
 0x46e   : > { %v4112_v37 = vrot.slane %v4078_v46, 7  ;;  %v4214_v42 = vrot.slane %v4078_v46, 1  ;;  %v4045_v36 = vadd.f32 %v9688_v47, %v4004_v16  ;;  %v6423_v0 = vpop.f32.mrf.mxu1  ;;  %v10077_v2 = vmul.f32 %v4234_v34, %v11382_v6 }
 0x46f   : > { %11381 = vst [vmem:[#allocation91_spill] sm:$0xff] %v10064_v18  ;;  %v3948_v27 = vpop.f32.mrf.mxu0 }
 0x470   : > { %v4131_v25 = vsel %vm529_vm4, %v4111_v19, %v4112_v37  ;;  %v4233_v55 = vsel %vm802_vm3, %v4213_v1, %v4214_v42  ;;  %v4079_v52 = vmax.f32 %v4045_v36, 0.0  ;;  %v4005_v50 = vadd.f32 %v3948_v27, %v3679_v58  ;;  %v3681_v31 = vpop.f32.mrf.mxu1 }
 0x471   : > { %v10080_v5 = vmul.f32 %v4233_v55, %v11383_v51  ;;  %v3682_v16 = vadd.f32 %v3681_v31, %v9667_v33  ;;  %v6499_v24 = vpop.f32.mrf.mxu0  ;;  %v11384_v55 = vld [vmem:[#allocation2_spill] sm:$0xff] }
 0x472   : > { %v4113_v0 = vrot.slane %v4079_v52, 7  ;;  %v4215_v26 = vrot.slane %v4079_v52, 1  ;;  %v4329_v17 = vpack.c.bf16 %v4079_v52, %v4078_v46  ;;  %v4046_v19 = vadd.f32 %v9688_v47, %v4005_v50  ;;  %v6424_v60 = vpop.f32.mrf.mxu1  ;;  %v11386_v52 = vld [vmem:[#allocation4_spill] sm:$0xff] }
 0x473   : > { %v3951_v18 = vpop.f32.mrf.mxu0  ;;  %v10092_v46 = vmul.f32 %v4131_v25, %v11384_v55  ;;  %v11389_v55 = vld [vmem:[#allocation5_spill] sm:$0xff] }
 0x474   : > { %v4130_v34 = vsel %vm529_vm4, %v4112_v37, %v4113_v0  ;;  %v4232_v58 = vsel %vm802_vm3, %v4214_v42, %v4215_v26  ;;  %v4080_v36 = vmax.f32 %v4046_v19, 0.0  ;;  %v4006_v27 = vadd.f32 %v3951_v18, %v3682_v16  ;;  %v3686_v33 = vpop.f32.mrf.mxu1  ;;  %6570 = vmatmul.mubr.msk.bf16.gmra.mxu1 %vm2122_vm5, %v4329_v17 }
 0x475   : > { %11385 = vst [vmem:[#allocation82_spill] sm:$0xff] %v10092_v46  ;;  %v10095_v60 = vmul.f32 %v4130_v34, %v11386_v52  ;;  %v3687_v50 = vadd.f32 %v3686_v33, %v9669_v21  ;;  %v6500_v31 = vpop.f32.mrf.mxu0  ;;  %6573 = vmatprep.mubr.msk.bf16.mxu1 %vm6802_vm1, %v10927_v15  ;;  %v11388_v34 = vld [vmem:[#allocation58_spill] sm:$0xff] }
 0x476   : > { %v4114_v37 = vrot.slane %v4080_v36, 7  ;;  %v4216_v6 = vrot.slane %v4080_v36, 1  ;;  %v4047_v42 = vadd.f32 %v9688_v47, %v4006_v27  ;;  %v6427_v18 = vpop.f32.mrf.mxu1  ;;  %v10108_v33 = vmul.f32 %v4232_v58, %v11388_v34 }
 0x477   : > { %11387 = vst [vmem:[#allocation92_spill] sm:$0xff] %v10095_v60  ;;  %v3956_v51 = vpop.f32.mrf.mxu0 }
 0x478   : > { %v4129_v25 = vsel %vm529_vm4, %v4113_v0, %v4114_v37  ;;  %v4231_v16 = vsel %vm802_vm3, %v4215_v26, %v4216_v6  ;;  %v4081_v21 = vmax.f32 %v4047_v42, 0.0  ;;  %v4007_v24 = vadd.f32 %v3956_v51, %v3687_v50  ;;  %v3689_v19 = vpop.f32.mrf.mxu1 }
 0x479   : > { %v10111_v52 = vmul.f32 %v4231_v16, %v11389_v55  ;;  %v3690_v27 = vadd.f32 %v3689_v19, %v9671_v45  ;;  %v6503_v31 = vpop.f32.mrf.mxu0  ;;  %v11390_v16 = vld [vmem:[#allocation7_spill] sm:$0xff] }
 0x47a   : > { %v4115_v18 = vrot.slane %v4081_v21, 7  ;;  %v4217_v17 = vrot.slane %v4081_v21, 1  ;;  %v4330_v1 = vpack.c.bf16 %v4081_v21, %v4080_v36  ;;  %v4048_v0 = vadd.f32 %v9688_v47, %v4007_v24  ;;  %v6428_v46 = vpop.f32.mrf.mxu1  ;;  %v11392_v21 = vld [vmem:[#allocation6_spill] sm:$0xff] }
 0x47b   : > { %v3959_v60 = vpop.f32.mrf.mxu0  ;;  %v10123_v36 = vmul.f32 %v4129_v25, %v11390_v16  ;;  %v11395_v16 = vld [vmem:[#allocation59_spill] sm:$0xff] }
 0x47c   : > { %v4128_v58 = vsel %vm529_vm4, %v4114_v37, %v4115_v18  ;;  %v4230_v50 = vsel %vm802_vm3, %v4216_v6, %v4217_v17  ;;  %v4082_v42 = vmax.f32 %v4048_v0, 0.0  ;;  %v4008_v51 = vadd.f32 %v3959_v60, %v3690_v27  ;;  %v3694_v45 = vpop.f32.mrf.mxu1  ;;  %6574 = vmatmul.mubr.msk.bf16.gmra.mxu1 %vm2122_vm5, %v4330_v1 }
 0x47d   : > { %11391 = vst [vmem:[#allocation83_spill] sm:$0xff] %v10123_v36  ;;  %v10126_v46 = vmul.f32 %v4128_v58, %v11392_v21  ;;  %v3695_v24 = vadd.f32 %v3694_v45, %v9673_v8  ;;  %v6504_v19 = vpop.f32.mrf.mxu0  ;;  %6577 = vmatprep.mubr.msk.bf16.mxu1 %vm6802_vm1, %v10927_v15  ;;  %v11394_v58 = vld [vmem:[#allocation60_spill] sm:$0xff] }
 0x47e   : > { %v4116_v37 = vrot.slane %v4082_v42, 7  ;;  %v4218_v34 = vrot.slane %v4082_v42, 1  ;;  %v4049_v6 = vadd.f32 %v9688_v47, %v4008_v51  ;;  %v6431_v60 = vpop.f32.mrf.mxu1  ;;  %v10139_v45 = vmul.f32 %v4230_v50, %v11394_v58 }
 0x47f   : > { %11393 = vst [vmem:[#allocation84_spill] sm:$0xff] %v10126_v46  ;;  %v3964_v55 = vpop.f32.mrf.mxu0 }
 0x480   : > { %v4127_v25 = vsel %vm529_vm4, %v4115_v18, %v4116_v37  ;;  %v4229_v27 = vsel %vm802_vm3, %v4217_v17, %v4218_v34  ;;  %v4083_v8 = vmax.f32 %v4049_v6, 0.0  ;;  %v4009_v31 = vadd.f32 %v3964_v55, %v3695_v24  ;;  %v3697_v0 = vpop.f32.mrf.mxu1 }
 0x481   : > { %v10142_v21 = vmul.f32 %v4229_v27, %v11395_v16  ;;  %v3698_v51 = vadd.f32 %v3697_v0, %v9675_v28  ;;  %v6507_v19 = vpop.f32.mrf.mxu0  ;;  %v11396_v27 = vld [vmem:[#allocation9_spill] sm:$0xff] }
 0x482   : > { %v4117_v60 = vrot.slane %v4083_v8, 7  ;;  %v4219_v1 = vrot.slane %v4083_v8, 1  ;;  %v4331_v26 = vpack.c.bf16 %v4083_v8, %v4082_v42  ;;  %v4050_v18 = vadd.f32 %v9688_v47, %v4009_v31  ;;  %v6432_v36 = vpop.f32.mrf.mxu1  ;;  %v11397_v47 = vld [vmem:[#allocation8_spill] sm:$0xff] }
 0x483   : > { %v3967_v46 = vpop.f32.mrf.mxu0  ;;  %v10154_v42 = vmul.f32 %v4127_v25, %v11396_v27 }
 0x484   : > { %v4126_v50 = vsel %vm529_vm4, %v4116_v37, %v4117_v60  ;;  %v4228_v24 = vsel %vm802_vm3, %v4218_v34, %v4219_v1  ;;  %v4084_v6 = vmax.f32 %v4050_v18, 0.0  ;;  %v4010_v55 = vadd.f32 %v3967_v46, %v3698_v51  ;;  %v3702_v28 = vpop.f32.mrf.mxu1  ;;  %6578 = vmatmul.mubr.msk.bf16.gmra.mxu1 %vm2122_vm5, %v4331_v26  ;;  %v6791_v46 = vld [vmem:[%s10665_s8] ss:$0 sm:$0xff] }
 0x485   : > { %v10157_v36 = vmul.f32 %v4126_v50, %v11397_v47  ;;  %v3703_v8 = vadd.f32 %v3702_v28, %v9677_v12  ;;  %v6508_v31 = vpop.f32.mrf.mxu0  ;;  %6581 = vmatprep.mubr.msk.bf16.mxu1 %vm6802_vm1, %v10927_v15  ;;  %v10172_v50 = vmul.f32 %v4228_v24, %v11247_v41 }
 0x486   : > { %v4118_v37 = vrot.slane %v4084_v6, 7  ;;  %v4220_v0 = vrot.slane %v4084_v6, 1  ;;  %v4051_v34 = vadd.f32 %v6791_v46, %v4010_v55  ;;  %v6435_v26 = vpop.f32.mrf.mxu1 }
 0x487   : > { %v3972_v58 = vpop.f32.mrf.mxu0 }
 0x488   : > { %v4125_v16 = vsel %vm529_vm4, %v4117_v60, %v4118_v37  ;;  %v4227_v12 = vsel %vm802_vm3, %v4219_v1, %v4220_v0  ;;  %v4085_v51 = vmax.f32 %v4051_v34, 0.0  ;;  %v4011_v19 = vadd.f32 %v3972_v58, %v3703_v8  ;;  %v3705_v18 = vpop.f32.mrf.mxu1 }
 0x489   : > { %v10175_v28 = vmul.f32 %v4227_v12, %v11248_v11  ;;  %v3706_v55 = vadd.f32 %v3705_v18, %v9682_v48  ;;  %v6511_v27 = vpop.f32.mrf.mxu0  ;;  %v10186_v48 = vmul.f32 %v4125_v16, %v11249_v29 }
 0x48a   : > { %v4119_v47 = vrot.slane %v4085_v51, 7  ;;  %v4221_v31 = vrot.slane %v4085_v51, 1  ;;  %v4332_v26 = vpack.c.bf16 %v4085_v51, %v4084_v6  ;;  %v4052_v25 = vadd.f32 %v6791_v46, %v4011_v19  ;;  %v6436_v60 = vpop.f32.mrf.mxu1  ;;  %v11398_v6 = vld [vmem:[#allocation63_spill] sm:$0xff] }
 0x48b   : > { %v3975_v17 = vpop.f32.mrf.mxu0  ;;  %v4845_v1 = vpack.c.bf16 %v10175_v28, %v10172_v50 }
 0x48c   : > { %v4124_v8 = vsel %vm529_vm4, %v4118_v37, %v4119_v47  ;;  %v4226_v41 = vsel %vm802_vm3, %v4220_v0, %v4221_v31  ;;  %v4086_v11 = vmax.f32 %v4052_v25, 0.0  ;;  %v4012_v24 = vadd.f32 %v3975_v17, %v3706_v55  ;;  %6582 = vmatmul.mubr.msk.bf16.gmra.mxu1 %vm2122_vm5, %v4332_v26 }
 0x48d   : > { %v10189_v34 = vmul.f32 %v4124_v8, %v11398_v6  ;;  %v6512_v58 = vpop.f32.mrf.mxu0  ;;  %6585 = vmatprep.mubr.msk.bf16.mxu1 %vm6802_vm1, %v10927_v15  ;;  %v10200_v16 = vmul.f32 %v4226_v41, %v11099_v20  ;;  %v11399_v20 = vrot.slane %v9692_v35, 7  ;;  %v11400_v8 = vrot.slane %v9692_v35, 1  ;;  %v11402_v41 = vld [vmem:[#allocation67_spill] sm:$0xff] }
 0x48e   : > { %v4120_v12 = vrot.slane %v4086_v11, 7  ;;  %v4222_v51 = vrot.slane %v4086_v11, 1  ;;  %v4053_v37 = vadd.f32 %v6791_v46, %v4012_v24  ;;  %v4157_v46 = vmul.f32 %v9708_v30, %v11252_v23  ;;  %v11401_v23 = vld [vmem:[#allocation11_spill] sm:$0xff]  ;;  %v11404_v58 = vld [vmem:[#allocation69_spill] sm:$0xff] }
 0x48f   : > { %v4307_v0 = vpack.c.bf16 %v10189_v34, %v10186_v48  ;;  %v11403_v24 = vld [vmem:[#allocation3_spill] sm:$0xff] }
 0x490   : > { %v4123_v17 = vsel %vm529_vm4, %v4119_v47, %v4120_v12  ;;  %v4225_v29 = vsel %vm802_vm3, %v4221_v31, %v4222_v51  ;;  %v4087_v25 = vmax.f32 %v4053_v37, 0.0  ;;  %v11405_v37 = vld [vmem:[#allocation61_spill] sm:$0xff] }
 0x491   : > { %v10203_v19 = vmul.f32 %v4225_v29, %v11251_v7  ;;  %v10208_v26 = vmul.f32 %v4123_v17, %v11253_v22  ;;  %v11406_v17 = vld [vmem:[#allocation62_spill] sm:$0xff] }
 0x492   : > { %v4121_v18 = vrot.slane %v4087_v25, 7  ;;  %v4223_v55 = vrot.slane %v4087_v25, 1  ;;  %v4333_v27 = vpack.c.bf16 %v4087_v25, %v4086_v11  ;;  %v11407_v29 = vpack.c.bf16 %v11405_v37, %v11406_v17  ;;  %v11408_v25 = vld [vmem:[#allocation65_spill] sm:$0xff] }
 0x493   : > { %v4846_v47 = vpack.c.bf16 %v10203_v19, %v10200_v16  ;;  %v11435_v17 = vpack.c.bf16 %v9956_v59, %v9953_v44  ;;  %v11439_v44 = vpack.c.bf16 %v9987_v63, %v9984_v32  ;;  %v11443_v32 = vpack.c.bf16 %v10018_v54, %v10015_v49 }
 0x494   : > { %v4122_v31 = vsel %vm529_vm4, %v4120_v12, %v4121_v18  ;;  %v4155_v7 = vsel %vm529_vm4, %v4121_v18, %v11399_v20  ;;  %v4224_v60 = vsel %vm802_vm3, %v4222_v51, %v4223_v55  ;;  %v4257_v22 = vsel %vm802_vm3, %v4223_v55, %v11400_v8  ;;  %6586 = vmatmul.mubr.msk.bf16.gmra.mxu1 %vm2122_vm5, %v4333_v27  ;;  %v11409_v18 = vld [vmem:[#allocation64_spill] sm:$0xff] }
 0x495   : > { %v4156_v30 = vmul.f32 %v4155_v7, %v11401_v23  ;;  %v10227_v11 = vmul.f32 %v4122_v31, %v11402_v41  ;;  %v10230_v6 = vmul.f32 %v4224_v60, %v11403_v24  ;;  %v10233_v12 = vmul.f32 %v4257_v22, %v11404_v58  ;;  %6673 = vmatprep.mubr.msk.bf16.mxu1 %vm6802_vm1, %v10927_v15  ;;  %v11413_v31 = vld [vmem:[#allocation13_spill] sm:$0xff] }
 0x496   : > { %v11410_v55 = vpack.c.bf16 %v11408_v25, %v11409_v18  ;;  %v11411_v27 = vpack.c.bf16 %v9770_v43, %v9767_v10  ;;  %v11415_v7 = vpack.c.bf16 %v9801_v57, %v9798_v4  ;;  %v11416_v10 = vld [vmem:[#allocation66_spill] sm:$0xff]  ;;  %v11417_v43 = vld [vmem:[#allocation88_spill] sm:$0xff]  ;;  %v11419_v8 = vpack.c.bf16 %v9832_v62, %v9829_v56  ;;  %v11420_v4 = vld [vmem:[#allocation87_spill] sm:$0xff] }
 0x497   : > { %v4292_v35 = vpack.c.bf16 %v4157_v46, %v4156_v30  ;;  %v4308_v40 = vpack.c.bf16 %v10227_v11, %v10208_v26  ;;  %v4847_v51 = vpack.c.bf16 %v10233_v12, %v10230_v6  ;;  %v11412_v46 = vld [vmem:[#allocation68_spill] sm:$0xff]  ;;  %v11418_v60 = vpack.c.bf16 %v11416_v10, %v11417_v43  ;;  %v11421_v57 = vld [vmem:[#allocation70_spill] sm:$0xff]  ;;  %v11425_v62 = vld [vmem:[#allocation71_spill] sm:$0xff] }
 0x498   : > { %v11414_v20 = vpack.c.bf16 %v11412_v46, %v11413_v31  ;;  %v11422_v22 = vpack.c.bf16 %v11420_v4, %v11421_v57  ;;  %v11423_v23 = vpack.c.bf16 %v9863_v13, %v9860_v53  ;;  %v11424_v56 = vld [vmem:[#allocation72_spill] sm:$0xff]  ;;  %v11427_v41 = vpack.c.bf16 %v9894_v14, %v9891_v38  ;;  %v11428_v53 = vld [vmem:[#allocation74_spill] sm:$0xff]  ;;  %v11429_v13 = vld [vmem:[#allocation73_spill] sm:$0xff] }
 0x499   : > { %6598 = vmatmul.mubr.msk.bf16.vlgmr.msra.gmra.mxu0 %vm2122_vm5, %v4292_v35  ;;  %v11426_v30 = vpack.c.bf16 %v11424_v56, %v11425_v62  ;;  %v11430_v24 = vpack.c.bf16 %v11428_v53, %v11429_v13  ;;  %v11431_v58 = vpack.c.bf16 %v9925_v39, %v9922_v61  ;;  %v11432_v38 = vld [vmem:[#allocation76_spill] sm:$0xff]  ;;  %v11433_v14 = vld [vmem:[#allocation75_spill] sm:$0xff]  ;;  %v11437_v25 = vld [vmem:[#allocation77_spill] sm:$0xff]  ;;  %v11447_v49 = vpack.c.bf16 %v10049_v3, %v10046_v9 }
 0x49a   : > { %6601 = vmatprep.mubr.msk.bf16.mxu0 %vm6802_vm1, %v10927_v15  ;;  %v11434_v35 = vpack.c.bf16 %v11432_v38, %v11433_v14  ;;  %v11440_v31 = vld [vmem:[#allocation89_spill] sm:$0xff]  ;;  %v11445_v4 = vld [vmem:[#allocation80_spill] sm:$0xff]  ;;  %v11448_v62 = vld [vmem:[#allocation91_spill] sm:$0xff]  ;;  %v11451_v9 = vpack.c.bf16 %v10080_v5, %v10077_v2  ;;  %v11455_v2 = vpack.c.bf16 %v10111_v52, %v10108_v33  ;;  %v11459_v33 = vpack.c.bf16 %v10142_v21, %v10139_v45 }
 0x49b   : > { %v11453_v38 = vld [vmem:[#allocation82_spill] sm:$0xff] }
 0x49c   : > { %6674 = vmatmul.mubr.msk.bf16.vlgmr.msra.gmra.mxu1 %vm2122_vm5, %v11407_v29  ;;  %v11436_v29 = vld [vmem:[#allocation78_spill] sm:$0xff] }
 0x49d   : > { %6677 = vmatprep.mubr.msk.bf16.mxu1 %vm6802_vm1, %v10927_v15  ;;  %v11438_v18 = vpack.c.bf16 %v11436_v29, %v11437_v25  ;;  %v11456_v29 = vld [vmem:[#allocation84_spill] sm:$0xff]  ;;  %v11457_v25 = vld [vmem:[#allocation83_spill] sm:$0xff] }
 0x4a1   : > { %6602 = vmatmul.mubr.msk.bf16.gmra.mxu0 %vm2122_vm5, %v11410_v55 }
 0x4a2   : > { %6605 = vmatprep.mubr.msk.bf16.mxu0 %vm6802_vm1, %v10927_v15 }
 0x4a4   : > { %6678 = vmatmul.mubr.msk.bf16.gmra.mxu1 %vm2122_vm5, %v11411_v27 }
 0x4a5   : > { %6681 = vmatprep.mubr.msk.bf16.mxu1 %vm6802_vm1, %v10927_v15 }
 0x4a9   : > { %6606 = vmatmul.mubr.msk.bf16.gmra.mxu0 %vm2122_vm5, %v11414_v20  ;;  %v11441_v20 = vld [vmem:[#allocation79_spill] sm:$0xff] }
 0x4aa   : > { %6609 = vmatprep.mubr.msk.bf16.mxu0 %vm6802_vm1, %v10927_v15 }
 0x4ac   : > { %6682 = vmatmul.mubr.msk.bf16.gmra.mxu1 %vm2122_vm5, %v11415_v7  ;;  %v11442_v7 = vpack.c.bf16 %v11440_v31, %v11441_v20  ;;  %v11460_v31 = vpack.c.bf16 %v10157_v36, %v10154_v42 }
 0x4ad   : > { %6685 = vmatprep.mubr.msk.bf16.mxu1 %vm6802_vm1, %v10927_v15 }
 0x4b1   : > { %6610 = vmatmul.mubr.msk.bf16.gmra.mxu0 %vm2122_vm5, %v11418_v60 }
 0x4b2   : > { %6613 = vmatprep.mubr.msk.bf16.mxu0 %vm6802_vm1, %v10927_v15 }
 0x4b4   : > { %6686 = vmatmul.mubr.msk.bf16.gmra.mxu1 %vm2122_vm5, %v11419_v8  ;;  %v11444_v8 = vld [vmem:[#allocation90_spill] sm:$0xff] }
 0x4b5   : > { %6689 = vmatprep.mubr.msk.bf16.mxu1 %vm6802_vm1, %v10927_v15  ;;  %v11446_v57 = vpack.c.bf16 %v11444_v8, %v11445_v4 }
 0x4b9   : > { %6614 = vmatmul.mubr.msk.bf16.gmra.mxu0 %vm2122_vm5, %v11422_v22 }
 0x4ba   : > { %6617 = vmatprep.mubr.msk.bf16.mxu0 %vm6802_vm1, %v10927_v15 }
 0x4bc   : > { %6690 = vmatmul.mubr.msk.bf16.gmra.mxu1 %vm2122_vm5, %v11423_v23 }
 0x4bd   : > { %6693 = vmatprep.mubr.msk.bf16.mxu1 %vm6802_vm1, %v10927_v15 }
 0x4c1   : > { %6618 = vmatmul.mubr.msk.bf16.gmra.mxu0 %vm2122_vm5, %v11426_v30  ;;  %v11449_v30 = vld [vmem:[#allocation81_spill] sm:$0xff] }
 0x4c2   : > { %6621 = vmatprep.mubr.msk.bf16.mxu0 %vm6802_vm1, %v10927_v15 }
 0x4c4   : > { %6694 = vmatmul.mubr.msk.bf16.gmra.mxu1 %vm2122_vm5, %v11427_v41  ;;  %v11450_v41 = vpack.c.bf16 %v11448_v62, %v11449_v30 }
 0x4c5   : > { %6697 = vmatprep.mubr.msk.bf16.mxu1 %vm6802_vm1, %v10927_v15 }
 0x4c9   : > { %6622 = vmatmul.mubr.msk.bf16.gmra.mxu0 %vm2122_vm5, %v11430_v24 }
 0x4ca   : > { %6625 = vmatprep.mubr.msk.bf16.mxu0 %vm6802_vm1, %v10927_v15 }
 0x4cc   : > { %6698 = vmatmul.mubr.msk.bf16.gmra.mxu1 %vm2122_vm5, %v11431_v58  ;;  %v11452_v58 = vld [vmem:[#allocation92_spill] sm:$0xff] }
 0x4cd   : > { %6701 = vmatprep.mubr.msk.bf16.mxu1 %vm6802_vm1, %v10927_v15  ;;  %v11454_v14 = vpack.c.bf16 %v11452_v58, %v11453_v38 }
 0x4d1   : > { %6626 = vmatmul.mubr.msk.bf16.gmra.mxu0 %vm2122_vm5, %v11434_v35 }
 0x4d2   : > { %6629 = vmatprep.mubr.msk.bf16.mxu0 %vm6802_vm1, %v10927_v15 }
 0x4d4   : > { %v10328_v37 = vpop.f32.mrf.mxu1  ;;  %6702 = vmatmul.mubr.msk.bf16.gmra.mxu1 %vm2122_vm5, %v11435_v17 }
 0x4d5   : > { %6705 = vmatprep.mubr.msk.bf16.mxu1 %vm6802_vm1, %v10927_v15 }
 0x4d6   : > { %v6523_v61 = vpop.f32.mrf.mxu1 }
 0x4d8   : > { %v10336_v39 = vpop.f32.mrf.mxu1 }
 0x4d9   : > { %6630 = vmatmul.mubr.msk.bf16.gmra.mxu0 %vm2122_vm5, %v11438_v18  ;;  %v11458_v18 = vpack.c.bf16 %v11456_v29, %v11457_v25 }
 0x4da   : > { %v6524_v55 = vpop.f32.mrf.mxu1  ;;  %6633 = vmatprep.mubr.msk.bf16.mxu0 %vm6802_vm1, %v10927_v15 }
 0x4dc   : > { %v10344_v27 = vpop.f32.mrf.mxu1  ;;  %6706 = vmatmul.mubr.msk.bf16.gmra.mxu1 %vm2122_vm5, %v11439_v44 }
 0x4dd   : > { %6709 = vmatprep.mubr.msk.bf16.mxu1 %vm6802_vm1, %v10927_v15 }
 0x4de   : > { %v6527_v59 = vpop.f32.mrf.mxu1 }
 0x4e0   : > { %v10352_v46 = vpop.f32.mrf.mxu1 }
 0x4e1   : > { %6634 = vmatmul.mubr.msk.bf16.gmra.mxu0 %vm2122_vm5, %v11442_v7 }
 0x4e2   : > { %v6528_v10 = vpop.f32.mrf.mxu1  ;;  %6637 = vmatprep.mubr.msk.bf16.mxu0 %vm6802_vm1, %v10927_v15 }
 0x4e4   : > { %v10360_v43 = vpop.f32.mrf.mxu1  ;;  %6710 = vmatmul.mubr.msk.bf16.gmra.mxu1 %vm2122_vm5, %v11443_v32 }
 0x4e5   : > { %6713 = vmatprep.mubr.msk.bf16.mxu1 %vm6802_vm1, %v10927_v15 }
 0x4e6   : > { %v6531_v63 = vpop.f32.mrf.mxu1 }
 0x4e8   : > { %v10368_v60 = vpop.f32.mrf.mxu1 }
 0x4e9   : > { %6638 = vmatmul.mubr.msk.bf16.gmra.mxu0 %vm2122_vm5, %v11446_v57 }
 0x4ea   : > { %v6532_v22 = vpop.f32.mrf.mxu1  ;;  %6641 = vmatprep.mubr.msk.bf16.mxu0 %vm6802_vm1, %v10927_v15 }
 0x4ec   : > { %v10376_v23 = vpop.f32.mrf.mxu1  ;;  %6714 = vmatmul.mubr.msk.bf16.gmra.mxu1 %vm2122_vm5, %v11447_v49 }
 0x4ed   : > { %6717 = vmatprep.mubr.msk.bf16.mxu1 %vm6802_vm1, %v10927_v15 }
 0x4ee   : > { %v6535_v54 = vpop.f32.mrf.mxu1 }
 0x4f0   : > { %v10384_v56 = vpop.f32.mrf.mxu1 }
 0x4f1   : > { %6642 = vmatmul.mubr.msk.bf16.gmra.mxu0 %vm2122_vm5, %v11450_v41 }
 0x4f2   : > { %v6536_v53 = vpop.f32.mrf.mxu1  ;;  %6645 = vmatprep.mubr.msk.bf16.mxu0 %vm6802_vm1, %v10927_v15 }
 0x4f4   : > { %v10392_v13 = vpop.f32.mrf.mxu1  ;;  %6718 = vmatmul.mubr.msk.bf16.gmra.mxu1 %vm2122_vm5, %v11451_v9 }
 0x4f5   : > { %6721 = vmatprep.mubr.msk.bf16.mxu1 %vm6802_vm1, %v10927_v15 }
 0x4f6   : > { %v6539_v3 = vpop.f32.mrf.mxu1 }
 0x4f8   : > { %v10400_v24 = vpop.f32.mrf.mxu1 }
 0x4f9   : > { %6646 = vmatmul.mubr.msk.bf16.gmra.mxu0 %vm2122_vm5, %v11454_v14 }
 0x4fa   : > { %v6540_v35 = vpop.f32.mrf.mxu1  ;;  %6649 = vmatprep.mubr.msk.bf16.mxu0 %vm6802_vm1, %v10927_v15 }
 0x4fc   : > { %v10408_v17 = vpop.f32.mrf.mxu1  ;;  %6722 = vmatmul.mubr.msk.bf16.gmra.mxu1 %vm2122_vm5, %v11455_v2 }
 0x4fd   : > { %6725 = vmatprep.mubr.msk.bf16.mxu1 %vm6802_vm1, %v10927_v15 }
 0x4fe   : > { %v6543_v5 = vpop.f32.mrf.mxu1 }
 0x500   : > { %v10416_v61 = vpop.f32.mrf.mxu1 }
 0x501   : > { %6650 = vmatmul.mubr.msk.bf16.gmra.mxu0 %vm2122_vm5, %v11458_v18  ;;  %v10510_v18 = vld [vmem:[%s10667_s10] ss:$0 sm:$0xff] }
 0x502   : > { %v6544_v55 = vpop.f32.mrf.mxu1  ;;  %6653 = vmatprep.mubr.msk.bf16.mxu0 %vm6802_vm1, %v10927_v15 }
 0x504   : > { %v10424_v44 = vpop.f32.mrf.mxu1  ;;  %6726 = vmatmul.mubr.msk.bf16.gmra.mxu1 %vm2122_vm5, %v11459_v33 }
 0x505   : > { %6729 = vmatprep.mubr.msk.bf16.mxu1 %vm6802_vm1, %v10927_v15 }
 0x506   : > { %v6547_v52 = vpop.f32.mrf.mxu1 }
 0x508   : > { %v10432_v59 = vpop.f32.mrf.mxu1 }
 0x509   : > { %6654 = vmatmul.mubr.msk.bf16.gmra.mxu0 %vm2122_vm5, %v11460_v31 }
 0x50a   : > { %v6548_v20 = vpop.f32.mrf.mxu1  ;;  %6657 = vmatprep.mubr.msk.bf16.mxu0 %vm6802_vm1, %v10927_v15 }
 0x50c   : > { %v10440_v7 = vpop.f32.mrf.mxu1  ;;  %6730 = vmatmul.mubr.msk.bf16.gmra.mxu1 %vm2122_vm5, %v4845_v1 }
 0x50d   : > { %6733 = vmatprep.mubr.msk.bf16.mxu1 %vm6802_vm1, %v10927_v15 }
 0x50e   : > { %v6551_v45 = vpop.f32.mrf.mxu1 }
 0x510   : > { %v10448_v21 = vpop.f32.mrf.mxu1 }
 0x511   : > { %6658 = vmatmul.mubr.msk.bf16.gmra.mxu0 %vm2122_vm5, %v4307_v0 }
 0x512   : > { %v6552_v42 = vpop.f32.mrf.mxu1  ;;  %6661 = vmatprep.mubr.msk.bf16.mxu0 %vm6802_vm1, %v10927_v15 }
 0x514   : > { %v10456_v36 = vpop.f32.mrf.mxu1  ;;  %6734 = vmatmul.mubr.msk.bf16.gmra.mxu1 %vm2122_vm5, %v4846_v47 }
 0x515   : > { %6737 = vmatprep.mubr.msk.bf16.mxu1 %vm6802_vm1, %v10927_v15 }
 0x516   : > { %v6555_v50 = vpop.f32.mrf.mxu1 }
 0x518   : > { %v10464_v28 = vpop.f32.mrf.mxu1 }
 0x519   : > { %6662 = vmatmul.mubr.msk.bf16.gmra.mxu0 %vm2122_vm5, %v4308_v40 }
 0x51a   : > { %v6556_v1 = vpop.f32.mrf.mxu1 }
 0x51c   : > { %v10470_v48 = vpop.f32.mrf.mxu1  ;;  %6738 = vmatmul.mubr.msk.bf16.gmra.mxu1 %vm2122_vm5, %v4847_v51 }
 0x51e   : > { %v6559_v34 = vpop.f32.mrf.mxu1 }
 0x520   : > { %v10476_v0 = vpop.f32.mrf.mxu1 }
 0x522   : > { %v6560_v15 = vpop.f32.mrf.mxu1 }
 0x524   : > { %v10478_v16 = vpop.f32.mrf.mxu1 }
 0x526   : > { %v6563_v19 = vpop.f32.mrf.mxu1 }
 0x528   : > { %v10480_v47 = vpop.f32.mrf.mxu1 }
 0x52a   : > { %v6564_v26 = vpop.f32.mrf.mxu1 }
 0x52c   : > { %v10482_v11 = vpop.f32.mrf.mxu1 }
 0x52e   : > { %v6567_v40 = vpop.f32.mrf.mxu1 }
 0x530   : > { %v10484_v10 = vpop.f32.mrf.mxu1 }
 0x532   : > { %v6568_v32 = vpop.f32.mrf.mxu1 }
 0x534   : > { %v10486_v63 = vpop.f32.mrf.mxu1 }
 0x536   : > { %v6571_v6 = vpop.f32.mrf.mxu1 }
 0x538   : > { %v10488_v12 = vpop.f32.mrf.mxu1 }
 0x53a   : > { %v6572_v51 = vpop.f32.mrf.mxu1 }
 0x53c   : > { %v10490_v8 = vpop.f32.mrf.mxu1 }
 0x53e   : > { %v6575_v4 = vpop.f32.mrf.mxu1 }
 0x540   : > { %v10492_v57 = vpop.f32.mrf.mxu1 }
 0x542   : > { %v6576_v22 = vpop.f32.mrf.mxu1 }
 0x544   : > { %v10494_v49 = vpop.f32.mrf.mxu1 }
 0x546   : > { %v6579_v54 = vpop.f32.mrf.mxu1 }
 0x548   : > { %v10496_v62 = vpop.f32.mrf.mxu1 }
 0x54a   : > { %v6580_v30 = vpop.f32.mrf.mxu1 }
 0x54c   : > { %v10498_v41 = vpop.f32.mrf.mxu1 }
 0x54e   : > { %v6583_v53 = vpop.f32.mrf.mxu1 }
 0x550   : > { %v10500_v9 = vpop.f32.mrf.mxu1 }
 0x552   : > { %v6584_v3 = vpop.f32.mrf.mxu1 }
 0x554   : > { %v10502_v58 = vpop.f32.mrf.mxu1 }
 0x556   : > { %v6587_v38 = vpop.f32.mrf.mxu1 }
 0x558   : > { %v10504_v14 = vpop.f32.mrf.mxu1 }
 0x559   : > { %v4696_v35 = vpop.f32.mrf.mxu0 }
 0x55a   : > { %v4697_v2 = vadd.f32 %v4696_v35, %v10328_v37  ;;  %v6588_v5 = vpop.f32.mrf.mxu1 }
 0x55b   : > { %v6599_v29 = vpop.f32.mrf.mxu0 }
 0x55c   : > { %v4966_v25 = vpop.f32.mrf.mxu1 }
 0x55d   : > { %v5101_v55 = vadd.f32 %v4966_v25, %v4697_v2  ;;  %v4699_v33 = vpop.f32.mrf.mxu0 }
 0x55e   : > { %v4700_v52 = vadd.f32 %v4699_v33, %v10336_v39  ;;  %v6675_v31 = vpop.f32.mrf.mxu1 }
 0x55f   : > { %v5142_v20 = vadd.f32 %v10510_v18, %v5101_v55  ;;  %v6600_v45 = vpop.f32.mrf.mxu0 }
 0x560   : > { %v4969_v37 = vpop.f32.mrf.mxu1 }
 0x561   : > { %v5176_v42 = vmax.f32 %v5142_v20, 0.0  ;;  %v5102_v50 = vadd.f32 %v4969_v37, %v4700_v52  ;;  %v4704_v1 = vpop.f32.mrf.mxu0 }
 0x562   : > { %v4705_v34 = vadd.f32 %v4704_v1, %v10344_v27  ;;  %v6676_v39 = vpop.f32.mrf.mxu1 }
 0x563   : > { %5211 = vst.msk [vmem:[%s10519_s15] sm:$0xff] %vm5210_vm6, %v5176_v42  ;;  %v5143_v15 = vadd.f32 %v10510_v18, %v5102_v50  ;;  %v6603_v19 = vpop.f32.mrf.mxu0 }
 0x564   : > { %v4974_v26 = vpop.f32.mrf.mxu1 }
 0x565   : > { %v5177_v40 = vmax.f32 %v5143_v15, 0.0  ;;  %v5103_v32 = vadd.f32 %v4974_v26, %v4705_v34  ;;  %v4707_v6 = vpop.f32.mrf.mxu0 }
 0x566   : > { %v4708_v51 = vadd.f32 %v4707_v6, %v10352_v46  ;;  %v6679_v4 = vpop.f32.mrf.mxu1 }
 0x567   : > { %5212 = vst.msk [vmem:[%s10519_s15 + $0x8] sm:$0xff] %vm5210_vm6, %v5177_v40  ;;  %v5144_v22 = vadd.f32 %v10510_v18, %v5103_v32  ;;  %v6604_v54 = vpop.f32.mrf.mxu0 }
 0x568   : > { %v4977_v27 = vpop.f32.mrf.mxu1 }
 0x569   : > { %v5178_v30 = vmax.f32 %v5144_v22, 0.0  ;;  %v5104_v53 = vadd.f32 %v4977_v27, %v4708_v51  ;;  %v4712_v3 = vpop.f32.mrf.mxu0 }
 0x56a   : > { %v4713_v38 = vadd.f32 %v4712_v3, %v10360_v43  ;;  %v6680_v35 = vpop.f32.mrf.mxu1 }
 0x56b   : > { %5213 = vst.msk [vmem:[%s10519_s15 + $0x10] sm:$0xff] %vm5210_vm6, %v5178_v30  ;;  %v5145_v2 = vadd.f32 %v10510_v18, %v5104_v53  ;;  %v6607_v5 = vpop.f32.mrf.mxu0 }
 0x56c   : > { %v4982_v46 = vpop.f32.mrf.mxu1 }
 0x56d   : > { %v5179_v29 = vmax.f32 %v5145_v2, 0.0  ;;  %v5105_v25 = vadd.f32 %v4982_v46, %v4713_v38  ;;  %v4715_v55 = vpop.f32.mrf.mxu0 }
 0x56e   : > { %v4716_v33 = vadd.f32 %v4715_v55, %v10368_v60  ;;  %v6683_v52 = vpop.f32.mrf.mxu1 }
 0x56f   : > { %5214 = vst.msk [vmem:[%s10519_s15 + $0x18] sm:$0xff] %vm5210_vm6, %v5179_v29  ;;  %v5146_v31 = vadd.f32 %v10510_v18, %v5105_v25  ;;  %v6608_v20 = vpop.f32.mrf.mxu0 }
 0x570   : > { %v4985_v43 = vpop.f32.mrf.mxu1 }
 0x571   : > { %v5180_v45 = vmax.f32 %v5146_v31, 0.0  ;;  %v5106_v37 = vadd.f32 %v4985_v43, %v4716_v33  ;;  %v4720_v42 = vpop.f32.mrf.mxu0 }
 0x572   : > { %v4721_v50 = vadd.f32 %v4720_v42, %v10376_v23  ;;  %v6684_v1 = vpop.f32.mrf.mxu1 }
 0x573   : > { %5215 = vst.msk [vmem:[%s10519_s15 + $0x20] sm:$0xff] %vm5210_vm6, %v5180_v45  ;;  %v5147_v34 = vadd.f32 %v10510_v18, %v5106_v37  ;;  %v6611_v39 = vpop.f32.mrf.mxu0 }
 0x574   : > { %v4990_v60 = vpop.f32.mrf.mxu1 }
 0x575   : > { %v5181_v15 = vmax.f32 %v5147_v34, 0.0  ;;  %v5107_v19 = vadd.f32 %v4990_v60, %v4721_v50  ;;  %v4723_v26 = vpop.f32.mrf.mxu0 }
 0x576   : > { %v4724_v40 = vadd.f32 %v4723_v26, %v10384_v56  ;;  %v6687_v32 = vpop.f32.mrf.mxu1 }
 0x577   : > { %5216 = vst.msk [vmem:[%s10519_s15 + $0x28] sm:$0xff] %vm5210_vm6, %v5181_v15  ;;  %v5148_v6 = vadd.f32 %v10510_v18, %v5107_v19  ;;  %v6612_v51 = vpop.f32.mrf.mxu0 }
 0x578   : > { %v4993_v23 = vpop.f32.mrf.mxu1 }
 0x579   : > { %v5182_v4 = vmax.f32 %v5148_v6, 0.0  ;;  %v5108_v22 = vadd.f32 %v4993_v23, %v4724_v40  ;;  %v4728_v54 = vpop.f32.mrf.mxu0 }
 0x57a   : > { %v4729_v27 = vadd.f32 %v4728_v54, %v10392_v13  ;;  %v6688_v30 = vpop.f32.mrf.mxu1 }
 0x57b   : > { %5217 = vst.msk [vmem:[%s10519_s15 + $0x30] sm:$0xff] %vm5210_vm6, %v5182_v4  ;;  %v5149_v53 = vadd.f32 %v10510_v18, %v5108_v22  ;;  %v6615_v3 = vpop.f32.mrf.mxu0 }
 0x57c   : > { %v4998_v56 = vpop.f32.mrf.mxu1 }
 0x57d   : > { %v5183_v38 = vmax.f32 %v5149_v53, 0.0  ;;  %v5109_v35 = vadd.f32 %v4998_v56, %v4729_v27  ;;  %v4731_v2 = vpop.f32.mrf.mxu0 }
 0x57e   : > { %v4732_v5 = vadd.f32 %v4731_v2, %v10400_v24  ;;  %v6691_v46 = vpop.f32.mrf.mxu1 }
 0x57f   : > { %5218 = vst.msk [vmem:[%s10519_s15 + $0x38] sm:$0xff] %vm5210_vm6, %v5183_v38  ;;  %v5150_v29 = vadd.f32 %v10510_v18, %v5109_v35  ;;  %v6616_v25 = vpop.f32.mrf.mxu0 }
 0x580   : > { %v5001_v13 = vpop.f32.mrf.mxu1 }
 0x581   : > { %v5184_v55 = vmax.f32 %v5150_v29, 0.0  ;;  %v5110_v33 = vadd.f32 %v5001_v13, %v4732_v5  ;;  %v4736_v52 = vpop.f32.mrf.mxu0 }
 0x582   : > { %v4737_v31 = vadd.f32 %v4736_v52, %v10408_v17  ;;  %v6692_v20 = vpop.f32.mrf.mxu1 }
 0x583   : > { %5219 = vst.msk [vmem:[%s10519_s15 + $0x40] sm:$0xff] %vm5210_vm6, %v5184_v55  ;;  %v5151_v43 = vadd.f32 %v10510_v18, %v5110_v33  ;;  %v6619_v45 = vpop.f32.mrf.mxu0 }
 0x584   : > { %v5006_v24 = vpop.f32.mrf.mxu1 }
 0x585   : > { %v5185_v37 = vmax.f32 %v5151_v43, 0.0  ;;  %v5111_v42 = vadd.f32 %v5006_v24, %v4737_v31  ;;  %v4739_v50 = vpop.f32.mrf.mxu0 }
 0x586   : > { %v4740_v1 = vadd.f32 %v4739_v50, %v10416_v61  ;;  %v6695_v34 = vpop.f32.mrf.mxu1 }
 0x587   : > { %5220 = vst.msk [vmem:[%s10519_s15 + $0x48] sm:$0xff] %vm5210_vm6, %v5185_v37  ;;  %v5152_v39 = vadd.f32 %v10510_v18, %v5111_v42  ;;  %v6620_v60 = vpop.f32.mrf.mxu0 }
 0x588   : > { %v5009_v17 = vpop.f32.mrf.mxu1 }
 0x589   : > { %v5186_v15 = vmax.f32 %v5152_v39, 0.0  ;;  %v5112_v19 = vadd.f32 %v5009_v17, %v4740_v1  ;;  %v4744_v26 = vpop.f32.mrf.mxu0 }
 0x58a   : > { %v4745_v40 = vadd.f32 %v4744_v26, %v10424_v44  ;;  %v6696_v32 = vpop.f32.mrf.mxu1 }
 0x58b   : > { %5221 = vst.msk [vmem:[%s10519_s15 + $0x50] sm:$0xff] %vm5210_vm6, %v5186_v15  ;;  %v5153_v6 = vadd.f32 %v10510_v18, %v5112_v19  ;;  %v6623_v51 = vpop.f32.mrf.mxu0 }
 0x58c   : > { %v5014_v61 = vpop.f32.mrf.mxu1 }
 0x58d   : > { %v5187_v23 = vmax.f32 %v5153_v6, 0.0  ;;  %v5113_v4 = vadd.f32 %v5014_v61, %v4745_v40  ;;  %v4747_v22 = vpop.f32.mrf.mxu0 }
 0x58e   : > { %v4748_v54 = vadd.f32 %v4747_v22, %v10432_v59  ;;  %v6699_v27 = vpop.f32.mrf.mxu1 }
 0x58f   : > { %5222 = vst.msk [vmem:[%s10519_s15 + $0x58] sm:$0xff] %vm5210_vm6, %v5187_v23  ;;  %v5154_v30 = vadd.f32 %v10510_v18, %v5113_v4  ;;  %v6624_v53 = vpop.f32.mrf.mxu0 }
 0x590   : > { %v5017_v44 = vpop.f32.mrf.mxu1 }
 0x591   : > { %v5188_v3 = vmax.f32 %v5154_v30, 0.0  ;;  %v5114_v56 = vadd.f32 %v5017_v44, %v4748_v54  ;;  %v4752_v38 = vpop.f32.mrf.mxu0 }
 0x592   : > { %v4753_v35 = vadd.f32 %v4752_v38, %v10440_v7  ;;  %v6700_v2 = vpop.f32.mrf.mxu1 }
 0x593   : > { %5223 = vst.msk [vmem:[%s10519_s15 + $0x60] sm:$0xff] %vm5210_vm6, %v5188_v3  ;;  %v5155_v5 = vadd.f32 %v10510_v18, %v5114_v56  ;;  %v6627_v46 = vpop.f32.mrf.mxu0 }
 0x594   : > { %v5022_v59 = vpop.f32.mrf.mxu1 }
 0x595   : > { %v5189_v29 = vmax.f32 %v5155_v5, 0.0  ;;  %v5115_v25 = vadd.f32 %v5022_v59, %v4753_v35  ;;  %v4755_v13 = vpop.f32.mrf.mxu0 }
 0x596   : > { %v4756_v55 = vadd.f32 %v4755_v13, %v10448_v21  ;;  %v6703_v33 = vpop.f32.mrf.mxu1 }
 0x597   : > { %5224 = vst.msk [vmem:[%s10519_s15 + $0x68] sm:$0xff] %vm5210_vm6, %v5189_v29  ;;  %v5156_v52 = vadd.f32 %v10510_v18, %v5115_v25  ;;  %v6628_v31 = vpop.f32.mrf.mxu0 }
 0x598   : > { %v5025_v7 = vpop.f32.mrf.mxu1 }
 0x599   : > { %v5190_v20 = vmax.f32 %v5156_v52, 0.0  ;;  %v5116_v43 = vadd.f32 %v5025_v7, %v4756_v55  ;;  %v4760_v45 = vpop.f32.mrf.mxu0 }
 0x59a   : > { %v4761_v24 = vadd.f32 %v4760_v45, %v10456_v36  ;;  %v6704_v37 = vpop.f32.mrf.mxu1 }
 0x59b   : > { %5225 = vst.msk [vmem:[%s10519_s15 + $0x70] sm:$0xff] %vm5210_vm6, %v5190_v20  ;;  %v5157_v42 = vadd.f32 %v10510_v18, %v5116_v43  ;;  %v6631_v50 = vpop.f32.mrf.mxu0 }
 0x59c   : > { %v5030_v21 = vpop.f32.mrf.mxu1 }
 0x59d   : > { %v5191_v1 = vmax.f32 %v5157_v42, 0.0  ;;  %v5117_v34 = vadd.f32 %v5030_v21, %v4761_v24  ;;  %v4763_v39 = vpop.f32.mrf.mxu0 }
 0x59e   : > { %v4764_v60 = vadd.f32 %v4763_v39, %v10464_v28  ;;  %v6707_v17 = vpop.f32.mrf.mxu1 }
 0x59f   : > { %5226 = vst.msk [vmem:[%s10519_s15 + $0x78] sm:$0xff] %vm5210_vm6, %v5191_v1  ;;  %v5158_v15 = vadd.f32 %v10510_v18, %v5117_v34  ;;  %v6632_v19 = vpop.f32.mrf.mxu0 }
 0x5a0   : > { %v5033_v36 = vpop.f32.mrf.mxu1 }
 0x5a1   : > { %v5192_v26 = vmax.f32 %v5158_v15, 0.0  ;;  %v5118_v40 = vadd.f32 %v5033_v36, %v4764_v60  ;;  %v4768_v32 = vpop.f32.mrf.mxu0 }
 0x5a2   : > { %v4769_v6 = vadd.f32 %v4768_v32, %v10470_v48  ;;  %v6708_v51 = vpop.f32.mrf.mxu1 }
 0x5a3   : > { %5227 = vst.msk [vmem:[%s10519_s15 + $0x80] sm:$0xff] %vm5210_vm6, %v5192_v26  ;;  %v5159_v61 = vadd.f32 %v10510_v18, %v5118_v40  ;;  %v6635_v23 = vpop.f32.mrf.mxu0 }
 0x5a4   : > { %v5038_v28 = vpop.f32.mrf.mxu1 }
 0x5a5   : > { %v5193_v4 = vmax.f32 %v5159_v61, 0.0  ;;  %v5119_v22 = vadd.f32 %v5038_v28, %v4769_v6  ;;  %v4771_v54 = vpop.f32.mrf.mxu0 }
 0x5a6   : > { %v4772_v27 = vadd.f32 %v4771_v54, %v10476_v0  ;;  %v6711_v30 = vpop.f32.mrf.mxu1 }
 0x5a7   : > { %5228 = vst.msk [vmem:[%s10519_s15 + $0x88] sm:$0xff] %vm5210_vm6, %v5193_v4  ;;  %v5160_v53 = vadd.f32 %v10510_v18, %v5119_v22  ;;  %v6636_v44 = vpop.f32.mrf.mxu0 }
 0x5a8   : > { %v5041_v48 = vpop.f32.mrf.mxu1 }
 0x5a9   : > { %v5194_v3 = vmax.f32 %v5160_v53, 0.0  ;;  %v5120_v56 = vadd.f32 %v5041_v48, %v4772_v27  ;;  %v4776_v38 = vpop.f32.mrf.mxu0 }
 0x5aa   : > { %v4777_v35 = vadd.f32 %v4776_v38, %v10478_v16  ;;  %v6712_v2 = vpop.f32.mrf.mxu1 }
 0x5ab   : > { %5229 = vst.msk [vmem:[%s10519_s15 + $0x90] sm:$0xff] %vm5210_vm6, %v5194_v3  ;;  %v5161_v5 = vadd.f32 %v10510_v18, %v5120_v56  ;;  %v6639_v46 = vpop.f32.mrf.mxu0 }
 0x5ac   : > { %v5046_v0 = vpop.f32.mrf.mxu1 }
 0x5ad   : > { %v5195_v59 = vmax.f32 %v5161_v5, 0.0  ;;  %v5121_v29 = vadd.f32 %v5046_v0, %v4777_v35  ;;  %v4779_v25 = vpop.f32.mrf.mxu0 }
 0x5ae   : > { %v4780_v13 = vadd.f32 %v4779_v25, %v10480_v47  ;;  %v6715_v55 = vpop.f32.mrf.mxu1 }
 0x5af   : > { %5230 = vst.msk [vmem:[%s10519_s15 + $0x98] sm:$0xff] %vm5210_vm6, %v5195_v59  ;;  %v5162_v33 = vadd.f32 %v10510_v18, %v5121_v29  ;;  %v6640_v52 = vpop.f32.mrf.mxu0 }
 0x5b0   : > { %v5049_v16 = vpop.f32.mrf.mxu1 }
 0x5b1   : > { %v5196_v31 = vmax.f32 %v5162_v33, 0.0  ;;  %v5122_v7 = vadd.f32 %v5049_v16, %v4780_v13  ;;  %v4784_v20 = vpop.f32.mrf.mxu0 }
 0x5b2   : > { %v4785_v43 = vadd.f32 %v4784_v20, %v10482_v11  ;;  %v6716_v45 = vpop.f32.mrf.mxu1 }
 0x5b3   : > { %5231 = vst.msk [vmem:[%s10519_s15 + $0xa0] sm:$0xff] %vm5210_vm6, %v5196_v31  ;;  %v5163_v24 = vadd.f32 %v10510_v18, %v5122_v7  ;;  %v6643_v37 = vpop.f32.mrf.mxu0 }
 0x5b4   : > { %v5054_v47 = vpop.f32.mrf.mxu1 }
 0x5b5   : > { %v5197_v42 = vmax.f32 %v5163_v24, 0.0  ;;  %v5123_v50 = vadd.f32 %v5054_v47, %v4785_v43  ;;  %v4787_v21 = vpop.f32.mrf.mxu0 }
 0x5b6   : > { %v4788_v1 = vadd.f32 %v4787_v21, %v10484_v10  ;;  %v6719_v34 = vpop.f32.mrf.mxu1 }
 0x5b7   : > { %5232 = vst.msk [vmem:[%s10519_s15 + $0xa8] sm:$0xff] %vm5210_vm6, %v5197_v42  ;;  %v5164_v39 = vadd.f32 %v10510_v18, %v5123_v50  ;;  %v6644_v60 = vpop.f32.mrf.mxu0 }
 0x5b8   : > { %v5057_v11 = vpop.f32.mrf.mxu1 }
 0x5b9   : > { %v5198_v17 = vmax.f32 %v5164_v39, 0.0  ;;  %v5124_v15 = vadd.f32 %v5057_v11, %v4788_v1  ;;  %v4792_v19 = vpop.f32.mrf.mxu0 }
 0x5ba   : > { %v4793_v36 = vadd.f32 %v4792_v19, %v10486_v63  ;;  %v6720_v26 = vpop.f32.mrf.mxu1 }
 0x5bb   : > { %5233 = vst.msk [vmem:[%s10519_s15 + $0xb0] sm:$0xff] %vm5210_vm6, %v5198_v17  ;;  %v5165_v40 = vadd.f32 %v10510_v18, %v5124_v15  ;;  %v6647_v32 = vpop.f32.mrf.mxu0 }
 0x5bc   : > { %v5062_v10 = vpop.f32.mrf.mxu1 }
 0x5bd   : > { %v5199_v6 = vmax.f32 %v5165_v40, 0.0  ;;  %v5125_v51 = vadd.f32 %v5062_v10, %v4793_v36  ;;  %v4795_v61 = vpop.f32.mrf.mxu0 }
 0x5be   : > { %v4796_v23 = vadd.f32 %v4795_v61, %v10488_v12  ;;  %v6723_v28 = vpop.f32.mrf.mxu1 }
 0x5bf   : > { %5234 = vst.msk [vmem:[%s10519_s15 + $0xb8] sm:$0xff] %vm5210_vm6, %v5199_v6  ;;  %v5166_v4 = vadd.f32 %v10510_v18, %v5125_v51  ;;  %v6648_v22 = vpop.f32.mrf.mxu0 }
 0x5c0   : > { %v5065_v63 = vpop.f32.mrf.mxu1 }
 0x5c1   : > { %v5200_v54 = vmax.f32 %v5166_v4, 0.0  ;;  %v5126_v27 = vadd.f32 %v5065_v63, %v4796_v23  ;;  %v4800_v30 = vpop.f32.mrf.mxu0 }
 0x5c2   : > { %v4801_v53 = vadd.f32 %v4800_v30, %v10490_v8  ;;  %v6724_v44 = vpop.f32.mrf.mxu1 }
 0x5c3   : > { %5235 = vst.msk [vmem:[%s10519_s15 + $0xc0] sm:$0xff] %vm5210_vm6, %v5200_v54  ;;  %v5167_v48 = vadd.f32 %v10510_v18, %v5126_v27  ;;  %v6651_v3 = vpop.f32.mrf.mxu0 }
 0x5c4   : > { %v5070_v12 = vpop.f32.mrf.mxu1 }
 0x5c5   : > { %v5201_v56 = vmax.f32 %v5167_v48, 0.0  ;;  %v5127_v38 = vadd.f32 %v5070_v12, %v4801_v53  ;;  %v4803_v35 = vpop.f32.mrf.mxu0 }
 0x5c6   : > { %v4804_v2 = vadd.f32 %v4803_v35, %v10492_v57  ;;  %v6727_v5 = vpop.f32.mrf.mxu1 }
 0x5c7   : > { %5236 = vst.msk [vmem:[%s10519_s15 + $0xc8] sm:$0xff] %vm5210_vm6, %v5201_v56  ;;  %v5168_v46 = vadd.f32 %v10510_v18, %v5127_v38  ;;  %v6652_v0 = vpop.f32.mrf.mxu0 }
 0x5c8   : > { %v5073_v8 = vpop.f32.mrf.mxu1 }
 0x5c9   : > { %v5202_v59 = vmax.f32 %v5168_v46, 0.0  ;;  %v5128_v29 = vadd.f32 %v5073_v8, %v4804_v2  ;;  %v4808_v25 = vpop.f32.mrf.mxu0 }
 0x5ca   : > { %v4809_v13 = vadd.f32 %v4808_v25, %v10494_v49  ;;  %v6728_v55 = vpop.f32.mrf.mxu1 }
 0x5cb   : > { %5237 = vst.msk [vmem:[%s10519_s15 + $0xd0] sm:$0xff] %vm5210_vm6, %v5202_v59  ;;  %v5169_v33 = vadd.f32 %v10510_v18, %v5128_v29  ;;  %v6655_v52 = vpop.f32.mrf.mxu0 }
 0x5cc   : > { %v5078_v57 = vpop.f32.mrf.mxu1 }
 0x5cd   : > { %v5203_v16 = vmax.f32 %v5169_v33, 0.0  ;;  %v5129_v31 = vadd.f32 %v5078_v57, %v4809_v13  ;;  %v4811_v7 = vpop.f32.mrf.mxu0 }
 0x5ce   : > { %v4812_v20 = vadd.f32 %v4811_v7, %v10496_v62  ;;  %v6731_v43 = vpop.f32.mrf.mxu1 }
 0x5cf   : > { %5238 = vst.msk [vmem:[%s10519_s15 + $0xd8] sm:$0xff] %vm5210_vm6, %v5203_v16  ;;  %v5170_v45 = vadd.f32 %v10510_v18, %v5129_v31  ;;  %v6656_v24 = vpop.f32.mrf.mxu0 }
 0x5d0   : > { %v5081_v49 = vpop.f32.mrf.mxu1 }
 0x5d1   : > { %v5204_v37 = vmax.f32 %v5170_v45, 0.0  ;;  %v5130_v47 = vadd.f32 %v5081_v49, %v4812_v20  ;;  %v4816_v42 = vpop.f32.mrf.mxu0 }
 0x5d2   : > { %v4817_v50 = vadd.f32 %v4816_v42, %v10498_v41  ;;  %v6732_v21 = vpop.f32.mrf.mxu1 }
 0x5d3   : > { %5239 = vst.msk [vmem:[%s10519_s15 + $0xe0] sm:$0xff] %vm5210_vm6, %v5204_v37  ;;  %v5171_v1 = vadd.f32 %v10510_v18, %v5130_v47  ;;  %v6659_v34 = vpop.f32.mrf.mxu0 }
 0x5d4   : > { %v5086_v62 = vpop.f32.mrf.mxu1 }
 0x5d5   : > { %v5205_v39 = vmax.f32 %v5171_v1, 0.0  ;;  %v5131_v60 = vadd.f32 %v5086_v62, %v4817_v50  ;;  %v4819_v11 = vpop.f32.mrf.mxu0 }
 0x5d6   : > { %v4820_v17 = vadd.f32 %v4819_v11, %v10500_v9  ;;  %v6735_v15 = vpop.f32.mrf.mxu1 }
 0x5d7   : > { %5240 = vst.msk [vmem:[%s10519_s15 + $0xe8] sm:$0xff] %vm5210_vm6, %v5205_v39  ;;  %v5172_v19 = vadd.f32 %v10510_v18, %v5131_v60  ;;  %v6660_v36 = vpop.f32.mrf.mxu0 }
 0x5d8   : > { %v5089_v41 = vpop.f32.mrf.mxu1 }
 0x5d9   : > { %v5206_v26 = vmax.f32 %v5172_v19, 0.0  ;;  %v5132_v40 = vadd.f32 %v5089_v41, %v4820_v17  ;;  %v4824_v32 = vpop.f32.mrf.mxu0 }
 0x5da   : > { %v4825_v10 = vadd.f32 %v4824_v32, %v10502_v58  ;;  %v6736_v6 = vpop.f32.mrf.mxu1 }
 0x5db   : > { %5241 = vst.msk [vmem:[%s10519_s15 + $0xf0] sm:$0xff] %vm5210_vm6, %v5206_v26  ;;  %v5173_v51 = vadd.f32 %v10510_v18, %v5132_v40  ;;  %v6663_v9 = vpop.f32.mrf.mxu0 }
 0x5dc   : > { %v5094_v61 = vpop.f32.mrf.mxu1 }
 0x5dd   : > { %v5207_v23 = vmax.f32 %v5173_v51, 0.0  ;;  %v5133_v28 = vadd.f32 %v5094_v61, %v4825_v10  ;;  %v4827_v4 = vpop.f32.mrf.mxu0 }
 0x5de   : > { %v4828_v22 = vadd.f32 %v4827_v4, %v10504_v14  ;;  %v6739_v63 = vpop.f32.mrf.mxu1 }
 0x5df   : > { %5242 = vst.msk [vmem:[%s10519_s15 + $0xf8] sm:$0xff] %vm5210_vm6, %v5207_v23  ;;  %v5174_v54 = vadd.f32 %v10510_v18, %v5133_v28  ;;  %v6664_v58 = vpop.f32.mrf.mxu0 }
 0x5e0   : > { %v5097_v27 = vpop.f32.mrf.mxu1 }
 0x5e1   : > { %v5208_v30 = vmax.f32 %v5174_v54, 0.0  ;;  %v5134_v53 = vadd.f32 %v5097_v27, %v4828_v22 }
 0x5e2   : > { %v6740_v44 = vpop.f32.mrf.mxu1 }
 0x5e3   : > { %5243 = vst.msk [vmem:[%s10519_s15 + $0x100] sm:$0xff] %vm5210_vm6, %v5208_v30  ;;  %v5175_v48 = vadd.f32 %v10510_v18, %v5134_v53 }
 0x5e5   : > { %v5209_v3 = vmax.f32 %v5175_v48, 0.0 }
 0x5e7   : > { %5244 = vst.msk [vmem:[%s10519_s15 + $0x108] sm:$0xff] %vm5210_vm6, %v5209_v3 }
 0x5e8 PF: > { %s21_s17 = sadd.s32 1, %s6798_s17  }
 0x5e9   : > { %p18_p4 = scmp.ge.s32.totalorder %s21_s17, 4  }
 0x5eb   :  { %20 = sbr.rel (!%p18_p4) target bundleno = 1 (0x1), region = 102 }

</bundles_post_ra>
